<compile_context>
chip_gen: v7x
topology: tpu7x:2x2x1
jax: 0.10.0
libtpu: 0.0.40
codegen_flags: <defaults>
</compile_context>

<pallas_src>
import math
from functools import partial

import jax
import jax.numpy as jnp
from jax.experimental import pallas as pl
from jax.experimental.pallas import tpu as pltpu

EPS = 1e-6  # nn.LayerNorm(eps=1e-6)


# ----------------------------- fused Pallas kernel --------------------------- #

def encoder_stack_kernel(x_ref, enc_ref, mask_ref,
                         ln_g_ref, ln_b_ref,
                         attn_w_ref, attn_b_ref,
                         ffn_w1_ref, ffn_b1_ref, ffn_w2_ref, ffn_b2_ref,
                         o_ref, *, num_heads, num_layers):
    # x_ref:   (1, T, D)   current batch element's query embeddings (+PE)
    # enc_ref: (1, S, D)   encoder output (memory)
    # mask_ref:(1, 1, S)   source mask (1 valid / 0 padded)
    # ln_g/b:  (3L+1, D)   [ln1, ln2, ffn_ln] per layer, then final LN
    # attn_w:  (L*8, D, D) per layer: self[q,k,v,o] then cross[q,k,v,o]
    # attn_b:  (L*8, D)
    # ffn_w1:  (L, D, F), ffn_b1: (L, F), ffn_w2: (L, F, D), ffn_b2: (L, D)
    x = x_ref[0]                                      # (T, D)
    enc = enc_ref[0]                                  # (S, D)
    src_bias = (1.0 - mask_ref[0]) * (-1e9)           # (1, S) additive key bias

    T, D = x.shape
    hd = D // num_heads
    scale = 1.0 / math.sqrt(hd)

    def layer_norm(v, idx):
        g = ln_g_ref[idx:idx + 1, :]                  # (1, D)
        b = ln_b_ref[idx:idx + 1, :]                  # (1, D)
        mu = jnp.mean(v, axis=-1, keepdims=True)
        var = jnp.mean((v - mu) ** 2, axis=-1, keepdims=True)
        return (v - mu) * jax.lax.rsqrt(var + EPS) * g + b

    def mha(xq, xkv, bias, base):
        # base = index of W_q within the attn_w stack; bias is None (self) or (1,S)
        q = jnp.dot(xq, attn_w_ref[base + 0],
                    preferred_element_type=jnp.float32) + attn_b_ref[base:base + 1, :]
        k = jnp.dot(xkv, attn_w_ref[base + 1],
                    preferred_element_type=jnp.float32) + attn_b_ref[base + 1:base + 2, :]
        v = jnp.dot(xkv, attn_w_ref[base + 2],
                    preferred_element_type=jnp.float32) + attn_b_ref[base + 2:base + 3, :]
        wo = attn_w_ref[base + 3]                                        # (D, D)
        bo = attn_b_ref[base + 3:base + 4, :]                            # (1, D)

        out = jnp.zeros((xq.shape[0], D), jnp.float32)
        for h in range(num_heads):                    # static unroll, tiny heads
            qh = q[:, h * hd:(h + 1) * hd] * scale    # (T, hd)
            kh = k[:, h * hd:(h + 1) * hd]            # (S, hd)
            vh = v[:, h * hd:(h + 1) * hd]            # (S, hd)
            # q @ k^T without materializing the transpose.
            scores = jax.lax.dot_general(
                qh, kh, (((1,), (1,)), ((), ())),
                preferred_element_type=jnp.float32)   # (T, S)
            if bias is not None:
                scores = scores + bias
            scores = scores - jnp.max(scores, axis=-1, keepdims=True)
            e = jnp.exp(scores)
            attn = e * pl.reciprocal(jnp.sum(e, axis=-1, keepdims=True), approx=True)
            ctx_h = jnp.dot(attn, vh, preferred_element_type=jnp.float32)      # (T, hd)
            # accumulate straight into the lane-dense (T, D) output: ctx @ W_o
            out = out + jnp.dot(ctx_h, wo[h * hd:(h + 1) * hd, :],
                                preferred_element_type=jnp.float32)
        return out + bo

    for l in range(num_layers):
        # --- self-attention block (trg_mask=None -> no mask path) ---
        xn = layer_norm(x, 3 * l + 0)
        h1 = mha(xn, xn, None, l * 8 + 0) + x
        # --- cross-attention block (encoder memory, src_mask) ---
        h1n = layer_norm(h1, 3 * l + 1)
        h2 = mha(h1n, enc, src_bias, l * 8 + 4) + h1
        # --- position-wise feed-forward: LN -> Linear -> ReLU -> Linear, + residual
        hn = layer_norm(h2, 3 * l + 2)
        hmid = jnp.dot(hn, ffn_w1_ref[l],
                       preferred_element_type=jnp.float32) + ffn_b1_ref[l:l + 1, :]
        hmid = jnp.maximum(hmid, 0.0)
        x = jnp.dot(hmid, ffn_w2_ref[l],
                    preferred_element_type=jnp.float32) + ffn_b2_ref[l:l + 1, :] + h2

    o_ref[0] = layer_norm(x, 3 * num_layers)          # final LayerNorm


# ----------------------------- pallas_call wrapper --------------------------- #

def _full_spec(a):
    nd = a.ndim
    return pl.BlockSpec(a.shape, lambda b, _nd=nd: (0,) * _nd)


def query_transformer_encoder(trg_embed, encoder_output, src_mask, params,
                              num_heads, num_layers):
    B, T, D = trg_embed.shape
    S = encoder_output.shape[1]

    # glue: positional encoding add (emb_dropout = identity at inference)
    x = trg_embed + positional_encoding(T, D)[None]

    kernel = partial(encoder_stack_kernel, num_heads=num_heads, num_layers=num_layers)
    return pl.pallas_call(
        kernel,
        out_shape=jax.ShapeDtypeStruct((B, T, D), jnp.float32),
        grid=(B,),
        in_specs=[
            pl.BlockSpec((1, T, D), lambda b: (b, 0, 0)),
            pl.BlockSpec((1, S, D), lambda b: (b, 0, 0)),
            pl.BlockSpec((1, 1, S), lambda b: (b, 0, 0)),
            _full_spec(params["ln_g"]), _full_spec(params["ln_b"]),
            _full_spec(params["attn_w"]), _full_spec(params["attn_b"]),
            _full_spec(params["ffn_w1"]), _full_spec(params["ffn_b1"]),
            _full_spec(params["ffn_w2"]), _full_spec(params["ffn_b2"]),
        ],
        out_specs=pl.BlockSpec((1, T, D), lambda b: (b, 0, 0)),
        compiler_params=pltpu.CompilerParams(dimension_semantics=("parallel",)),
    )(x, encoder_output, src_mask,
      params["ln_g"], params["ln_b"],
      params["attn_w"], params["attn_b"],
      params["ffn_w1"], params["ffn_b1"],
      params["ffn_w2"], params["ffn_b2"])


# ----------------------------- model glue ------------------------------------ #

def positional_encoding(T, D):
    pos = jnp.arange(T, dtype=jnp.float32)[:, None]
    div = jnp.exp(jnp.arange(0, D, 2, dtype=jnp.float32) * -(math.log(10000.0) / D))
    pe = jnp.zeros((T, D), jnp.float32)
    pe = pe.at[:, 0::2].set(jnp.sin(pos * div))
    pe = pe.at[:, 1::2].set(jnp.cos(pos * div))
    return pe


# ----------------------------- pure-JAX reference ----------------------------- #

def _ref_forward(trg_embed, enc, src_mask, params, num_heads, num_layers):
    def ln(x, g, b):
        mu = x.mean(-1, keepdims=True)
        var = ((x - mu) ** 2).mean(-1, keepdims=True)
        return (x - mu) * jax.lax.rsqrt(var + EPS) * g + b

    B, T, D = trg_embed.shape
    hd = D // num_heads

    def mha(xq, xkv, mask, base):
        wq, wk, wv, wo = (params["attn_w"][base + i] for i in range(4))
        bq, bk, bv, bo = (params["attn_b"][base + i] for i in range(4))
        Tq, Sk = xq.shape[1], xkv.shape[1]
        q = (xq @ wq + bq).reshape(B, Tq, num_heads, hd).transpose(0, 2, 1, 3)
        k = (xkv @ wk + bk).reshape(B, Sk, num_heads, hd).transpose(0, 2, 1, 3)
        v = (xkv @ wv + bv).reshape(B, Sk, num_heads, hd).transpose(0, 2, 1, 3)
        scores = (q / math.sqrt(hd)) @ k.transpose(0, 1, 3, 2)
        if mask is not None:
            scores = scores + (1.0 - mask[:, None, :, :]) * (-1e9)
        attn = jax.nn.softmax(scores, axis=-1)
        ctx = (attn @ v).transpose(0, 2, 1, 3).reshape(B, Tq, D)
        return ctx @ wo + bo

    x = trg_embed + positional_encoding(T, D)[None]
    for l in range(num_layers):
        def g(i): return params["ln_g"][i][None, None, :]
        def b(i): return params["ln_b"][i][None, None, :]
        xn = ln(x, g(3 * l + 0), b(3 * l + 0))
        h1 = mha(xn, xn, None, l * 8 + 0) + x
        h1n = ln(h1, g(3 * l + 1), b(3 * l + 1))
        h2 = mha(h1n, enc, src_mask, l * 8 + 4) + h1
        hn = ln(h2, g(3 * l + 2), b(3 * l + 2))
        x = (jnp.maximum(hn @ params["ffn_w1"][l] + params["ffn_b1"][l], 0.0)
             @ params["ffn_w2"][l] + params["ffn_b2"][l]) + h2
    return ln(x, params["ln_g"][3 * num_layers][None, None, :],
              params["ln_b"][3 * num_layers][None, None, :])


# ----------------------------- params init ------------------------------------ #

def init_params(key, num_layers, D, F):
    keyring = [key]

    def nk():
        keyring[0], sub = jax.random.split(keyring[0])
        return sub

    def w(shape): return 0.02 * jax.random.normal(nk(), shape, jnp.float32)
    def b(shape): return 0.01 * jax.random.normal(nk(), shape, jnp.float32)

    return dict(
        # layer l rows: [ln1, ln2, ffn_ln]; last row = final LayerNorm
        ln_g=1.0 + 0.05 * jax.random.normal(nk(), (3 * num_layers + 1, D), jnp.float32),
        ln_b=0.05 * jax.random.normal(nk(), (3 * num_layers + 1, D), jnp.float32),
        # layer l rows: self[q,k,v,o] then cross[q,k,v,o]
        attn_w=w((num_layers * 8, D, D)),
        attn_b=b((num_layers * 8, D)),
        ffn_w1=w((num_layers, D, F)),
        ffn_b1=b((num_layers, F)),
        ffn_w2=w((num_layers, F, D)),
        ffn_b2=b((num_layers, D)),
    )


# ----------------------------- main -------------------------------------------- #

if __name__ == "__main__":
    B, T, S = 2, 8, 16           # batch, target (query) length, source length
    D, H, F, L = 32, 4, 64, 2    # hidden, heads, ff_size, num_layers

    key = jax.random.PRNGKey(0)
    k_emb, k_enc, k_par = jax.random.split(key, 3)

    trg_embed = jax.random.normal(k_emb, (B, T, D), jnp.float32)
    encoder_output = jax.random.normal(k_enc, (B, S, D), jnp.float32)
    # src_mask: first example all valid, second has 4 padded source positions
    lens = jnp.array([S, S - 4])
    src_mask = (jnp.arange(S)[None, :] < lens[:, None]).astype(jnp.float32)[:, None, :]

    params = init_params(k_par, L, D, F)

    out = query_transformer_encoder(trg_embed, encoder_output, src_mask, params, H, L)
    out = jax.block_until_ready(out)

    ref = _ref_forward(trg_embed, encoder_output, src_mask, params, H, L)
    assert out.shape == (B, T, D)
    max_err = float(jnp.max(jnp.abs(out - ref)))
    # approx reciprocal in the softmax denominator => slightly relaxed tolerance
    assert jnp.allclose(out, ref, rtol=1e-3, atol=1e-3), f"mismatch (max err {max_err})"

    print("KERNEL_OK")
</pallas_src>

<mosaic_0001>
module attributes {stable_mosaic.version = 11 : i64} {
  func.func @encoder_stack_kernel(%arg0: i32, %arg1: memref<1x8x32xf32, #tpu.memory_space<vmem>>, %arg2: memref<1x16x32xf32, #tpu.memory_space<vmem>>, %arg3: memref<1x1x16xf32, #tpu.memory_space<vmem>>, %arg4: memref<7x32xf32, #tpu.memory_space<vmem>>, %arg5: memref<7x32xf32, #tpu.memory_space<vmem>>, %arg6: memref<16x32x32xf32, #tpu.memory_space<vmem>>, %arg7: memref<16x32xf32, #tpu.memory_space<vmem>>, %arg8: memref<2x32x64xf32, #tpu.memory_space<vmem>>, %arg9: memref<2x64xf32, #tpu.memory_space<vmem>>, %arg10: memref<2x64x32xf32, #tpu.memory_space<vmem>>, %arg11: memref<2x32xf32, #tpu.memory_space<vmem>>, %arg12: memref<1x8x32xf32, #tpu.memory_space<vmem>>) attributes {dimension_semantics = [#tpu.dimension_semantics<parallel>], iteration_bounds = array<i64: 2>, scalar_prefetch = 0 : i64, scratch_operands = 0 : i64, tpu.core_type = #tpu.core_type<tc>, window_params = [{transform_indices = @transform_0, window_bounds = array<i64: 1, 8, 32>}, {transform_indices = @transform_1, window_bounds = array<i64: 1, 16, 32>}, {transform_indices = @transform_2, window_bounds = array<i64: 1, 1, 16>}, {pipeline_mode = #tpu.pipeline_mode<synchronous>, transform_indices = @transform_3, window_bounds = array<i64: 7, 32>}, {pipeline_mode = #tpu.pipeline_mode<synchronous>, transform_indices = @transform_4, window_bounds = array<i64: 7, 32>}, {pipeline_mode = #tpu.pipeline_mode<synchronous>, transform_indices = @transform_5, window_bounds = array<i64: 16, 32, 32>}, {pipeline_mode = #tpu.pipeline_mode<synchronous>, transform_indices = @transform_6, window_bounds = array<i64: 16, 32>}, {pipeline_mode = #tpu.pipeline_mode<synchronous>, transform_indices = @transform_7, window_bounds = array<i64: 2, 32, 64>}, {pipeline_mode = #tpu.pipeline_mode<synchronous>, transform_indices = @transform_8, window_bounds = array<i64: 2, 64>}, {pipeline_mode = #tpu.pipeline_mode<synchronous>, transform_indices = @transform_9, window_bounds = array<i64: 2, 64, 32>}, {pipeline_mode = #tpu.pipeline_mode<synchronous>, transform_indices = @transform_10, window_bounds = array<i64: 2, 32>}, {transform_indices = @transform_11, window_bounds = array<i64: 1, 8, 32>}]} {
    %c0 = arith.constant 0 : index
    %c0_0 = arith.constant 0 : index
    %c0_1 = arith.constant 0 : index
    %0 = vector.load %arg1[%c0, %c0_0, %c0_1] : memref<1x8x32xf32, #tpu.memory_space<vmem>>, vector<1x8x32xf32>
    %1 = vector.shape_cast %0 : vector<1x8x32xf32> to vector<8x32xf32>
    %c0_2 = arith.constant 0 : index
    %c0_3 = arith.constant 0 : index
    %c0_4 = arith.constant 0 : index
    %2 = vector.load %arg2[%c0_2, %c0_3, %c0_4] : memref<1x16x32xf32, #tpu.memory_space<vmem>>, vector<1x16x32xf32>
    %3 = vector.shape_cast %2 : vector<1x16x32xf32> to vector<16x32xf32>
    %c0_5 = arith.constant 0 : index
    %c0_6 = arith.constant 0 : index
    %c0_7 = arith.constant 0 : index
    %4 = vector.load %arg3[%c0_5, %c0_6, %c0_7] : memref<1x1x16xf32, #tpu.memory_space<vmem>>, vector<1x1x16xf32>
    %5 = vector.shape_cast %4 : vector<1x1x16xf32> to vector<1x16xf32>
    %cst = arith.constant 1.000000e+00 : f32
    %6 = vector.broadcast %cst : f32 to vector<1x16xf32>
    %7 = arith.subf %6, %5 : vector<1x16xf32>
    %cst_8 = arith.constant -1.000000e+09 : f32
    %8 = vector.broadcast %cst_8 : f32 to vector<1x16xf32>
    %9 = arith.mulf %7, %8 : vector<1x16xf32>
    %c0_9 = arith.constant 0 : index
    %c0_10 = arith.constant 0 : index
    %10 = vector.load %arg4[%c0_9, %c0_10] : memref<7x32xf32, #tpu.memory_space<vmem>>, vector<1x32xf32>
    %c0_11 = arith.constant 0 : index
    %c0_12 = arith.constant 0 : index
    %11 = vector.load %arg5[%c0_11, %c0_12] : memref<7x32xf32, #tpu.memory_space<vmem>>, vector<1x32xf32>
    %cst_13 = arith.constant dense<0.000000e+00> : vector<8xf32>
    %12 = vector.multi_reduction <add>, %1, %cst_13 [1] : vector<8x32xf32> to vector<8xf32>
    %13 = vector.shape_cast %12 : vector<8xf32> to vector<8x1xf32>
    %cst_14 = arith.constant 3.200000e+01 : f32
    %14 = vector.broadcast %cst_14 : f32 to vector<8x1xf32>
    %15 = arith.divf %13, %14 : vector<8x1xf32>
    %16 = vector.broadcast %15 : vector<8x1xf32> to vector<8x32xf32>
    %17 = arith.subf %1, %16 : vector<8x32xf32>
    %18 = arith.mulf %17, %17 : vector<8x32xf32>
    %cst_15 = arith.constant dense<0.000000e+00> : vector<8xf32>
    %19 = vector.multi_reduction <add>, %18, %cst_15 [1] : vector<8x32xf32> to vector<8xf32>
    %20 = vector.shape_cast %19 : vector<8xf32> to vector<8x1xf32>
    %cst_16 = arith.constant 3.200000e+01 : f32
    %21 = vector.broadcast %cst_16 : f32 to vector<8x1xf32>
    %22 = arith.divf %20, %21 : vector<8x1xf32>
    %23 = vector.broadcast %15 : vector<8x1xf32> to vector<8x32xf32>
    %24 = arith.subf %1, %23 : vector<8x32xf32>
    %cst_17 = arith.constant 9.99999997E-7 : f32
    %25 = vector.broadcast %cst_17 : f32 to vector<8x1xf32>
    %26 = arith.addf %22, %25 : vector<8x1xf32>
    %27 = math.rsqrt %26 : vector<8x1xf32>
    %28 = vector.broadcast %27 : vector<8x1xf32> to vector<8x32xf32>
    %29 = arith.mulf %24, %28 : vector<8x32xf32>
    %30 = vector.broadcast %10 : vector<1x32xf32> to vector<8x32xf32>
    %31 = arith.mulf %29, %30 : vector<8x32xf32>
    %32 = vector.broadcast %11 : vector<1x32xf32> to vector<8x32xf32>
    %33 = arith.addf %31, %32 : vector<8x32xf32>
    %c0_18 = arith.constant 0 : index
    %c0_19 = arith.constant 0 : index
    %c0_20 = arith.constant 0 : index
    %34 = vector.load %arg6[%c0_18, %c0_19, %c0_20] : memref<16x32x32xf32, #tpu.memory_space<vmem>>, vector<1x32x32xf32>
    %35 = vector.shape_cast %34 : vector<1x32x32xf32> to vector<32x32xf32>
    %cst_21 = arith.constant dense<0.000000e+00> : vector<8x32xf32>
    %36 = tpu.matmul %33, %35, %cst_21 {dimension_numbers = #tpu.dot_dimension_numbers<[1], [0], [0], [1], [0, 0, 1, 1], [], []>} : vector<8x32xf32>, vector<32x32xf32>, vector<8x32xf32> -> vector<8x32xf32>
    %c0_22 = arith.constant 0 : index
    %c0_23 = arith.constant 0 : index
    %37 = vector.load %arg7[%c0_22, %c0_23] : memref<16x32xf32, #tpu.memory_space<vmem>>, vector<1x32xf32>
    %38 = vector.broadcast %37 : vector<1x32xf32> to vector<8x32xf32>
    %39 = arith.addf %36, %38 : vector<8x32xf32>
    %c1 = arith.constant 1 : index
    %c0_24 = arith.constant 0 : index
    %c0_25 = arith.constant 0 : index
    %40 = vector.load %arg6[%c1, %c0_24, %c0_25] : memref<16x32x32xf32, #tpu.memory_space<vmem>>, vector<1x32x32xf32>
    %41 = vector.shape_cast %40 : vector<1x32x32xf32> to vector<32x32xf32>
    %cst_26 = arith.constant dense<0.000000e+00> : vector<8x32xf32>
    %42 = tpu.matmul %33, %41, %cst_26 {dimension_numbers = #tpu.dot_dimension_numbers<[1], [0], [0], [1], [0, 0, 1, 1], [], []>} : vector<8x32xf32>, vector<32x32xf32>, vector<8x32xf32> -> vector<8x32xf32>
    %c1_27 = arith.constant 1 : index
    %c0_28 = arith.constant 0 : index
    %43 = vector.load %arg7[%c1_27, %c0_28] : memref<16x32xf32, #tpu.memory_space<vmem>>, vector<1x32xf32>
    %44 = vector.broadcast %43 : vector<1x32xf32> to vector<8x32xf32>
    %45 = arith.addf %42, %44 : vector<8x32xf32>
    %c2 = arith.constant 2 : index
    %c0_29 = arith.constant 0 : index
    %c0_30 = arith.constant 0 : index
    %46 = vector.load %arg6[%c2, %c0_29, %c0_30] : memref<16x32x32xf32, #tpu.memory_space<vmem>>, vector<1x32x32xf32>
    %47 = vector.shape_cast %46 : vector<1x32x32xf32> to vector<32x32xf32>
    %cst_31 = arith.constant dense<0.000000e+00> : vector<8x32xf32>
    %48 = tpu.matmul %33, %47, %cst_31 {dimension_numbers = #tpu.dot_dimension_numbers<[1], [0], [0], [1], [0, 0, 1, 1], [], []>} : vector<8x32xf32>, vector<32x32xf32>, vector<8x32xf32> -> vector<8x32xf32>
    %c2_32 = arith.constant 2 : index
    %c0_33 = arith.constant 0 : index
    %49 = vector.load %arg7[%c2_32, %c0_33] : memref<16x32xf32, #tpu.memory_space<vmem>>, vector<1x32xf32>
    %50 = vector.broadcast %49 : vector<1x32xf32> to vector<8x32xf32>
    %51 = arith.addf %48, %50 : vector<8x32xf32>
    %c3 = arith.constant 3 : index
    %c0_34 = arith.constant 0 : index
    %c0_35 = arith.constant 0 : index
    %52 = vector.load %arg6[%c3, %c0_34, %c0_35] : memref<16x32x32xf32, #tpu.memory_space<vmem>>, vector<1x32x32xf32>
    %53 = vector.shape_cast %52 : vector<1x32x32xf32> to vector<32x32xf32>
    %c3_36 = arith.constant 3 : index
    %c0_37 = arith.constant 0 : index
    %54 = vector.load %arg7[%c3_36, %c0_37] : memref<16x32xf32, #tpu.memory_space<vmem>>, vector<1x32xf32>
    %cst_38 = arith.constant 0.000000e+00 : f32
    %55 = vector.broadcast %cst_38 : f32 to vector<8x32xf32>
    %56 = vector.extract_strided_slice %39 {offsets = [0, 0], sizes = [8, 8], strides = [1, 1]} : vector<8x32xf32> to vector<8x8xf32>
    %cst_39 = arith.constant 0.353553385 : f32
    %57 = vector.broadcast %cst_39 : f32 to vector<8x8xf32>
    %58 = arith.mulf %56, %57 : vector<8x8xf32>
    %59 = vector.extract_strided_slice %45 {offsets = [0, 0], sizes = [8, 8], strides = [1, 1]} : vector<8x32xf32> to vector<8x8xf32>
    %60 = vector.extract_strided_slice %51 {offsets = [0, 0], sizes = [8, 8], strides = [1, 1]} : vector<8x32xf32> to vector<8x8xf32>
    %cst_40 = arith.constant dense<0.000000e+00> : vector<8x8xf32>
    %61 = tpu.matmul %58, %59, %cst_40 {dimension_numbers = #tpu.dot_dimension_numbers<[1], [1], [0], [0], [0, 0, 1, 0], [], []>} : vector<8x8xf32>, vector<8x8xf32>, vector<8x8xf32> -> vector<8x8xf32>
    %cst_41 = arith.constant dense<0xFF800000> : vector<8xf32>
    %62 = vector.multi_reduction <maximumf>, %61, %cst_41 [1] : vector<8x8xf32> to vector<8xf32>
    %63 = vector.shape_cast %62 : vector<8xf32> to vector<8x1xf32>
    %64 = vector.broadcast %63 : vector<8x1xf32> to vector<8x8xf32>
    %65 = arith.subf %61, %64 : vector<8x8xf32>
    %66 = math.exp %65 : vector<8x8xf32>
    %cst_42 = arith.constant dense<0.000000e+00> : vector<8xf32>
    %67 = vector.multi_reduction <add>, %66, %cst_42 [1] : vector<8x8xf32> to vector<8xf32>
    %68 = vector.shape_cast %67 : vector<8xf32> to vector<8x1xf32>
    %69 = tpu.reciprocal %68 {approx = true} : vector<8x1xf32> -> vector<8x1xf32>
    %70 = vector.broadcast %69 : vector<8x1xf32> to vector<8x8xf32>
    %71 = arith.mulf %66, %70 : vector<8x8xf32>
    %cst_43 = arith.constant dense<0.000000e+00> : vector<8x8xf32>
    %72 = tpu.matmul %71, %60, %cst_43 {dimension_numbers = #tpu.dot_dimension_numbers<[1], [0], [0], [1], [0, 0, 1, 1], [], []>} : vector<8x8xf32>, vector<8x8xf32>, vector<8x8xf32> -> vector<8x8xf32>
    %73 = vector.extract_strided_slice %53 {offsets = [0, 0], sizes = [8, 32], strides = [1, 1]} : vector<32x32xf32> to vector<8x32xf32>
    %cst_44 = arith.constant dense<0.000000e+00> : vector<8x32xf32>
    %74 = tpu.matmul %72, %73, %cst_44 {dimension_numbers = #tpu.dot_dimension_numbers<[1], [0], [0], [1], [0, 0, 1, 1], [], []>} : vector<8x8xf32>, vector<8x32xf32>, vector<8x32xf32> -> vector<8x32xf32>
    %75 = arith.addf %55, %74 : vector<8x32xf32>
    %76 = vector.extract_strided_slice %39 {offsets = [0, 8], sizes = [8, 8], strides = [1, 1]} : vector<8x32xf32> to vector<8x8xf32>
    %cst_45 = arith.constant 0.353553385 : f32
    %77 = vector.broadcast %cst_45 : f32 to vector<8x8xf32>
    %78 = arith.mulf %76, %77 : vector<8x8xf32>
    %79 = vector.extract_strided_slice %45 {offsets = [0, 8], sizes = [8, 8], strides = [1, 1]} : vector<8x32xf32> to vector<8x8xf32>
    %80 = vector.extract_strided_slice %51 {offsets = [0, 8], sizes = [8, 8], strides = [1, 1]} : vector<8x32xf32> to vector<8x8xf32>
    %cst_46 = arith.constant dense<0.000000e+00> : vector<8x8xf32>
    %81 = tpu.matmul %78, %79, %cst_46 {dimension_numbers = #tpu.dot_dimension_numbers<[1], [1], [0], [0], [0, 0, 1, 0], [], []>} : vector<8x8xf32>, vector<8x8xf32>, vector<8x8xf32> -> vector<8x8xf32>
    %cst_47 = arith.constant dense<0xFF800000> : vector<8xf32>
    %82 = vector.multi_reduction <maximumf>, %81, %cst_47 [1] : vector<8x8xf32> to vector<8xf32>
    %83 = vector.shape_cast %82 : vector<8xf32> to vector<8x1xf32>
    %84 = vector.broadcast %83 : vector<8x1xf32> to vector<8x8xf32>
    %85 = arith.subf %81, %84 : vector<8x8xf32>
    %86 = math.exp %85 : vector<8x8xf32>
    %cst_48 = arith.constant dense<0.000000e+00> : vector<8xf32>
    %87 = vector.multi_reduction <add>, %86, %cst_48 [1] : vector<8x8xf32> to vector<8xf32>
    %88 = vector.shape_cast %87 : vector<8xf32> to vector<8x1xf32>
    %89 = tpu.reciprocal %88 {approx = true} : vector<8x1xf32> -> vector<8x1xf32>
    %90 = vector.broadcast %89 : vector<8x1xf32> to vector<8x8xf32>
    %91 = arith.mulf %86, %90 : vector<8x8xf32>
    %cst_49 = arith.constant dense<0.000000e+00> : vector<8x8xf32>
    %92 = tpu.matmul %91, %80, %cst_49 {dimension_numbers = #tpu.dot_dimension_numbers<[1], [0], [0], [1], [0, 0, 1, 1], [], []>} : vector<8x8xf32>, vector<8x8xf32>, vector<8x8xf32> -> vector<8x8xf32>
    %93 = vector.extract_strided_slice %53 {offsets = [8, 0], sizes = [8, 32], strides = [1, 1]} : vector<32x32xf32> to vector<8x32xf32>
    %cst_50 = arith.constant dense<0.000000e+00> : vector<8x32xf32>
    %94 = tpu.matmul %92, %93, %cst_50 {dimension_numbers = #tpu.dot_dimension_numbers<[1], [0], [0], [1], [0, 0, 1, 1], [], []>} : vector<8x8xf32>, vector<8x32xf32>, vector<8x32xf32> -> vector<8x32xf32>
    %95 = arith.addf %75, %94 : vector<8x32xf32>
    %96 = vector.extract_strided_slice %39 {offsets = [0, 16], sizes = [8, 8], strides = [1, 1]} : vector<8x32xf32> to vector<8x8xf32>
    %cst_51 = arith.constant 0.353553385 : f32
    %97 = vector.broadcast %cst_51 : f32 to vector<8x8xf32>
    %98 = arith.mulf %96, %97 : vector<8x8xf32>
    %99 = vector.extract_strided_slice %45 {offsets = [0, 16], sizes = [8, 8], strides = [1, 1]} : vector<8x32xf32> to vector<8x8xf32>
    %100 = vector.extract_strided_slice %51 {offsets = [0, 16], sizes = [8, 8], strides = [1, 1]} : vector<8x32xf32> to vector<8x8xf32>
    %cst_52 = arith.constant dense<0.000000e+00> : vector<8x8xf32>
    %101 = tpu.matmul %98, %99, %cst_52 {dimension_numbers = #tpu.dot_dimension_numbers<[1], [1], [0], [0], [0, 0, 1, 0], [], []>} : vector<8x8xf32>, vector<8x8xf32>, vector<8x8xf32> -> vector<8x8xf32>
    %cst_53 = arith.constant dense<0xFF800000> : vector<8xf32>
    %102 = vector.multi_reduction <maximumf>, %101, %cst_53 [1] : vector<8x8xf32> to vector<8xf32>
    %103 = vector.shape_cast %102 : vector<8xf32> to vector<8x1xf32>
    %104 = vector.broadcast %103 : vector<8x1xf32> to vector<8x8xf32>
    %105 = arith.subf %101, %104 : vector<8x8xf32>
    %106 = math.exp %105 : vector<8x8xf32>
    %cst_54 = arith.constant dense<0.000000e+00> : vector<8xf32>
    %107 = vector.multi_reduction <add>, %106, %cst_54 [1] : vector<8x8xf32> to vector<8xf32>
    %108 = vector.shape_cast %107 : vector<8xf32> to vector<8x1xf32>
    %109 = tpu.reciprocal %108 {approx = true} : vector<8x1xf32> -> vector<8x1xf32>
    %110 = vector.broadcast %109 : vector<8x1xf32> to vector<8x8xf32>
    %111 = arith.mulf %106, %110 : vector<8x8xf32>
    %cst_55 = arith.constant dense<0.000000e+00> : vector<8x8xf32>
    %112 = tpu.matmul %111, %100, %cst_55 {dimension_numbers = #tpu.dot_dimension_numbers<[1], [0], [0], [1], [0, 0, 1, 1], [], []>} : vector<8x8xf32>, vector<8x8xf32>, vector<8x8xf32> -> vector<8x8xf32>
    %113 = vector.extract_strided_slice %53 {offsets = [16, 0], sizes = [8, 32], strides = [1, 1]} : vector<32x32xf32> to vector<8x32xf32>
    %cst_56 = arith.constant dense<0.000000e+00> : vector<8x32xf32>
    %114 = tpu.matmul %112, %113, %cst_56 {dimension_numbers = #tpu.dot_dimension_numbers<[1], [0], [0], [1], [0, 0, 1, 1], [], []>} : vector<8x8xf32>, vector<8x32xf32>, vector<8x32xf32> -> vector<8x32xf32>
    %115 = arith.addf %95, %114 : vector<8x32xf32>
    %116 = vector.extract_strided_slice %39 {offsets = [0, 24], sizes = [8, 8], strides = [1, 1]} : vector<8x32xf32> to vector<8x8xf32>
    %cst_57 = arith.constant 0.353553385 : f32
    %117 = vector.broadcast %cst_57 : f32 to vector<8x8xf32>
    %118 = arith.mulf %116, %117 : vector<8x8xf32>
    %119 = vector.extract_strided_slice %45 {offsets = [0, 24], sizes = [8, 8], strides = [1, 1]} : vector<8x32xf32> to vector<8x8xf32>
    %120 = vector.extract_strided_slice %51 {offsets = [0, 24], sizes = [8, 8], strides = [1, 1]} : vector<8x32xf32> to vector<8x8xf32>
    %cst_58 = arith.constant dense<0.000000e+00> : vector<8x8xf32>
    %121 = tpu.matmul %118, %119, %cst_58 {dimension_numbers = #tpu.dot_dimension_numbers<[1], [1], [0], [0], [0, 0, 1, 0], [], []>} : vector<8x8xf32>, vector<8x8xf32>, vector<8x8xf32> -> vector<8x8xf32>
    %cst_59 = arith.constant dense<0xFF800000> : vector<8xf32>
    %122 = vector.multi_reduction <maximumf>, %121, %cst_59 [1] : vector<8x8xf32> to vector<8xf32>
    %123 = vector.shape_cast %122 : vector<8xf32> to vector<8x1xf32>
    %124 = vector.broadcast %123 : vector<8x1xf32> to vector<8x8xf32>
    %125 = arith.subf %121, %124 : vector<8x8xf32>
    %126 = math.exp %125 : vector<8x8xf32>
    %cst_60 = arith.constant dense<0.000000e+00> : vector<8xf32>
    %127 = vector.multi_reduction <add>, %126, %cst_60 [1] : vector<8x8xf32> to vector<8xf32>
    %128 = vector.shape_cast %127 : vector<8xf32> to vector<8x1xf32>
    %129 = tpu.reciprocal %128 {approx = true} : vector<8x1xf32> -> vector<8x1xf32>
    %130 = vector.broadcast %129 : vector<8x1xf32> to vector<8x8xf32>
    %131 = arith.mulf %126, %130 : vector<8x8xf32>
    %cst_61 = arith.constant dense<0.000000e+00> : vector<8x8xf32>
    %132 = tpu.matmul %131, %120, %cst_61 {dimension_numbers = #tpu.dot_dimension_numbers<[1], [0], [0], [1], [0, 0, 1, 1], [], []>} : vector<8x8xf32>, vector<8x8xf32>, vector<8x8xf32> -> vector<8x8xf32>
    %133 = vector.extract_strided_slice %53 {offsets = [24, 0], sizes = [8, 32], strides = [1, 1]} : vector<32x32xf32> to vector<8x32xf32>
    %cst_62 = arith.constant dense<0.000000e+00> : vector<8x32xf32>
    %134 = tpu.matmul %132, %133, %cst_62 {dimension_numbers = #tpu.dot_dimension_numbers<[1], [0], [0], [1], [0, 0, 1, 1], [], []>} : vector<8x8xf32>, vector<8x32xf32>, vector<8x32xf32> -> vector<8x32xf32>
    %135 = arith.addf %115, %134 : vector<8x32xf32>
    %136 = vector.broadcast %54 : vector<1x32xf32> to vector<8x32xf32>
    %137 = arith.addf %135, %136 : vector<8x32xf32>
    %138 = arith.addf %137, %1 : vector<8x32xf32>
    %c1_63 = arith.constant 1 : index
    %c0_64 = arith.constant 0 : index
    %139 = vector.load %arg4[%c1_63, %c0_64] : memref<7x32xf32, #tpu.memory_space<vmem>>, vector<1x32xf32>
    %c1_65 = arith.constant 1 : index
    %c0_66 = arith.constant 0 : index
    %140 = vector.load %arg5[%c1_65, %c0_66] : memref<7x32xf32, #tpu.memory_space<vmem>>, vector<1x32xf32>
    %cst_67 = arith.constant dense<0.000000e+00> : vector<8xf32>
    %141 = vector.multi_reduction <add>, %138, %cst_67 [1] : vector<8x32xf32> to vector<8xf32>
    %142 = vector.shape_cast %141 : vector<8xf32> to vector<8x1xf32>
    %cst_68 = arith.constant 3.200000e+01 : f32
    %143 = vector.broadcast %cst_68 : f32 to vector<8x1xf32>
    %144 = arith.divf %142, %143 : vector<8x1xf32>
    %145 = vector.broadcast %144 : vector<8x1xf32> to vector<8x32xf32>
    %146 = arith.subf %138, %145 : vector<8x32xf32>
    %147 = arith.mulf %146, %146 : vector<8x32xf32>
    %cst_69 = arith.constant dense<0.000000e+00> : vector<8xf32>
    %148 = vector.multi_reduction <add>, %147, %cst_69 [1] : vector<8x32xf32> to vector<8xf32>
    %149 = vector.shape_cast %148 : vector<8xf32> to vector<8x1xf32>
    %cst_70 = arith.constant 3.200000e+01 : f32
    %150 = vector.broadcast %cst_70 : f32 to vector<8x1xf32>
    %151 = arith.divf %149, %150 : vector<8x1xf32>
    %152 = vector.broadcast %144 : vector<8x1xf32> to vector<8x32xf32>
    %153 = arith.subf %138, %152 : vector<8x32xf32>
    %cst_71 = arith.constant 9.99999997E-7 : f32
    %154 = vector.broadcast %cst_71 : f32 to vector<8x1xf32>
    %155 = arith.addf %151, %154 : vector<8x1xf32>
    %156 = math.rsqrt %155 : vector<8x1xf32>
    %157 = vector.broadcast %156 : vector<8x1xf32> to vector<8x32xf32>
    %158 = arith.mulf %153, %157 : vector<8x32xf32>
    %159 = vector.broadcast %139 : vector<1x32xf32> to vector<8x32xf32>
    %160 = arith.mulf %158, %159 : vector<8x32xf32>
    %161 = vector.broadcast %140 : vector<1x32xf32> to vector<8x32xf32>
    %162 = arith.addf %160, %161 : vector<8x32xf32>
    %c4 = arith.constant 4 : index
    %c0_72 = arith.constant 0 : index
    %c0_73 = arith.constant 0 : index
    %163 = vector.load %arg6[%c4, %c0_72, %c0_73] : memref<16x32x32xf32, #tpu.memory_space<vmem>>, vector<1x32x32xf32>
    %164 = vector.shape_cast %163 : vector<1x32x32xf32> to vector<32x32xf32>
    %cst_74 = arith.constant dense<0.000000e+00> : vector<8x32xf32>
    %165 = tpu.matmul %162, %164, %cst_74 {dimension_numbers = #tpu.dot_dimension_numbers<[1], [0], [0], [1], [0, 0, 1, 1], [], []>} : vector<8x32xf32>, vector<32x32xf32>, vector<8x32xf32> -> vector<8x32xf32>
    %c4_75 = arith.constant 4 : index
    %c0_76 = arith.constant 0 : index
    %166 = vector.load %arg7[%c4_75, %c0_76] : memref<16x32xf32, #tpu.memory_space<vmem>>, vector<1x32xf32>
    %167 = vector.broadcast %166 : vector<1x32xf32> to vector<8x32xf32>
    %168 = arith.addf %165, %167 : vector<8x32xf32>
    %c5 = arith.constant 5 : index
    %c0_77 = arith.constant 0 : index
    %c0_78 = arith.constant 0 : index
    %169 = vector.load %arg6[%c5, %c0_77, %c0_78] : memref<16x32x32xf32, #tpu.memory_space<vmem>>, vector<1x32x32xf32>
    %170 = vector.shape_cast %169 : vector<1x32x32xf32> to vector<32x32xf32>
    %cst_79 = arith.constant dense<0.000000e+00> : vector<16x32xf32>
    %171 = tpu.matmul %3, %170, %cst_79 {dimension_numbers = #tpu.dot_dimension_numbers<[1], [0], [0], [1], [0, 0, 1, 1], [], []>} : vector<16x32xf32>, vector<32x32xf32>, vector<16x32xf32> -> vector<16x32xf32>
    %c5_80 = arith.constant 5 : index
    %c0_81 = arith.constant 0 : index
    %172 = vector.load %arg7[%c5_80, %c0_81] : memref<16x32xf32, #tpu.memory_space<vmem>>, vector<1x32xf32>
    %173 = vector.broadcast %172 : vector<1x32xf32> to vector<16x32xf32>
    %174 = arith.addf %171, %173 : vector<16x32xf32>
    %c6 = arith.constant 6 : index
    %c0_82 = arith.constant 0 : index
    %c0_83 = arith.constant 0 : index
    %175 = vector.load %arg6[%c6, %c0_82, %c0_83] : memref<16x32x32xf32, #tpu.memory_space<vmem>>, vector<1x32x32xf32>
    %176 = vector.shape_cast %175 : vector<1x32x32xf32> to vector<32x32xf32>
    %cst_84 = arith.constant dense<0.000000e+00> : vector<16x32xf32>
    %177 = tpu.matmul %3, %176, %cst_84 {dimension_numbers = #tpu.dot_dimension_numbers<[1], [0], [0], [1], [0, 0, 1, 1], [], []>} : vector<16x32xf32>, vector<32x32xf32>, vector<16x32xf32> -> vector<16x32xf32>
    %c6_85 = arith.constant 6 : index
    %c0_86 = arith.constant 0 : index
    %178 = vector.load %arg7[%c6_85, %c0_86] : memref<16x32xf32, #tpu.memory_space<vmem>>, vector<1x32xf32>
    %179 = vector.broadcast %178 : vector<1x32xf32> to vector<16x32xf32>
    %180 = arith.addf %177, %179 : vector<16x32xf32>
    %c7 = arith.constant 7 : index
    %c0_87 = arith.constant 0 : index
    %c0_88 = arith.constant 0 : index
    %181 = vector.load %arg6[%c7, %c0_87, %c0_88] : memref<16x32x32xf32, #tpu.memory_space<vmem>>, vector<1x32x32xf32>
    %182 = vector.shape_cast %181 : vector<1x32x32xf32> to vector<32x32xf32>
    %c7_89 = arith.constant 7 : index
    %c0_90 = arith.constant 0 : index
    %183 = vector.load %arg7[%c7_89, %c0_90] : memref<16x32xf32, #tpu.memory_space<vmem>>, vector<1x32xf32>
    %cst_91 = arith.constant 0.000000e+00 : f32
    %184 = vector.broadcast %cst_91 : f32 to vector<8x32xf32>
    %185 = vector.extract_strided_slice %168 {offsets = [0, 0], sizes = [8, 8], strides = [1, 1]} : vector<8x32xf32> to vector<8x8xf32>
    %cst_92 = arith.constant 0.353553385 : f32
    %186 = vector.broadcast %cst_92 : f32 to vector<8x8xf32>
    %187 = arith.mulf %185, %186 : vector<8x8xf32>
    %188 = vector.extract_strided_slice %174 {offsets = [0, 0], sizes = [16, 8], strides = [1, 1]} : vector<16x32xf32> to vector<16x8xf32>
    %189 = vector.extract_strided_slice %180 {offsets = [0, 0], sizes = [16, 8], strides = [1, 1]} : vector<16x32xf32> to vector<16x8xf32>
    %cst_93 = arith.constant dense<0.000000e+00> : vector<8x16xf32>
    %190 = tpu.matmul %187, %188, %cst_93 {dimension_numbers = #tpu.dot_dimension_numbers<[1], [1], [0], [0], [0, 0, 1, 0], [], []>} : vector<8x8xf32>, vector<16x8xf32>, vector<8x16xf32> -> vector<8x16xf32>
    %191 = vector.broadcast %9 : vector<1x16xf32> to vector<8x16xf32>
    %192 = arith.addf %190, %191 : vector<8x16xf32>
    %cst_94 = arith.constant dense<0xFF800000> : vector<8xf32>
    %193 = vector.multi_reduction <maximumf>, %192, %cst_94 [1] : vector<8x16xf32> to vector<8xf32>
    %194 = vector.shape_cast %193 : vector<8xf32> to vector<8x1xf32>
    %195 = vector.broadcast %194 : vector<8x1xf32> to vector<8x16xf32>
    %196 = arith.subf %192, %195 : vector<8x16xf32>
    %197 = math.exp %196 : vector<8x16xf32>
    %cst_95 = arith.constant dense<0.000000e+00> : vector<8xf32>
    %198 = vector.multi_reduction <add>, %197, %cst_95 [1] : vector<8x16xf32> to vector<8xf32>
    %199 = vector.shape_cast %198 : vector<8xf32> to vector<8x1xf32>
    %200 = tpu.reciprocal %199 {approx = true} : vector<8x1xf32> -> vector<8x1xf32>
    %201 = vector.broadcast %200 : vector<8x1xf32> to vector<8x16xf32>
    %202 = arith.mulf %197, %201 : vector<8x16xf32>
    %cst_96 = arith.constant dense<0.000000e+00> : vector<8x8xf32>
    %203 = tpu.matmul %202, %189, %cst_96 {dimension_numbers = #tpu.dot_dimension_numbers<[1], [0], [0], [1], [0, 0, 1, 1], [], []>} : vector<8x16xf32>, vector<16x8xf32>, vector<8x8xf32> -> vector<8x8xf32>
    %204 = vector.extract_strided_slice %182 {offsets = [0, 0], sizes = [8, 32], strides = [1, 1]} : vector<32x32xf32> to vector<8x32xf32>
    %cst_97 = arith.constant dense<0.000000e+00> : vector<8x32xf32>
    %205 = tpu.matmul %203, %204, %cst_97 {dimension_numbers = #tpu.dot_dimension_numbers<[1], [0], [0], [1], [0, 0, 1, 1], [], []>} : vector<8x8xf32>, vector<8x32xf32>, vector<8x32xf32> -> vector<8x32xf32>
    %206 = arith.addf %184, %205 : vector<8x32xf32>
    %207 = vector.extract_strided_slice %168 {offsets = [0, 8], sizes = [8, 8], strides = [1, 1]} : vector<8x32xf32> to vector<8x8xf32>
    %cst_98 = arith.constant 0.353553385 : f32
    %208 = vector.broadcast %cst_98 : f32 to vector<8x8xf32>
    %209 = arith.mulf %207, %208 : vector<8x8xf32>
    %210 = vector.extract_strided_slice %174 {offsets = [0, 8], sizes = [16, 8], strides = [1, 1]} : vector<16x32xf32> to vector<16x8xf32>
    %211 = vector.extract_strided_slice %180 {offsets = [0, 8], sizes = [16, 8], strides = [1, 1]} : vector<16x32xf32> to vector<16x8xf32>
    %cst_99 = arith.constant dense<0.000000e+00> : vector<8x16xf32>
    %212 = tpu.matmul %209, %210, %cst_99 {dimension_numbers = #tpu.dot_dimension_numbers<[1], [1], [0], [0], [0, 0, 1, 0], [], []>} : vector<8x8xf32>, vector<16x8xf32>, vector<8x16xf32> -> vector<8x16xf32>
    %213 = vector.broadcast %9 : vector<1x16xf32> to vector<8x16xf32>
    %214 = arith.addf %212, %213 : vector<8x16xf32>
    %cst_100 = arith.constant dense<0xFF800000> : vector<8xf32>
    %215 = vector.multi_reduction <maximumf>, %214, %cst_100 [1] : vector<8x16xf32> to vector<8xf32>
    %216 = vector.shape_cast %215 : vector<8xf32> to vector<8x1xf32>
    %217 = vector.broadcast %216 : vector<8x1xf32> to vector<8x16xf32>
    %218 = arith.subf %214, %217 : vector<8x16xf32>
    %219 = math.exp %218 : vector<8x16xf32>
    %cst_101 = arith.constant dense<0.000000e+00> : vector<8xf32>
    %220 = vector.multi_reduction <add>, %219, %cst_101 [1] : vector<8x16xf32> to vector<8xf32>
    %221 = vector.shape_cast %220 : vector<8xf32> to vector<8x1xf32>
    %222 = tpu.reciprocal %221 {approx = true} : vector<8x1xf32> -> vector<8x1xf32>
    %223 = vector.broadcast %222 : vector<8x1xf32> to vector<8x16xf32>
    %224 = arith.mulf %219, %223 : vector<8x16xf32>
    %cst_102 = arith.constant dense<0.000000e+00> : vector<8x8xf32>
    %225 = tpu.matmul %224, %211, %cst_102 {dimension_numbers = #tpu.dot_dimension_numbers<[1], [0], [0], [1], [0, 0, 1, 1], [], []>} : vector<8x16xf32>, vector<16x8xf32>, vector<8x8xf32> -> vector<8x8xf32>
    %226 = vector.extract_strided_slice %182 {offsets = [8, 0], sizes = [8, 32], strides = [1, 1]} : vector<32x32xf32> to vector<8x32xf32>
    %cst_103 = arith.constant dense<0.000000e+00> : vector<8x32xf32>
    %227 = tpu.matmul %225, %226, %cst_103 {dimension_numbers = #tpu.dot_dimension_numbers<[1], [0], [0], [1], [0, 0, 1, 1], [], []>} : vector<8x8xf32>, vector<8x32xf32>, vector<8x32xf32> -> vector<8x32xf32>
    %228 = arith.addf %206, %227 : vector<8x32xf32>
    %229 = vector.extract_strided_slice %168 {offsets = [0, 16], sizes = [8, 8], strides = [1, 1]} : vector<8x32xf32> to vector<8x8xf32>
    %cst_104 = arith.constant 0.353553385 : f32
    %230 = vector.broadcast %cst_104 : f32 to vector<8x8xf32>
    %231 = arith.mulf %229, %230 : vector<8x8xf32>
    %232 = vector.extract_strided_slice %174 {offsets = [0, 16], sizes = [16, 8], strides = [1, 1]} : vector<16x32xf32> to vector<16x8xf32>
    %233 = vector.extract_strided_slice %180 {offsets = [0, 16], sizes = [16, 8], strides = [1, 1]} : vector<16x32xf32> to vector<16x8xf32>
    %cst_105 = arith.constant dense<0.000000e+00> : vector<8x16xf32>
    %234 = tpu.matmul %231, %232, %cst_105 {dimension_numbers = #tpu.dot_dimension_numbers<[1], [1], [0], [0], [0, 0, 1, 0], [], []>} : vector<8x8xf32>, vector<16x8xf32>, vector<8x16xf32> -> vector<8x16xf32>
    %235 = vector.broadcast %9 : vector<1x16xf32> to vector<8x16xf32>
    %236 = arith.addf %234, %235 : vector<8x16xf32>
    %cst_106 = arith.constant dense<0xFF800000> : vector<8xf32>
    %237 = vector.multi_reduction <maximumf>, %236, %cst_106 [1] : vector<8x16xf32> to vector<8xf32>
    %238 = vector.shape_cast %237 : vector<8xf32> to vector<8x1xf32>
    %239 = vector.broadcast %238 : vector<8x1xf32> to vector<8x16xf32>
    %240 = arith.subf %236, %239 : vector<8x16xf32>
    %241 = math.exp %240 : vector<8x16xf32>
    %cst_107 = arith.constant dense<0.000000e+00> : vector<8xf32>
    %242 = vector.multi_reduction <add>, %241, %cst_107 [1] : vector<8x16xf32> to vector<8xf32>
    %243 = vector.shape_cast %242 : vector<8xf32> to vector<8x1xf32>
    %244 = tpu.reciprocal %243 {approx = true} : vector<8x1xf32> -> vector<8x1xf32>
    %245 = vector.broadcast %244 : vector<8x1xf32> to vector<8x16xf32>
    %246 = arith.mulf %241, %245 : vector<8x16xf32>
    %cst_108 = arith.constant dense<0.000000e+00> : vector<8x8xf32>
    %247 = tpu.matmul %246, %233, %cst_108 {dimension_numbers = #tpu.dot_dimension_numbers<[1], [0], [0], [1], [0, 0, 1, 1], [], []>} : vector<8x16xf32>, vector<16x8xf32>, vector<8x8xf32> -> vector<8x8xf32>
    %248 = vector.extract_strided_slice %182 {offsets = [16, 0], sizes = [8, 32], strides = [1, 1]} : vector<32x32xf32> to vector<8x32xf32>
    %cst_109 = arith.constant dense<0.000000e+00> : vector<8x32xf32>
    %249 = tpu.matmul %247, %248, %cst_109 {dimension_numbers = #tpu.dot_dimension_numbers<[1], [0], [0], [1], [0, 0, 1, 1], [], []>} : vector<8x8xf32>, vector<8x32xf32>, vector<8x32xf32> -> vector<8x32xf32>
    %250 = arith.addf %228, %249 : vector<8x32xf32>
    %251 = vector.extract_strided_slice %168 {offsets = [0, 24], sizes = [8, 8], strides = [1, 1]} : vector<8x32xf32> to vector<8x8xf32>
    %cst_110 = arith.constant 0.353553385 : f32
    %252 = vector.broadcast %cst_110 : f32 to vector<8x8xf32>
    %253 = arith.mulf %251, %252 : vector<8x8xf32>
    %254 = vector.extract_strided_slice %174 {offsets = [0, 24], sizes = [16, 8], strides = [1, 1]} : vector<16x32xf32> to vector<16x8xf32>
    %255 = vector.extract_strided_slice %180 {offsets = [0, 24], sizes = [16, 8], strides = [1, 1]} : vector<16x32xf32> to vector<16x8xf32>
    %cst_111 = arith.constant dense<0.000000e+00> : vector<8x16xf32>
    %256 = tpu.matmul %253, %254, %cst_111 {dimension_numbers = #tpu.dot_dimension_numbers<[1], [1], [0], [0], [0, 0, 1, 0], [], []>} : vector<8x8xf32>, vector<16x8xf32>, vector<8x16xf32> -> vector<8x16xf32>
    %257 = vector.broadcast %9 : vector<1x16xf32> to vector<8x16xf32>
    %258 = arith.addf %256, %257 : vector<8x16xf32>
    %cst_112 = arith.constant dense<0xFF800000> : vector<8xf32>
    %259 = vector.multi_reduction <maximumf>, %258, %cst_112 [1] : vector<8x16xf32> to vector<8xf32>
    %260 = vector.shape_cast %259 : vector<8xf32> to vector<8x1xf32>
    %261 = vector.broadcast %260 : vector<8x1xf32> to vector<8x16xf32>
    %262 = arith.subf %258, %261 : vector<8x16xf32>
    %263 = math.exp %262 : vector<8x16xf32>
    %cst_113 = arith.constant dense<0.000000e+00> : vector<8xf32>
    %264 = vector.multi_reduction <add>, %263, %cst_113 [1] : vector<8x16xf32> to vector<8xf32>
    %265 = vector.shape_cast %264 : vector<8xf32> to vector<8x1xf32>
    %266 = tpu.reciprocal %265 {approx = true} : vector<8x1xf32> -> vector<8x1xf32>
    %267 = vector.broadcast %266 : vector<8x1xf32> to vector<8x16xf32>
    %268 = arith.mulf %263, %267 : vector<8x16xf32>
    %cst_114 = arith.constant dense<0.000000e+00> : vector<8x8xf32>
    %269 = tpu.matmul %268, %255, %cst_114 {dimension_numbers = #tpu.dot_dimension_numbers<[1], [0], [0], [1], [0, 0, 1, 1], [], []>} : vector<8x16xf32>, vector<16x8xf32>, vector<8x8xf32> -> vector<8x8xf32>
    %270 = vector.extract_strided_slice %182 {offsets = [24, 0], sizes = [8, 32], strides = [1, 1]} : vector<32x32xf32> to vector<8x32xf32>
    %cst_115 = arith.constant dense<0.000000e+00> : vector<8x32xf32>
    %271 = tpu.matmul %269, %270, %cst_115 {dimension_numbers = #tpu.dot_dimension_numbers<[1], [0], [0], [1], [0, 0, 1, 1], [], []>} : vector<8x8xf32>, vector<8x32xf32>, vector<8x32xf32> -> vector<8x32xf32>
    %272 = arith.addf %250, %271 : vector<8x32xf32>
    %273 = vector.broadcast %183 : vector<1x32xf32> to vector<8x32xf32>
    %274 = arith.addf %272, %273 : vector<8x32xf32>
    %275 = arith.addf %274, %138 : vector<8x32xf32>
    %c2_116 = arith.constant 2 : index
    %c0_117 = arith.constant 0 : index
    %276 = vector.load %arg4[%c2_116, %c0_117] : memref<7x32xf32, #tpu.memory_space<vmem>>, vector<1x32xf32>
    %c2_118 = arith.constant 2 : index
    %c0_119 = arith.constant 0 : index
    %277 = vector.load %arg5[%c2_118, %c0_119] : memref<7x32xf32, #tpu.memory_space<vmem>>, vector<1x32xf32>
    %cst_120 = arith.constant dense<0.000000e+00> : vector<8xf32>
    %278 = vector.multi_reduction <add>, %275, %cst_120 [1] : vector<8x32xf32> to vector<8xf32>
    %279 = vector.shape_cast %278 : vector<8xf32> to vector<8x1xf32>
    %cst_121 = arith.constant 3.200000e+01 : f32
    %280 = vector.broadcast %cst_121 : f32 to vector<8x1xf32>
    %281 = arith.divf %279, %280 : vector<8x1xf32>
    %282 = vector.broadcast %281 : vector<8x1xf32> to vector<8x32xf32>
    %283 = arith.subf %275, %282 : vector<8x32xf32>
    %284 = arith.mulf %283, %283 : vector<8x32xf32>
    %cst_122 = arith.constant dense<0.000000e+00> : vector<8xf32>
    %285 = vector.multi_reduction <add>, %284, %cst_122 [1] : vector<8x32xf32> to vector<8xf32>
    %286 = vector.shape_cast %285 : vector<8xf32> to vector<8x1xf32>
    %cst_123 = arith.constant 3.200000e+01 : f32
    %287 = vector.broadcast %cst_123 : f32 to vector<8x1xf32>
    %288 = arith.divf %286, %287 : vector<8x1xf32>
    %289 = vector.broadcast %281 : vector<8x1xf32> to vector<8x32xf32>
    %290 = arith.subf %275, %289 : vector<8x32xf32>
    %cst_124 = arith.constant 9.99999997E-7 : f32
    %291 = vector.broadcast %cst_124 : f32 to vector<8x1xf32>
    %292 = arith.addf %288, %291 : vector<8x1xf32>
    %293 = math.rsqrt %292 : vector<8x1xf32>
    %294 = vector.broadcast %293 : vector<8x1xf32> to vector<8x32xf32>
    %295 = arith.mulf %290, %294 : vector<8x32xf32>
    %296 = vector.broadcast %276 : vector<1x32xf32> to vector<8x32xf32>
    %297 = arith.mulf %295, %296 : vector<8x32xf32>
    %298 = vector.broadcast %277 : vector<1x32xf32> to vector<8x32xf32>
    %299 = arith.addf %297, %298 : vector<8x32xf32>
    %c0_125 = arith.constant 0 : index
    %c0_126 = arith.constant 0 : index
    %c0_127 = arith.constant 0 : index
    %300 = vector.load %arg8[%c0_125, %c0_126, %c0_127] : memref<2x32x64xf32, #tpu.memory_space<vmem>>, vector<1x32x64xf32>
    %301 = vector.shape_cast %300 : vector<1x32x64xf32> to vector<32x64xf32>
    %cst_128 = arith.constant dense<0.000000e+00> : vector<8x64xf32>
    %302 = tpu.matmul %299, %301, %cst_128 {dimension_numbers = #tpu.dot_dimension_numbers<[1], [0], [0], [1], [0, 0, 1, 1], [], []>} : vector<8x32xf32>, vector<32x64xf32>, vector<8x64xf32> -> vector<8x64xf32>
    %c0_129 = arith.constant 0 : index
    %c0_130 = arith.constant 0 : index
    %303 = vector.load %arg9[%c0_129, %c0_130] : memref<2x64xf32, #tpu.memory_space<vmem>>, vector<1x64xf32>
    %304 = vector.broadcast %303 : vector<1x64xf32> to vector<8x64xf32>
    %305 = arith.addf %302, %304 : vector<8x64xf32>
    %cst_131 = arith.constant 0.000000e+00 : f32
    %306 = vector.broadcast %cst_131 : f32 to vector<8x64xf32>
    %307 = arith.maximumf %305, %306 : vector<8x64xf32>
    %c0_132 = arith.constant 0 : index
    %c0_133 = arith.constant 0 : index
    %c0_134 = arith.constant 0 : index
    %308 = vector.load %arg10[%c0_132, %c0_133, %c0_134] : memref<2x64x32xf32, #tpu.memory_space<vmem>>, vector<1x64x32xf32>
    %309 = vector.shape_cast %308 : vector<1x64x32xf32> to vector<64x32xf32>
    %cst_135 = arith.constant dense<0.000000e+00> : vector<8x32xf32>
    %310 = tpu.matmul %307, %309, %cst_135 {dimension_numbers = #tpu.dot_dimension_numbers<[1], [0], [0], [1], [0, 0, 1, 1], [], []>} : vector<8x64xf32>, vector<64x32xf32>, vector<8x32xf32> -> vector<8x32xf32>
    %c0_136 = arith.constant 0 : index
    %c0_137 = arith.constant 0 : index
    %311 = vector.load %arg11[%c0_136, %c0_137] : memref<2x32xf32, #tpu.memory_space<vmem>>, vector<1x32xf32>
    %312 = vector.broadcast %311 : vector<1x32xf32> to vector<8x32xf32>
    %313 = arith.addf %310, %312 : vector<8x32xf32>
    %314 = arith.addf %313, %275 : vector<8x32xf32>
    %c3_138 = arith.constant 3 : index
    %c0_139 = arith.constant 0 : index
    %315 = vector.load %arg4[%c3_138, %c0_139] : memref<7x32xf32, #tpu.memory_space<vmem>>, vector<1x32xf32>
    %c3_140 = arith.constant 3 : index
    %c0_141 = arith.constant 0 : index
    %316 = vector.load %arg5[%c3_140, %c0_141] : memref<7x32xf32, #tpu.memory_space<vmem>>, vector<1x32xf32>
    %cst_142 = arith.constant dense<0.000000e+00> : vector<8xf32>
    %317 = vector.multi_reduction <add>, %314, %cst_142 [1] : vector<8x32xf32> to vector<8xf32>
    %318 = vector.shape_cast %317 : vector<8xf32> to vector<8x1xf32>
    %cst_143 = arith.constant 3.200000e+01 : f32
    %319 = vector.broadcast %cst_143 : f32 to vector<8x1xf32>
    %320 = arith.divf %318, %319 : vector<8x1xf32>
    %321 = vector.broadcast %320 : vector<8x1xf32> to vector<8x32xf32>
    %322 = arith.subf %314, %321 : vector<8x32xf32>
    %323 = arith.mulf %322, %322 : vector<8x32xf32>
    %cst_144 = arith.constant dense<0.000000e+00> : vector<8xf32>
    %324 = vector.multi_reduction <add>, %323, %cst_144 [1] : vector<8x32xf32> to vector<8xf32>
    %325 = vector.shape_cast %324 : vector<8xf32> to vector<8x1xf32>
    %cst_145 = arith.constant 3.200000e+01 : f32
    %326 = vector.broadcast %cst_145 : f32 to vector<8x1xf32>
    %327 = arith.divf %325, %326 : vector<8x1xf32>
    %328 = vector.broadcast %320 : vector<8x1xf32> to vector<8x32xf32>
    %329 = arith.subf %314, %328 : vector<8x32xf32>
    %cst_146 = arith.constant 9.99999997E-7 : f32
    %330 = vector.broadcast %cst_146 : f32 to vector<8x1xf32>
    %331 = arith.addf %327, %330 : vector<8x1xf32>
    %332 = math.rsqrt %331 : vector<8x1xf32>
    %333 = vector.broadcast %332 : vector<8x1xf32> to vector<8x32xf32>
    %334 = arith.mulf %329, %333 : vector<8x32xf32>
    %335 = vector.broadcast %315 : vector<1x32xf32> to vector<8x32xf32>
    %336 = arith.mulf %334, %335 : vector<8x32xf32>
    %337 = vector.broadcast %316 : vector<1x32xf32> to vector<8x32xf32>
    %338 = arith.addf %336, %337 : vector<8x32xf32>
    %c8 = arith.constant 8 : index
    %c0_147 = arith.constant 0 : index
    %c0_148 = arith.constant 0 : index
    %339 = vector.load %arg6[%c8, %c0_147, %c0_148] : memref<16x32x32xf32, #tpu.memory_space<vmem>>, vector<1x32x32xf32>
    %340 = vector.shape_cast %339 : vector<1x32x32xf32> to vector<32x32xf32>
    %cst_149 = arith.constant dense<0.000000e+00> : vector<8x32xf32>
    %341 = tpu.matmul %338, %340, %cst_149 {dimension_numbers = #tpu.dot_dimension_numbers<[1], [0], [0], [1], [0, 0, 1, 1], [], []>} : vector<8x32xf32>, vector<32x32xf32>, vector<8x32xf32> -> vector<8x32xf32>
    %c8_150 = arith.constant 8 : index
    %c0_151 = arith.constant 0 : index
    %342 = vector.load %arg7[%c8_150, %c0_151] : memref<16x32xf32, #tpu.memory_space<vmem>>, vector<1x32xf32>
    %343 = vector.broadcast %342 : vector<1x32xf32> to vector<8x32xf32>
    %344 = arith.addf %341, %343 : vector<8x32xf32>
    %c9 = arith.constant 9 : index
    %c0_152 = arith.constant 0 : index
    %c0_153 = arith.constant 0 : index
    %345 = vector.load %arg6[%c9, %c0_152, %c0_153] : memref<16x32x32xf32, #tpu.memory_space<vmem>>, vector<1x32x32xf32>
    %346 = vector.shape_cast %345 : vector<1x32x32xf32> to vector<32x32xf32>
    %cst_154 = arith.constant dense<0.000000e+00> : vector<8x32xf32>
    %347 = tpu.matmul %338, %346, %cst_154 {dimension_numbers = #tpu.dot_dimension_numbers<[1], [0], [0], [1], [0, 0, 1, 1], [], []>} : vector<8x32xf32>, vector<32x32xf32>, vector<8x32xf32> -> vector<8x32xf32>
    %c9_155 = arith.constant 9 : index
    %c0_156 = arith.constant 0 : index
    %348 = vector.load %arg7[%c9_155, %c0_156] : memref<16x32xf32, #tpu.memory_space<vmem>>, vector<1x32xf32>
    %349 = vector.broadcast %348 : vector<1x32xf32> to vector<8x32xf32>
    %350 = arith.addf %347, %349 : vector<8x32xf32>
    %c10 = arith.constant 10 : index
    %c0_157 = arith.constant 0 : index
    %c0_158 = arith.constant 0 : index
    %351 = vector.load %arg6[%c10, %c0_157, %c0_158] : memref<16x32x32xf32, #tpu.memory_space<vmem>>, vector<1x32x32xf32>
    %352 = vector.shape_cast %351 : vector<1x32x32xf32> to vector<32x32xf32>
    %cst_159 = arith.constant dense<0.000000e+00> : vector<8x32xf32>
    %353 = tpu.matmul %338, %352, %cst_159 {dimension_numbers = #tpu.dot_dimension_numbers<[1], [0], [0], [1], [0, 0, 1, 1], [], []>} : vector<8x32xf32>, vector<32x32xf32>, vector<8x32xf32> -> vector<8x32xf32>
    %c10_160 = arith.constant 10 : index
    %c0_161 = arith.constant 0 : index
    %354 = vector.load %arg7[%c10_160, %c0_161] : memref<16x32xf32, #tpu.memory_space<vmem>>, vector<1x32xf32>
    %355 = vector.broadcast %354 : vector<1x32xf32> to vector<8x32xf32>
    %356 = arith.addf %353, %355 : vector<8x32xf32>
    %c11 = arith.constant 11 : index
    %c0_162 = arith.constant 0 : index
    %c0_163 = arith.constant 0 : index
    %357 = vector.load %arg6[%c11, %c0_162, %c0_163] : memref<16x32x32xf32, #tpu.memory_space<vmem>>, vector<1x32x32xf32>
    %358 = vector.shape_cast %357 : vector<1x32x32xf32> to vector<32x32xf32>
    %c11_164 = arith.constant 11 : index
    %c0_165 = arith.constant 0 : index
    %359 = vector.load %arg7[%c11_164, %c0_165] : memref<16x32xf32, #tpu.memory_space<vmem>>, vector<1x32xf32>
    %cst_166 = arith.constant 0.000000e+00 : f32
    %360 = vector.broadcast %cst_166 : f32 to vector<8x32xf32>
    %361 = vector.extract_strided_slice %344 {offsets = [0, 0], sizes = [8, 8], strides = [1, 1]} : vector<8x32xf32> to vector<8x8xf32>
    %cst_167 = arith.constant 0.353553385 : f32
    %362 = vector.broadcast %cst_167 : f32 to vector<8x8xf32>
    %363 = arith.mulf %361, %362 : vector<8x8xf32>
    %364 = vector.extract_strided_slice %350 {offsets = [0, 0], sizes = [8, 8], strides = [1, 1]} : vector<8x32xf32> to vector<8x8xf32>
    %365 = vector.extract_strided_slice %356 {offsets = [0, 0], sizes = [8, 8], strides = [1, 1]} : vector<8x32xf32> to vector<8x8xf32>
    %cst_168 = arith.constant dense<0.000000e+00> : vector<8x8xf32>
    %366 = tpu.matmul %363, %364, %cst_168 {dimension_numbers = #tpu.dot_dimension_numbers<[1], [1], [0], [0], [0, 0, 1, 0], [], []>} : vector<8x8xf32>, vector<8x8xf32>, vector<8x8xf32> -> vector<8x8xf32>
    %cst_169 = arith.constant dense<0xFF800000> : vector<8xf32>
    %367 = vector.multi_reduction <maximumf>, %366, %cst_169 [1] : vector<8x8xf32> to vector<8xf32>
    %368 = vector.shape_cast %367 : vector<8xf32> to vector<8x1xf32>
    %369 = vector.broadcast %368 : vector<8x1xf32> to vector<8x8xf32>
    %370 = arith.subf %366, %369 : vector<8x8xf32>
    %371 = math.exp %370 : vector<8x8xf32>
    %cst_170 = arith.constant dense<0.000000e+00> : vector<8xf32>
    %372 = vector.multi_reduction <add>, %371, %cst_170 [1] : vector<8x8xf32> to vector<8xf32>
    %373 = vector.shape_cast %372 : vector<8xf32> to vector<8x1xf32>
    %374 = tpu.reciprocal %373 {approx = true} : vector<8x1xf32> -> vector<8x1xf32>
    %375 = vector.broadcast %374 : vector<8x1xf32> to vector<8x8xf32>
    %376 = arith.mulf %371, %375 : vector<8x8xf32>
    %cst_171 = arith.constant dense<0.000000e+00> : vector<8x8xf32>
    %377 = tpu.matmul %376, %365, %cst_171 {dimension_numbers = #tpu.dot_dimension_numbers<[1], [0], [0], [1], [0, 0, 1, 1], [], []>} : vector<8x8xf32>, vector<8x8xf32>, vector<8x8xf32> -> vector<8x8xf32>
    %378 = vector.extract_strided_slice %358 {offsets = [0, 0], sizes = [8, 32], strides = [1, 1]} : vector<32x32xf32> to vector<8x32xf32>
    %cst_172 = arith.constant dense<0.000000e+00> : vector<8x32xf32>
    %379 = tpu.matmul %377, %378, %cst_172 {dimension_numbers = #tpu.dot_dimension_numbers<[1], [0], [0], [1], [0, 0, 1, 1], [], []>} : vector<8x8xf32>, vector<8x32xf32>, vector<8x32xf32> -> vector<8x32xf32>
    %380 = arith.addf %360, %379 : vector<8x32xf32>
    %381 = vector.extract_strided_slice %344 {offsets = [0, 8], sizes = [8, 8], strides = [1, 1]} : vector<8x32xf32> to vector<8x8xf32>
    %cst_173 = arith.constant 0.353553385 : f32
    %382 = vector.broadcast %cst_173 : f32 to vector<8x8xf32>
    %383 = arith.mulf %381, %382 : vector<8x8xf32>
    %384 = vector.extract_strided_slice %350 {offsets = [0, 8], sizes = [8, 8], strides = [1, 1]} : vector<8x32xf32> to vector<8x8xf32>
    %385 = vector.extract_strided_slice %356 {offsets = [0, 8], sizes = [8, 8], strides = [1, 1]} : vector<8x32xf32> to vector<8x8xf32>
    %cst_174 = arith.constant dense<0.000000e+00> : vector<8x8xf32>
    %386 = tpu.matmul %383, %384, %cst_174 {dimension_numbers = #tpu.dot_dimension_numbers<[1], [1], [0], [0], [0, 0, 1, 0], [], []>} : vector<8x8xf32>, vector<8x8xf32>, vector<8x8xf32> -> vector<8x8xf32>
    %cst_175 = arith.constant dense<0xFF800000> : vector<8xf32>
    %387 = vector.multi_reduction <maximumf>, %386, %cst_175 [1] : vector<8x8xf32> to vector<8xf32>
    %388 = vector.shape_cast %387 : vector<8xf32> to vector<8x1xf32>
    %389 = vector.broadcast %388 : vector<8x1xf32> to vector<8x8xf32>
    %390 = arith.subf %386, %389 : vector<8x8xf32>
    %391 = math.exp %390 : vector<8x8xf32>
    %cst_176 = arith.constant dense<0.000000e+00> : vector<8xf32>
    %392 = vector.multi_reduction <add>, %391, %cst_176 [1] : vector<8x8xf32> to vector<8xf32>
    %393 = vector.shape_cast %392 : vector<8xf32> to vector<8x1xf32>
    %394 = tpu.reciprocal %393 {approx = true} : vector<8x1xf32> -> vector<8x1xf32>
    %395 = vector.broadcast %394 : vector<8x1xf32> to vector<8x8xf32>
    %396 = arith.mulf %391, %395 : vector<8x8xf32>
    %cst_177 = arith.constant dense<0.000000e+00> : vector<8x8xf32>
    %397 = tpu.matmul %396, %385, %cst_177 {dimension_numbers = #tpu.dot_dimension_numbers<[1], [0], [0], [1], [0, 0, 1, 1], [], []>} : vector<8x8xf32>, vector<8x8xf32>, vector<8x8xf32> -> vector<8x8xf32>
    %398 = vector.extract_strided_slice %358 {offsets = [8, 0], sizes = [8, 32], strides = [1, 1]} : vector<32x32xf32> to vector<8x32xf32>
    %cst_178 = arith.constant dense<0.000000e+00> : vector<8x32xf32>
    %399 = tpu.matmul %397, %398, %cst_178 {dimension_numbers = #tpu.dot_dimension_numbers<[1], [0], [0], [1], [0, 0, 1, 1], [], []>} : vector<8x8xf32>, vector<8x32xf32>, vector<8x32xf32> -> vector<8x32xf32>
    %400 = arith.addf %380, %399 : vector<8x32xf32>
    %401 = vector.extract_strided_slice %344 {offsets = [0, 16], sizes = [8, 8], strides = [1, 1]} : vector<8x32xf32> to vector<8x8xf32>
    %cst_179 = arith.constant 0.353553385 : f32
    %402 = vector.broadcast %cst_179 : f32 to vector<8x8xf32>
    %403 = arith.mulf %401, %402 : vector<8x8xf32>
    %404 = vector.extract_strided_slice %350 {offsets = [0, 16], sizes = [8, 8], strides = [1, 1]} : vector<8x32xf32> to vector<8x8xf32>
    %405 = vector.extract_strided_slice %356 {offsets = [0, 16], sizes = [8, 8], strides = [1, 1]} : vector<8x32xf32> to vector<8x8xf32>
    %cst_180 = arith.constant dense<0.000000e+00> : vector<8x8xf32>
    %406 = tpu.matmul %403, %404, %cst_180 {dimension_numbers = #tpu.dot_dimension_numbers<[1], [1], [0], [0], [0, 0, 1, 0], [], []>} : vector<8x8xf32>, vector<8x8xf32>, vector<8x8xf32> -> vector<8x8xf32>
    %cst_181 = arith.constant dense<0xFF800000> : vector<8xf32>
    %407 = vector.multi_reduction <maximumf>, %406, %cst_181 [1] : vector<8x8xf32> to vector<8xf32>
    %408 = vector.shape_cast %407 : vector<8xf32> to vector<8x1xf32>
    %409 = vector.broadcast %408 : vector<8x1xf32> to vector<8x8xf32>
    %410 = arith.subf %406, %409 : vector<8x8xf32>
    %411 = math.exp %410 : vector<8x8xf32>
    %cst_182 = arith.constant dense<0.000000e+00> : vector<8xf32>
    %412 = vector.multi_reduction <add>, %411, %cst_182 [1] : vector<8x8xf32> to vector<8xf32>
    %413 = vector.shape_cast %412 : vector<8xf32> to vector<8x1xf32>
    %414 = tpu.reciprocal %413 {approx = true} : vector<8x1xf32> -> vector<8x1xf32>
    %415 = vector.broadcast %414 : vector<8x1xf32> to vector<8x8xf32>
    %416 = arith.mulf %411, %415 : vector<8x8xf32>
    %cst_183 = arith.constant dense<0.000000e+00> : vector<8x8xf32>
    %417 = tpu.matmul %416, %405, %cst_183 {dimension_numbers = #tpu.dot_dimension_numbers<[1], [0], [0], [1], [0, 0, 1, 1], [], []>} : vector<8x8xf32>, vector<8x8xf32>, vector<8x8xf32> -> vector<8x8xf32>
    %418 = vector.extract_strided_slice %358 {offsets = [16, 0], sizes = [8, 32], strides = [1, 1]} : vector<32x32xf32> to vector<8x32xf32>
    %cst_184 = arith.constant dense<0.000000e+00> : vector<8x32xf32>
    %419 = tpu.matmul %417, %418, %cst_184 {dimension_numbers = #tpu.dot_dimension_numbers<[1], [0], [0], [1], [0, 0, 1, 1], [], []>} : vector<8x8xf32>, vector<8x32xf32>, vector<8x32xf32> -> vector<8x32xf32>
    %420 = arith.addf %400, %419 : vector<8x32xf32>
    %421 = vector.extract_strided_slice %344 {offsets = [0, 24], sizes = [8, 8], strides = [1, 1]} : vector<8x32xf32> to vector<8x8xf32>
    %cst_185 = arith.constant 0.353553385 : f32
    %422 = vector.broadcast %cst_185 : f32 to vector<8x8xf32>
    %423 = arith.mulf %421, %422 : vector<8x8xf32>
    %424 = vector.extract_strided_slice %350 {offsets = [0, 24], sizes = [8, 8], strides = [1, 1]} : vector<8x32xf32> to vector<8x8xf32>
    %425 = vector.extract_strided_slice %356 {offsets = [0, 24], sizes = [8, 8], strides = [1, 1]} : vector<8x32xf32> to vector<8x8xf32>
    %cst_186 = arith.constant dense<0.000000e+00> : vector<8x8xf32>
    %426 = tpu.matmul %423, %424, %cst_186 {dimension_numbers = #tpu.dot_dimension_numbers<[1], [1], [0], [0], [0, 0, 1, 0], [], []>} : vector<8x8xf32>, vector<8x8xf32>, vector<8x8xf32> -> vector<8x8xf32>
    %cst_187 = arith.constant dense<0xFF800000> : vector<8xf32>
    %427 = vector.multi_reduction <maximumf>, %426, %cst_187 [1] : vector<8x8xf32> to vector<8xf32>
    %428 = vector.shape_cast %427 : vector<8xf32> to vector<8x1xf32>
    %429 = vector.broadcast %428 : vector<8x1xf32> to vector<8x8xf32>
    %430 = arith.subf %426, %429 : vector<8x8xf32>
    %431 = math.exp %430 : vector<8x8xf32>
    %cst_188 = arith.constant dense<0.000000e+00> : vector<8xf32>
    %432 = vector.multi_reduction <add>, %431, %cst_188 [1] : vector<8x8xf32> to vector<8xf32>
    %433 = vector.shape_cast %432 : vector<8xf32> to vector<8x1xf32>
    %434 = tpu.reciprocal %433 {approx = true} : vector<8x1xf32> -> vector<8x1xf32>
    %435 = vector.broadcast %434 : vector<8x1xf32> to vector<8x8xf32>
    %436 = arith.mulf %431, %435 : vector<8x8xf32>
    %cst_189 = arith.constant dense<0.000000e+00> : vector<8x8xf32>
    %437 = tpu.matmul %436, %425, %cst_189 {dimension_numbers = #tpu.dot_dimension_numbers<[1], [0], [0], [1], [0, 0, 1, 1], [], []>} : vector<8x8xf32>, vector<8x8xf32>, vector<8x8xf32> -> vector<8x8xf32>
    %438 = vector.extract_strided_slice %358 {offsets = [24, 0], sizes = [8, 32], strides = [1, 1]} : vector<32x32xf32> to vector<8x32xf32>
    %cst_190 = arith.constant dense<0.000000e+00> : vector<8x32xf32>
    %439 = tpu.matmul %437, %438, %cst_190 {dimension_numbers = #tpu.dot_dimension_numbers<[1], [0], [0], [1], [0, 0, 1, 1], [], []>} : vector<8x8xf32>, vector<8x32xf32>, vector<8x32xf32> -> vector<8x32xf32>
    %440 = arith.addf %420, %439 : vector<8x32xf32>
    %441 = vector.broadcast %359 : vector<1x32xf32> to vector<8x32xf32>
    %442 = arith.addf %440, %441 : vector<8x32xf32>
    %443 = arith.addf %442, %314 : vector<8x32xf32>
    %c4_191 = arith.constant 4 : index
    %c0_192 = arith.constant 0 : index
    %444 = vector.load %arg4[%c4_191, %c0_192] : memref<7x32xf32, #tpu.memory_space<vmem>>, vector<1x32xf32>
    %c4_193 = arith.constant 4 : index
    %c0_194 = arith.constant 0 : index
    %445 = vector.load %arg5[%c4_193, %c0_194] : memref<7x32xf32, #tpu.memory_space<vmem>>, vector<1x32xf32>
    %cst_195 = arith.constant dense<0.000000e+00> : vector<8xf32>
    %446 = vector.multi_reduction <add>, %443, %cst_195 [1] : vector<8x32xf32> to vector<8xf32>
    %447 = vector.shape_cast %446 : vector<8xf32> to vector<8x1xf32>
    %cst_196 = arith.constant 3.200000e+01 : f32
    %448 = vector.broadcast %cst_196 : f32 to vector<8x1xf32>
    %449 = arith.divf %447, %448 : vector<8x1xf32>
    %450 = vector.broadcast %449 : vector<8x1xf32> to vector<8x32xf32>
    %451 = arith.subf %443, %450 : vector<8x32xf32>
    %452 = arith.mulf %451, %451 : vector<8x32xf32>
    %cst_197 = arith.constant dense<0.000000e+00> : vector<8xf32>
    %453 = vector.multi_reduction <add>, %452, %cst_197 [1] : vector<8x32xf32> to vector<8xf32>
    %454 = vector.shape_cast %453 : vector<8xf32> to vector<8x1xf32>
    %cst_198 = arith.constant 3.200000e+01 : f32
    %455 = vector.broadcast %cst_198 : f32 to vector<8x1xf32>
    %456 = arith.divf %454, %455 : vector<8x1xf32>
    %457 = vector.broadcast %449 : vector<8x1xf32> to vector<8x32xf32>
    %458 = arith.subf %443, %457 : vector<8x32xf32>
    %cst_199 = arith.constant 9.99999997E-7 : f32
    %459 = vector.broadcast %cst_199 : f32 to vector<8x1xf32>
    %460 = arith.addf %456, %459 : vector<8x1xf32>
    %461 = math.rsqrt %460 : vector<8x1xf32>
    %462 = vector.broadcast %461 : vector<8x1xf32> to vector<8x32xf32>
    %463 = arith.mulf %458, %462 : vector<8x32xf32>
    %464 = vector.broadcast %444 : vector<1x32xf32> to vector<8x32xf32>
    %465 = arith.mulf %463, %464 : vector<8x32xf32>
    %466 = vector.broadcast %445 : vector<1x32xf32> to vector<8x32xf32>
    %467 = arith.addf %465, %466 : vector<8x32xf32>
    %c12 = arith.constant 12 : index
    %c0_200 = arith.constant 0 : index
    %c0_201 = arith.constant 0 : index
    %468 = vector.load %arg6[%c12, %c0_200, %c0_201] : memref<16x32x32xf32, #tpu.memory_space<vmem>>, vector<1x32x32xf32>
    %469 = vector.shape_cast %468 : vector<1x32x32xf32> to vector<32x32xf32>
    %cst_202 = arith.constant dense<0.000000e+00> : vector<8x32xf32>
    %470 = tpu.matmul %467, %469, %cst_202 {dimension_numbers = #tpu.dot_dimension_numbers<[1], [0], [0], [1], [0, 0, 1, 1], [], []>} : vector<8x32xf32>, vector<32x32xf32>, vector<8x32xf32> -> vector<8x32xf32>
    %c12_203 = arith.constant 12 : index
    %c0_204 = arith.constant 0 : index
    %471 = vector.load %arg7[%c12_203, %c0_204] : memref<16x32xf32, #tpu.memory_space<vmem>>, vector<1x32xf32>
    %472 = vector.broadcast %471 : vector<1x32xf32> to vector<8x32xf32>
    %473 = arith.addf %470, %472 : vector<8x32xf32>
    %c13 = arith.constant 13 : index
    %c0_205 = arith.constant 0 : index
    %c0_206 = arith.constant 0 : index
    %474 = vector.load %arg6[%c13, %c0_205, %c0_206] : memref<16x32x32xf32, #tpu.memory_space<vmem>>, vector<1x32x32xf32>
    %475 = vector.shape_cast %474 : vector<1x32x32xf32> to vector<32x32xf32>
    %cst_207 = arith.constant dense<0.000000e+00> : vector<16x32xf32>
    %476 = tpu.matmul %3, %475, %cst_207 {dimension_numbers = #tpu.dot_dimension_numbers<[1], [0], [0], [1], [0, 0, 1, 1], [], []>} : vector<16x32xf32>, vector<32x32xf32>, vector<16x32xf32> -> vector<16x32xf32>
    %c13_208 = arith.constant 13 : index
    %c0_209 = arith.constant 0 : index
    %477 = vector.load %arg7[%c13_208, %c0_209] : memref<16x32xf32, #tpu.memory_space<vmem>>, vector<1x32xf32>
    %478 = vector.broadcast %477 : vector<1x32xf32> to vector<16x32xf32>
    %479 = arith.addf %476, %478 : vector<16x32xf32>
    %c14 = arith.constant 14 : index
    %c0_210 = arith.constant 0 : index
    %c0_211 = arith.constant 0 : index
    %480 = vector.load %arg6[%c14, %c0_210, %c0_211] : memref<16x32x32xf32, #tpu.memory_space<vmem>>, vector<1x32x32xf32>
    %481 = vector.shape_cast %480 : vector<1x32x32xf32> to vector<32x32xf32>
    %cst_212 = arith.constant dense<0.000000e+00> : vector<16x32xf32>
    %482 = tpu.matmul %3, %481, %cst_212 {dimension_numbers = #tpu.dot_dimension_numbers<[1], [0], [0], [1], [0, 0, 1, 1], [], []>} : vector<16x32xf32>, vector<32x32xf32>, vector<16x32xf32> -> vector<16x32xf32>
    %c14_213 = arith.constant 14 : index
    %c0_214 = arith.constant 0 : index
    %483 = vector.load %arg7[%c14_213, %c0_214] : memref<16x32xf32, #tpu.memory_space<vmem>>, vector<1x32xf32>
    %484 = vector.broadcast %483 : vector<1x32xf32> to vector<16x32xf32>
    %485 = arith.addf %482, %484 : vector<16x32xf32>
    %c15 = arith.constant 15 : index
    %c0_215 = arith.constant 0 : index
    %c0_216 = arith.constant 0 : index
    %486 = vector.load %arg6[%c15, %c0_215, %c0_216] : memref<16x32x32xf32, #tpu.memory_space<vmem>>, vector<1x32x32xf32>
    %487 = vector.shape_cast %486 : vector<1x32x32xf32> to vector<32x32xf32>
    %c15_217 = arith.constant 15 : index
    %c0_218 = arith.constant 0 : index
    %488 = vector.load %arg7[%c15_217, %c0_218] : memref<16x32xf32, #tpu.memory_space<vmem>>, vector<1x32xf32>
    %cst_219 = arith.constant 0.000000e+00 : f32
    %489 = vector.broadcast %cst_219 : f32 to vector<8x32xf32>
    %490 = vector.extract_strided_slice %473 {offsets = [0, 0], sizes = [8, 8], strides = [1, 1]} : vector<8x32xf32> to vector<8x8xf32>
    %cst_220 = arith.constant 0.353553385 : f32
    %491 = vector.broadcast %cst_220 : f32 to vector<8x8xf32>
    %492 = arith.mulf %490, %491 : vector<8x8xf32>
    %493 = vector.extract_strided_slice %479 {offsets = [0, 0], sizes = [16, 8], strides = [1, 1]} : vector<16x32xf32> to vector<16x8xf32>
    %494 = vector.extract_strided_slice %485 {offsets = [0, 0], sizes = [16, 8], strides = [1, 1]} : vector<16x32xf32> to vector<16x8xf32>
    %cst_221 = arith.constant dense<0.000000e+00> : vector<8x16xf32>
    %495 = tpu.matmul %492, %493, %cst_221 {dimension_numbers = #tpu.dot_dimension_numbers<[1], [1], [0], [0], [0, 0, 1, 0], [], []>} : vector<8x8xf32>, vector<16x8xf32>, vector<8x16xf32> -> vector<8x16xf32>
    %496 = vector.broadcast %9 : vector<1x16xf32> to vector<8x16xf32>
    %497 = arith.addf %495, %496 : vector<8x16xf32>
    %cst_222 = arith.constant dense<0xFF800000> : vector<8xf32>
    %498 = vector.multi_reduction <maximumf>, %497, %cst_222 [1] : vector<8x16xf32> to vector<8xf32>
    %499 = vector.shape_cast %498 : vector<8xf32> to vector<8x1xf32>
    %500 = vector.broadcast %499 : vector<8x1xf32> to vector<8x16xf32>
    %501 = arith.subf %497, %500 : vector<8x16xf32>
    %502 = math.exp %501 : vector<8x16xf32>
    %cst_223 = arith.constant dense<0.000000e+00> : vector<8xf32>
    %503 = vector.multi_reduction <add>, %502, %cst_223 [1] : vector<8x16xf32> to vector<8xf32>
    %504 = vector.shape_cast %503 : vector<8xf32> to vector<8x1xf32>
    %505 = tpu.reciprocal %504 {approx = true} : vector<8x1xf32> -> vector<8x1xf32>
    %506 = vector.broadcast %505 : vector<8x1xf32> to vector<8x16xf32>
    %507 = arith.mulf %502, %506 : vector<8x16xf32>
    %cst_224 = arith.constant dense<0.000000e+00> : vector<8x8xf32>
    %508 = tpu.matmul %507, %494, %cst_224 {dimension_numbers = #tpu.dot_dimension_numbers<[1], [0], [0], [1], [0, 0, 1, 1], [], []>} : vector<8x16xf32>, vector<16x8xf32>, vector<8x8xf32> -> vector<8x8xf32>
    %509 = vector.extract_strided_slice %487 {offsets = [0, 0], sizes = [8, 32], strides = [1, 1]} : vector<32x32xf32> to vector<8x32xf32>
    %cst_225 = arith.constant dense<0.000000e+00> : vector<8x32xf32>
    %510 = tpu.matmul %508, %509, %cst_225 {dimension_numbers = #tpu.dot_dimension_numbers<[1], [0], [0], [1], [0, 0, 1, 1], [], []>} : vector<8x8xf32>, vector<8x32xf32>, vector<8x32xf32> -> vector<8x32xf32>
    %511 = arith.addf %489, %510 : vector<8x32xf32>
    %512 = vector.extract_strided_slice %473 {offsets = [0, 8], sizes = [8, 8], strides = [1, 1]} : vector<8x32xf32> to vector<8x8xf32>
    %cst_226 = arith.constant 0.353553385 : f32
    %513 = vector.broadcast %cst_226 : f32 to vector<8x8xf32>
    %514 = arith.mulf %512, %513 : vector<8x8xf32>
    %515 = vector.extract_strided_slice %479 {offsets = [0, 8], sizes = [16, 8], strides = [1, 1]} : vector<16x32xf32> to vector<16x8xf32>
    %516 = vector.extract_strided_slice %485 {offsets = [0, 8], sizes = [16, 8], strides = [1, 1]} : vector<16x32xf32> to vector<16x8xf32>
    %cst_227 = arith.constant dense<0.000000e+00> : vector<8x16xf32>
    %517 = tpu.matmul %514, %515, %cst_227 {dimension_numbers = #tpu.dot_dimension_numbers<[1], [1], [0], [0], [0, 0, 1, 0], [], []>} : vector<8x8xf32>, vector<16x8xf32>, vector<8x16xf32> -> vector<8x16xf32>
    %518 = vector.broadcast %9 : vector<1x16xf32> to vector<8x16xf32>
    %519 = arith.addf %517, %518 : vector<8x16xf32>
    %cst_228 = arith.constant dense<0xFF800000> : vector<8xf32>
    %520 = vector.multi_reduction <maximumf>, %519, %cst_228 [1] : vector<8x16xf32> to vector<8xf32>
    %521 = vector.shape_cast %520 : vector<8xf32> to vector<8x1xf32>
    %522 = vector.broadcast %521 : vector<8x1xf32> to vector<8x16xf32>
    %523 = arith.subf %519, %522 : vector<8x16xf32>
    %524 = math.exp %523 : vector<8x16xf32>
    %cst_229 = arith.constant dense<0.000000e+00> : vector<8xf32>
    %525 = vector.multi_reduction <add>, %524, %cst_229 [1] : vector<8x16xf32> to vector<8xf32>
    %526 = vector.shape_cast %525 : vector<8xf32> to vector<8x1xf32>
    %527 = tpu.reciprocal %526 {approx = true} : vector<8x1xf32> -> vector<8x1xf32>
    %528 = vector.broadcast %527 : vector<8x1xf32> to vector<8x16xf32>
    %529 = arith.mulf %524, %528 : vector<8x16xf32>
    %cst_230 = arith.constant dense<0.000000e+00> : vector<8x8xf32>
    %530 = tpu.matmul %529, %516, %cst_230 {dimension_numbers = #tpu.dot_dimension_numbers<[1], [0], [0], [1], [0, 0, 1, 1], [], []>} : vector<8x16xf32>, vector<16x8xf32>, vector<8x8xf32> -> vector<8x8xf32>
    %531 = vector.extract_strided_slice %487 {offsets = [8, 0], sizes = [8, 32], strides = [1, 1]} : vector<32x32xf32> to vector<8x32xf32>
    %cst_231 = arith.constant dense<0.000000e+00> : vector<8x32xf32>
    %532 = tpu.matmul %530, %531, %cst_231 {dimension_numbers = #tpu.dot_dimension_numbers<[1], [0], [0], [1], [0, 0, 1, 1], [], []>} : vector<8x8xf32>, vector<8x32xf32>, vector<8x32xf32> -> vector<8x32xf32>
    %533 = arith.addf %511, %532 : vector<8x32xf32>
    %534 = vector.extract_strided_slice %473 {offsets = [0, 16], sizes = [8, 8], strides = [1, 1]} : vector<8x32xf32> to vector<8x8xf32>
    %cst_232 = arith.constant 0.353553385 : f32
    %535 = vector.broadcast %cst_232 : f32 to vector<8x8xf32>
    %536 = arith.mulf %534, %535 : vector<8x8xf32>
    %537 = vector.extract_strided_slice %479 {offsets = [0, 16], sizes = [16, 8], strides = [1, 1]} : vector<16x32xf32> to vector<16x8xf32>
    %538 = vector.extract_strided_slice %485 {offsets = [0, 16], sizes = [16, 8], strides = [1, 1]} : vector<16x32xf32> to vector<16x8xf32>
    %cst_233 = arith.constant dense<0.000000e+00> : vector<8x16xf32>
    %539 = tpu.matmul %536, %537, %cst_233 {dimension_numbers = #tpu.dot_dimension_numbers<[1], [1], [0], [0], [0, 0, 1, 0], [], []>} : vector<8x8xf32>, vector<16x8xf32>, vector<8x16xf32> -> vector<8x16xf32>
    %540 = vector.broadcast %9 : vector<1x16xf32> to vector<8x16xf32>
    %541 = arith.addf %539, %540 : vector<8x16xf32>
    %cst_234 = arith.constant dense<0xFF800000> : vector<8xf32>
    %542 = vector.multi_reduction <maximumf>, %541, %cst_234 [1] : vector<8x16xf32> to vector<8xf32>
    %543 = vector.shape_cast %542 : vector<8xf32> to vector<8x1xf32>
    %544 = vector.broadcast %543 : vector<8x1xf32> to vector<8x16xf32>
    %545 = arith.subf %541, %544 : vector<8x16xf32>
    %546 = math.exp %545 : vector<8x16xf32>
    %cst_235 = arith.constant dense<0.000000e+00> : vector<8xf32>
    %547 = vector.multi_reduction <add>, %546, %cst_235 [1] : vector<8x16xf32> to vector<8xf32>
    %548 = vector.shape_cast %547 : vector<8xf32> to vector<8x1xf32>
    %549 = tpu.reciprocal %548 {approx = true} : vector<8x1xf32> -> vector<8x1xf32>
    %550 = vector.broadcast %549 : vector<8x1xf32> to vector<8x16xf32>
    %551 = arith.mulf %546, %550 : vector<8x16xf32>
    %cst_236 = arith.constant dense<0.000000e+00> : vector<8x8xf32>
    %552 = tpu.matmul %551, %538, %cst_236 {dimension_numbers = #tpu.dot_dimension_numbers<[1], [0], [0], [1], [0, 0, 1, 1], [], []>} : vector<8x16xf32>, vector<16x8xf32>, vector<8x8xf32> -> vector<8x8xf32>
    %553 = vector.extract_strided_slice %487 {offsets = [16, 0], sizes = [8, 32], strides = [1, 1]} : vector<32x32xf32> to vector<8x32xf32>
    %cst_237 = arith.constant dense<0.000000e+00> : vector<8x32xf32>
    %554 = tpu.matmul %552, %553, %cst_237 {dimension_numbers = #tpu.dot_dimension_numbers<[1], [0], [0], [1], [0, 0, 1, 1], [], []>} : vector<8x8xf32>, vector<8x32xf32>, vector<8x32xf32> -> vector<8x32xf32>
    %555 = arith.addf %533, %554 : vector<8x32xf32>
    %556 = vector.extract_strided_slice %473 {offsets = [0, 24], sizes = [8, 8], strides = [1, 1]} : vector<8x32xf32> to vector<8x8xf32>
    %cst_238 = arith.constant 0.353553385 : f32
    %557 = vector.broadcast %cst_238 : f32 to vector<8x8xf32>
    %558 = arith.mulf %556, %557 : vector<8x8xf32>
    %559 = vector.extract_strided_slice %479 {offsets = [0, 24], sizes = [16, 8], strides = [1, 1]} : vector<16x32xf32> to vector<16x8xf32>
    %560 = vector.extract_strided_slice %485 {offsets = [0, 24], sizes = [16, 8], strides = [1, 1]} : vector<16x32xf32> to vector<16x8xf32>
    %cst_239 = arith.constant dense<0.000000e+00> : vector<8x16xf32>
    %561 = tpu.matmul %558, %559, %cst_239 {dimension_numbers = #tpu.dot_dimension_numbers<[1], [1], [0], [0], [0, 0, 1, 0], [], []>} : vector<8x8xf32>, vector<16x8xf32>, vector<8x16xf32> -> vector<8x16xf32>
    %562 = vector.broadcast %9 : vector<1x16xf32> to vector<8x16xf32>
    %563 = arith.addf %561, %562 : vector<8x16xf32>
    %cst_240 = arith.constant dense<0xFF800000> : vector<8xf32>
    %564 = vector.multi_reduction <maximumf>, %563, %cst_240 [1] : vector<8x16xf32> to vector<8xf32>
    %565 = vector.shape_cast %564 : vector<8xf32> to vector<8x1xf32>
    %566 = vector.broadcast %565 : vector<8x1xf32> to vector<8x16xf32>
    %567 = arith.subf %563, %566 : vector<8x16xf32>
    %568 = math.exp %567 : vector<8x16xf32>
    %cst_241 = arith.constant dense<0.000000e+00> : vector<8xf32>
    %569 = vector.multi_reduction <add>, %568, %cst_241 [1] : vector<8x16xf32> to vector<8xf32>
    %570 = vector.shape_cast %569 : vector<8xf32> to vector<8x1xf32>
    %571 = tpu.reciprocal %570 {approx = true} : vector<8x1xf32> -> vector<8x1xf32>
    %572 = vector.broadcast %571 : vector<8x1xf32> to vector<8x16xf32>
    %573 = arith.mulf %568, %572 : vector<8x16xf32>
    %cst_242 = arith.constant dense<0.000000e+00> : vector<8x8xf32>
    %574 = tpu.matmul %573, %560, %cst_242 {dimension_numbers = #tpu.dot_dimension_numbers<[1], [0], [0], [1], [0, 0, 1, 1], [], []>} : vector<8x16xf32>, vector<16x8xf32>, vector<8x8xf32> -> vector<8x8xf32>
    %575 = vector.extract_strided_slice %487 {offsets = [24, 0], sizes = [8, 32], strides = [1, 1]} : vector<32x32xf32> to vector<8x32xf32>
    %cst_243 = arith.constant dense<0.000000e+00> : vector<8x32xf32>
    %576 = tpu.matmul %574, %575, %cst_243 {dimension_numbers = #tpu.dot_dimension_numbers<[1], [0], [0], [1], [0, 0, 1, 1], [], []>} : vector<8x8xf32>, vector<8x32xf32>, vector<8x32xf32> -> vector<8x32xf32>
    %577 = arith.addf %555, %576 : vector<8x32xf32>
    %578 = vector.broadcast %488 : vector<1x32xf32> to vector<8x32xf32>
    %579 = arith.addf %577, %578 : vector<8x32xf32>
    %580 = arith.addf %579, %443 : vector<8x32xf32>
    %c5_244 = arith.constant 5 : index
    %c0_245 = arith.constant 0 : index
    %581 = vector.load %arg4[%c5_244, %c0_245] : memref<7x32xf32, #tpu.memory_space<vmem>>, vector<1x32xf32>
    %c5_246 = arith.constant 5 : index
    %c0_247 = arith.constant 0 : index
    %582 = vector.load %arg5[%c5_246, %c0_247] : memref<7x32xf32, #tpu.memory_space<vmem>>, vector<1x32xf32>
    %cst_248 = arith.constant dense<0.000000e+00> : vector<8xf32>
    %583 = vector.multi_reduction <add>, %580, %cst_248 [1] : vector<8x32xf32> to vector<8xf32>
    %584 = vector.shape_cast %583 : vector<8xf32> to vector<8x1xf32>
    %cst_249 = arith.constant 3.200000e+01 : f32
    %585 = vector.broadcast %cst_249 : f32 to vector<8x1xf32>
    %586 = arith.divf %584, %585 : vector<8x1xf32>
    %587 = vector.broadcast %586 : vector<8x1xf32> to vector<8x32xf32>
    %588 = arith.subf %580, %587 : vector<8x32xf32>
    %589 = arith.mulf %588, %588 : vector<8x32xf32>
    %cst_250 = arith.constant dense<0.000000e+00> : vector<8xf32>
    %590 = vector.multi_reduction <add>, %589, %cst_250 [1] : vector<8x32xf32> to vector<8xf32>
    %591 = vector.shape_cast %590 : vector<8xf32> to vector<8x1xf32>
    %cst_251 = arith.constant 3.200000e+01 : f32
    %592 = vector.broadcast %cst_251 : f32 to vector<8x1xf32>
    %593 = arith.divf %591, %592 : vector<8x1xf32>
    %594 = vector.broadcast %586 : vector<8x1xf32> to vector<8x32xf32>
    %595 = arith.subf %580, %594 : vector<8x32xf32>
    %cst_252 = arith.constant 9.99999997E-7 : f32
    %596 = vector.broadcast %cst_252 : f32 to vector<8x1xf32>
    %597 = arith.addf %593, %596 : vector<8x1xf32>
    %598 = math.rsqrt %597 : vector<8x1xf32>
    %599 = vector.broadcast %598 : vector<8x1xf32> to vector<8x32xf32>
    %600 = arith.mulf %595, %599 : vector<8x32xf32>
    %601 = vector.broadcast %581 : vector<1x32xf32> to vector<8x32xf32>
    %602 = arith.mulf %600, %601 : vector<8x32xf32>
    %603 = vector.broadcast %582 : vector<1x32xf32> to vector<8x32xf32>
    %604 = arith.addf %602, %603 : vector<8x32xf32>
    %c1_253 = arith.constant 1 : index
    %c0_254 = arith.constant 0 : index
    %c0_255 = arith.constant 0 : index
    %605 = vector.load %arg8[%c1_253, %c0_254, %c0_255] : memref<2x32x64xf32, #tpu.memory_space<vmem>>, vector<1x32x64xf32>
    %606 = vector.shape_cast %605 : vector<1x32x64xf32> to vector<32x64xf32>
    %cst_256 = arith.constant dense<0.000000e+00> : vector<8x64xf32>
    %607 = tpu.matmul %604, %606, %cst_256 {dimension_numbers = #tpu.dot_dimension_numbers<[1], [0], [0], [1], [0, 0, 1, 1], [], []>} : vector<8x32xf32>, vector<32x64xf32>, vector<8x64xf32> -> vector<8x64xf32>
    %c1_257 = arith.constant 1 : index
    %c0_258 = arith.constant 0 : index
    %608 = vector.load %arg9[%c1_257, %c0_258] : memref<2x64xf32, #tpu.memory_space<vmem>>, vector<1x64xf32>
    %609 = vector.broadcast %608 : vector<1x64xf32> to vector<8x64xf32>
    %610 = arith.addf %607, %609 : vector<8x64xf32>
    %cst_259 = arith.constant 0.000000e+00 : f32
    %611 = vector.broadcast %cst_259 : f32 to vector<8x64xf32>
    %612 = arith.maximumf %610, %611 : vector<8x64xf32>
    %c1_260 = arith.constant 1 : index
    %c0_261 = arith.constant 0 : index
    %c0_262 = arith.constant 0 : index
    %613 = vector.load %arg10[%c1_260, %c0_261, %c0_262] : memref<2x64x32xf32, #tpu.memory_space<vmem>>, vector<1x64x32xf32>
    %614 = vector.shape_cast %613 : vector<1x64x32xf32> to vector<64x32xf32>
    %cst_263 = arith.constant dense<0.000000e+00> : vector<8x32xf32>
    %615 = tpu.matmul %612, %614, %cst_263 {dimension_numbers = #tpu.dot_dimension_numbers<[1], [0], [0], [1], [0, 0, 1, 1], [], []>} : vector<8x64xf32>, vector<64x32xf32>, vector<8x32xf32> -> vector<8x32xf32>
    %c1_264 = arith.constant 1 : index
    %c0_265 = arith.constant 0 : index
    %616 = vector.load %arg11[%c1_264, %c0_265] : memref<2x32xf32, #tpu.memory_space<vmem>>, vector<1x32xf32>
    %617 = vector.broadcast %616 : vector<1x32xf32> to vector<8x32xf32>
    %618 = arith.addf %615, %617 : vector<8x32xf32>
    %619 = arith.addf %618, %580 : vector<8x32xf32>
    %c6_266 = arith.constant 6 : index
    %c0_267 = arith.constant 0 : index
    %620 = vector.load %arg4[%c6_266, %c0_267] : memref<7x32xf32, #tpu.memory_space<vmem>>, vector<1x32xf32>
    %c6_268 = arith.constant 6 : index
    %c0_269 = arith.constant 0 : index
    %621 = vector.load %arg5[%c6_268, %c0_269] : memref<7x32xf32, #tpu.memory_space<vmem>>, vector<1x32xf32>
    %cst_270 = arith.constant dense<0.000000e+00> : vector<8xf32>
    %622 = vector.multi_reduction <add>, %619, %cst_270 [1] : vector<8x32xf32> to vector<8xf32>
    %623 = vector.shape_cast %622 : vector<8xf32> to vector<8x1xf32>
    %cst_271 = arith.constant 3.200000e+01 : f32
    %624 = vector.broadcast %cst_271 : f32 to vector<8x1xf32>
    %625 = arith.divf %623, %624 : vector<8x1xf32>
    %626 = vector.broadcast %625 : vector<8x1xf32> to vector<8x32xf32>
    %627 = arith.subf %619, %626 : vector<8x32xf32>
    %628 = arith.mulf %627, %627 : vector<8x32xf32>
    %cst_272 = arith.constant dense<0.000000e+00> : vector<8xf32>
    %629 = vector.multi_reduction <add>, %628, %cst_272 [1] : vector<8x32xf32> to vector<8xf32>
    %630 = vector.shape_cast %629 : vector<8xf32> to vector<8x1xf32>
    %cst_273 = arith.constant 3.200000e+01 : f32
    %631 = vector.broadcast %cst_273 : f32 to vector<8x1xf32>
    %632 = arith.divf %630, %631 : vector<8x1xf32>
    %633 = vector.broadcast %625 : vector<8x1xf32> to vector<8x32xf32>
    %634 = arith.subf %619, %633 : vector<8x32xf32>
    %cst_274 = arith.constant 9.99999997E-7 : f32
    %635 = vector.broadcast %cst_274 : f32 to vector<8x1xf32>
    %636 = arith.addf %632, %635 : vector<8x1xf32>
    %637 = math.rsqrt %636 : vector<8x1xf32>
    %638 = vector.broadcast %637 : vector<8x1xf32> to vector<8x32xf32>
    %639 = arith.mulf %634, %638 : vector<8x32xf32>
    %640 = vector.broadcast %620 : vector<1x32xf32> to vector<8x32xf32>
    %641 = arith.mulf %639, %640 : vector<8x32xf32>
    %642 = vector.broadcast %621 : vector<1x32xf32> to vector<8x32xf32>
    %643 = arith.addf %641, %642 : vector<8x32xf32>
    %c0_275 = arith.constant 0 : index
    %c0_276 = arith.constant 0 : index
    %c0_277 = arith.constant 0 : index
    %644 = vector.load %arg12[%c0_275, %c0_276, %c0_277] : memref<1x8x32xf32, #tpu.memory_space<vmem>>, vector<1x8x32xf32>
    %645 = vector.shape_cast %644 : vector<1x8x32xf32> to vector<8x32xf32>
    %646 = vector.shape_cast %643 : vector<8x32xf32> to vector<1x8x32xf32>
    tpu.vector_store %arg12[%c0_275, %c0_276, %c0_277], %646 {strides = array<i32>} : memref<1x8x32xf32, #tpu.memory_space<vmem>>, vector<1x8x32xf32>,
    return
  }
  func.func @transform_0(%arg0: i32) -> (i32, i32, i32) {
    %c0_i32 = arith.constant 0 : i32
    %c0_i32_0 = arith.constant 0 : i32
    %c0_i32_1 = arith.constant 0 : i32
    return %arg0, %c0_i32, %c0_i32_0 : i32, i32, i32
  }
  func.func @transform_1(%arg0: i32) -> (i32, i32, i32) {
    %c0_i32 = arith.constant 0 : i32
    %c0_i32_0 = arith.constant 0 : i32
    %c0_i32_1 = arith.constant 0 : i32
    return %arg0, %c0_i32, %c0_i32_0 : i32, i32, i32
  }
  func.func @transform_2(%arg0: i32) -> (i32, i32, i32) {
    %c0_i32 = arith.constant 0 : i32
    %c0_i32_0 = arith.constant 0 : i32
    %c0_i32_1 = arith.constant 0 : i32
    return %arg0, %c0_i32, %c0_i32_0 : i32, i32, i32
  }
  func.func @transform_3(%arg0: i32) -> (i32, i32) {
    %c0_i32 = arith.constant 0 : i32
    %c0_i32_0 = arith.constant 0 : i32
    %c0_i32_1 = arith.constant 0 : i32
    return %c0_i32, %c0_i32_0 : i32, i32
  }
  func.func @transform_4(%arg0: i32) -> (i32, i32) {
    %c0_i32 = arith.constant 0 : i32
    %c0_i32_0 = arith.constant 0 : i32
    %c0_i32_1 = arith.constant 0 : i32
    return %c0_i32, %c0_i32_0 : i32, i32
  }
  func.func @transform_5(%arg0: i32) -> (i32, i32, i32) {
    %c0_i32 = arith.constant 0 : i32
    %c0_i32_0 = arith.constant 0 : i32
    %c0_i32_1 = arith.constant 0 : i32
    %c0_i32_2 = arith.constant 0 : i32
    return %c0_i32, %c0_i32_0, %c0_i32_1 : i32, i32, i32
  }
  func.func @transform_6(%arg0: i32) -> (i32, i32) {
    %c0_i32 = arith.constant 0 : i32
    %c0_i32_0 = arith.constant 0 : i32
    %c0_i32_1 = arith.constant 0 : i32
    return %c0_i32, %c0_i32_0 : i32, i32
  }
  func.func @transform_7(%arg0: i32) -> (i32, i32, i32) {
    %c0_i32 = arith.constant 0 : i32
    %c0_i32_0 = arith.constant 0 : i32
    %c0_i32_1 = arith.constant 0 : i32
    %c0_i32_2 = arith.constant 0 : i32
    return %c0_i32, %c0_i32_0, %c0_i32_1 : i32, i32, i32
  }
  func.func @transform_8(%arg0: i32) -> (i32, i32) {
    %c0_i32 = arith.constant 0 : i32
    %c0_i32_0 = arith.constant 0 : i32
    %c0_i32_1 = arith.constant 0 : i32
    return %c0_i32, %c0_i32_0 : i32, i32
  }
  func.func @transform_9(%arg0: i32) -> (i32, i32, i32) {
    %c0_i32 = arith.constant 0 : i32
    %c0_i32_0 = arith.constant 0 : i32
    %c0_i32_1 = arith.constant 0 : i32
    %c0_i32_2 = arith.constant 0 : i32
    return %c0_i32, %c0_i32_0, %c0_i32_1 : i32, i32, i32
  }
  func.func @transform_10(%arg0: i32) -> (i32, i32) {
    %c0_i32 = arith.constant 0 : i32
    %c0_i32_0 = arith.constant 0 : i32
    %c0_i32_1 = arith.constant 0 : i32
    return %c0_i32, %c0_i32_0 : i32, i32
  }
  func.func @transform_11(%arg0: i32) -> (i32, i32, i32) {
    %c0_i32 = arith.constant 0 : i32
    %c0_i32_0 = arith.constant 0 : i32
    %c0_i32_1 = arith.constant 0 : i32
    return %arg0, %c0_i32, %c0_i32_0 : i32, i32, i32
  }
}

</mosaic_0001>

<bundles_post_ra>
// kernel: tpu_custom_call.1
= control target key start
LH: loop header
LB: loop body
LE: loop exit
PB: predicated region body
PF: predicated region fallthrough
CT: control target
= control target key end

     0   :  { %s8134_s0 = inlined_call_operand.vmem [shape: f32[2,8,32], index: 0, kind: input, shape index: {}]   ;;  %s8135_s1 = inlined_call_operand.vmem [shape: f32[2,16,32], index: 1, kind: input, shape index: {}]   ;;  %s8136_s2 = inlined_call_operand.vmem [shape: f32[2,1,16], index: 2, kind: input, shape index: {}]   ;;  %s8137_s3 = inlined_call_operand.vmem [shape: f32[7,32], index: 3, kind: input, shape index: {}]   ;;  %s8138_s4 = inlined_call_operand.vmem [shape: f32[7,32], index: 4, kind: input, shape index: {}]   ;;  %s8139_s5 = inlined_call_operand.hbm [shape: f32[16,32,32], index: 5, kind: input, shape index: {}]   ;;  %s8140_s6 = inlined_call_operand.vmem [shape: f32[16,32], index: 6, kind: input, shape index: {}]   ;;  %s8141_s7 = inlined_call_operand.vmem [shape: f32[2,32,64], index: 7, kind: input, shape index: {}]   ;;  %s8142_s8 = inlined_call_operand.vmem [shape: f32[2,64], index: 8, kind: input, shape index: {}]   ;;  %s8143_s9 = inlined_call_operand.vmem [shape: f32[2,64,32], index: 9, kind: input, shape index: {}]   ;;  %s8144_s10 = inlined_call_operand.vmem [shape: f32[2,32], index: 10, kind: input, shape index: {}]   ;;  %s8145_s11 = inlined_call_operand.hbm [shape: f32[2,8,32], index: 11, kind: output, shape index: {}]  }
   0x1   :  { %8153 = sst [smem:[#allocation9_spill]] %s8134_s0 }
   0x2   :  { %16 = vsyncpa [#allocation3], 0 }
   0x3   :  { %17 = vsyncpa [#allocation4], 0 }
   0x4   :  { %19 = vsyncpa [#allocation4 + $0x1], 0  ;;  %s7328_s17 = smov 0   ;;  %s7330_s18 = smov 0  }
   0x5   :  { %s7332_s19 = smov 0   ;;  %s7334_s20 = smov 0  }
   0x6 LB: > { %s7349_s21 = sadd.s32 4294967295, %s7256_s20   ;;  %s5971_s22 = sadd.s32 4294967294, %s7256_s20   ;;  %s7256_s20 = sphi %s7334_s20, %s8173_s20   ;;  %s7252_s19 = sphi %s7332_s19, %s8172_s19   ;;  %s7248_s18 = sphi %s7330_s18, %s8171_s18   ;;  %s7244_s17 = sphi %s7328_s17, %s8170_s17  }
   0x7   : > { %s7353_s23 = sadd.s32 1, %s7256_s20   ;;  %s278_s24 = sadd.s32 1, %s7252_s19 }
   0x8   : > { %s275_s25 = ssub.s32 %s7256_s20, %s7353_s23  ;;  %p288_p0 = scmp.ne.s32.totalorder %s7252_s19, %s7248_s18 }
   0x9   : > { %p276_p1 = scmp.eq.s32.totalorder %s275_s25, 0  ;;  %p289_p2 = scmp.eq.s32.totalorder %s7349_s21, 1 }
   0xa   : > { %p294_p3 = scmp.ne.s32.totalorder %s7248_s18, %s7244_s17  ;;  %p295_p4 = scmp.eq.s32.totalorder %s5971_s22, 1 }
   0xb   : > { %s7364_s26 = scalar_select %p276_p1, %s7252_s19, %s278_s24  }
   0xc   : > { %p7366_p5 = por %p289_p2, %p288_p0  ;;  %p7370_p6 = por %p295_p4, %p294_p3 }
   0xd   : > { %8154 = sst [smem:[#allocation8_spill]] %s7364_s26  ;;  %p5972_p7 = scmp.ge.s32.totalorder %s7256_s20, 1 }
   0xe   : > { %s8155_s27 = scalar_select %p7366_p5, 1, 0 }
   0xf   : > { %s8156_s28 = scalar_select %p7370_p6, 1, 0 }
  0x10   : > { %p302_p8 = scmp.lt.s32.totalorder %s7256_s20, 3  ;;  %p8146_p9 = scmp.eq.s32.totalorder %s7349_s21, 0 }
  0x11   : > { %s7258_s30 = smov [#allocation2]   ;;  %s7162_s16 = scalar_lea.hbm %s8139_s5, 8192 }
  0x12   : > { %p7377_p10 = pnand %p5972_p7, %p302_p8  ;;  %s320_s12 = sshll.u32 %s7258_s30, 4  ;;  %s321_s12 = int_to_ptr.vmem [resolvable:$true] %s320_s12 }
  0x13   : > { %p7163_p13 = scmp.ne.s32.totalorder %s8139_s5, %s7162_s16  ;;  %p7169_p3 = scmp.lt.u32.totalorder %s7162_s16, %s8139_s5 }
  0x14   : > { %s8157_s29 = scalar_select %p7377_p10, 1, 0 }
  0x15   : > { %p6970_p11 = pneg %p7377_p10 }
  0x17   : > { %p7385_p12 = pnand %p8146_p9, %p6970_p11 }
  0x19   : > { %p7164_p0 = pneg %p7385_p12 }
  0x1b   : > { %p7165_p1 = pnand %p7164_p0, %p7163_p13 }
  0x1d   : > { %p7166_p2 = pneg %p7165_p1 }
  0x1f   : > { %p7171_p4 = pnand %p7169_p3, %p7166_p2 }
  0x21   : > { %7174 = shalt.err (!%p7171_p4)
}
  0x22   : > { %s7175_s26 = scalar_lea.vmem %s321_s12, 8192  ;;  %p7183_p9 = scmp.lt.s32.totalorder %s321_s12, %s321_s12 }
  0x23   : > { %p7176_p7 = scmp.ne.s32.totalorder %s321_s12, %s7175_s26  ;;  %p7184_p6 = scmp.lt.s32.totalorder %s7175_s26, %s7175_s26 }
  0x25   : > { %p7178_p8 = pnand %p7176_p7, %p7164_p0  ;;  %p7185_p5 = por %p7184_p6, %p7183_p9 }
  0x27   : > { %p7179_p11 = pneg %p7178_p8 }
  0x29   : > { %p7186_p10 = pnand %p7185_p5, %p7179_p11 }
  0x2b   : > { %7189 = shalt.err (!%p7186_p10)
}
  0x2c   : > { %s7259_s14 = smov 128   ;;  %s7260_s15 = smov 8  }
  0x2d   : > { %6973 = dma.hbm_to_vmem [thread:$0]  (!%p7385_p12), %s8139_s5, 8192, %s321_s12, [#allocation3], %s7259_s14, %s7259_s14, %s7260_s15  }
  0x2e   : > { %p8159_p13 = scmp.ne.s32.totalorder %s8157_s29, 0 }
  0x2f   : > { %p8160_p1 = scmp.eq.s32.totalorder (!%p8159_p13), %s7349_s21, 0 }
  0x30   : > { %372 = sbr.rel (%p8159_p13) target bundleno = 12768 (0x31e0), region = 64 }
  0x37   : > { %7235 = dma.done.wait (%p8160_p1), [#allocation3], 8192   ;;  %p8161_p0 = pmov %p8160_p1 }
  0x38   : > { %p419_p5 = scmp.lt.s32.totalorder %s7349_s21, 1  ;;  %s8162_s0 = sld [smem:[#allocation9_spill]]  ;;  %vm439_vm0 = vcmask 261120   ;;  %v464_v7 = vld [vmem:[#allocation2] sm:$0xff]  ;;  %v465_v8 = vld [vmem:[#allocation2 + $0x8] sm:$0xff]  ;;  %v7261_v10 = vmov 0.0|0.0  }
  0x39   : > { %7237 = vsyncadd (%p8161_p0), [#allocation3], 4294959104  ;;  %v547_v9 = vld [vmem:[#allocation2 + $0x20] sm:$0xff]  ;;  %6792 = vmatprep.subr.bf16.mxu0 %v7261_v10  ;;  %v6793_v11 = vpack.c.bf16 %v465_v8, %v464_v7  ;;  %6798 = vmatprep.subr.bf16.mxu1 %v7261_v10  ;;  %v548_v12 = vld [vmem:[#allocation2 + $0x28] sm:$0xff]  ;;  %vm7262_vm1 = vmmov 0   ;;  %v7263_v18 = vmov 0.0  }
  0x3a   : > { %s7413_s26 = scalar_select %p419_p5, %s7349_s21, 1  ;;  %v466_v13 = vld [vmem:[#allocation2 + $0x10] sm:$0xff]  ;;  %v467_v14 = vld [vmem:[#allocation2 + $0x18] sm:$0xff]  ;;  %v6799_v15 = vpack.c.bf16 %v548_v12, %v547_v9  ;;  %6336 = vmatprep.mubr.msk.f32.mxu0 %vm7262_vm1, %v7263_v18  ;;  %6347 = vmatprep.mubr.msk.f32.mxu1 %vm7262_vm1, %v7263_v18  ;;  %v5981_v25 = vld [vmem:[%s8137_s3] ss:$0 sm:$0xff]  ;;  %vm713_vm2 = vcmask 64512  }
  0x3b   : > { %v549_v16 = vld [vmem:[#allocation2 + $0x30] sm:$0xff]  ;;  %v550_v17 = vld [vmem:[#allocation2 + $0x38] sm:$0xff]  ;;  %6794 = vmatpush3.bf16.msra.mxu0 %v6793_v11  ;;  %v6796_v19 = vpack.c.bf16 %v467_v14, %v466_v13  ;;  %v627_v27 = vld [vmem:[#allocation2 + $0x40] sm:$0xff]  ;;  %s7264_s25 = smov 120   ;;  %s8151_s30 = smov 112   ;;  %vm2046_vm4 = vcmask 130048  }
  0x3c   : > { %s5978_s13 = sshll.u32 %s7413_s26, 3  ;;  %6800 = vmatpush3.bf16.msra.mxu1 %v6799_v15  ;;  %6795 = vmatprep.subr.bf16.mxu0 %v7261_v10  ;;  %v6802_v20 = vpack.c.bf16 %v550_v17, %v549_v16  ;;  %v628_v28 = vld [vmem:[#allocation2 + $0x48] sm:$0xff]  ;;  %v5982_v29 = vld [vmem:[%s8138_s4] ss:$0 sm:$0xff]  ;;  %v629_v33 = vld [vmem:[#allocation2 + $0x50] sm:$0xff]  ;;  %s8149_s14 = smov 104  }
  0x3d   : > { %6801 = vmatprep.subr.bf16.mxu1 %v7261_v10  ;;  %v6805_v31 = vpack.c.bf16 %v628_v28, %v627_v27  ;;  %v630_v34 = vld [vmem:[#allocation2 + $0x58] sm:$0xff]  ;;  %v5983_v36 = vld [vmem:[%s8140_s6] ss:$0 sm:$0xff]  ;;  %v5985_v37 = vld [vmem:[%s8140_s6 + $0x1] ss:$0 sm:$0xff]  ;;  %s6123_s24 = sshll.u32 %s7413_s26, 4 }
  0x3e   : > { %s422_s12 = scalar_lea.vmem %s8162_s0, %s5978_s13  ;;  %v6808_v35 = vpack.c.bf16 %v630_v34, %v629_v33  ;;  %v5987_v45 = vld [vmem:[%s8140_s6 + $0x2] ss:$0 sm:$0xff]  ;;  %v708_v7 = vld [vmem:[#allocation2 + $0x68] sm:$0xff]  ;;  %vm7582_vm3 = vmpackc.low %vm713_vm2, %vm713_vm2  ;;  %s430_s13 = scalar_lea.vmem %s8136_s2, %s7413_s26  ;;  %vm3070_vm5 = vcmask 523264  }
  0x3f   : > { %v7419_v0 = vld [vmem:[%s422_s12] sm:$0xff]  ;;  %6797 = vmatpush3.bf16.msra.mxu0 %v6796_v19  ;;  %s7559_s12 = scalar_lea.vmem %s8135_s1, %s6123_s24  ;;  %s8166_s15 = smov 104  }
  0x40   : > { %v440_v1 = vsel %vm439_vm0, %v7419_v0, 0.0  ;;  %6803 = vmatpush3.bf16.msra.mxu1 %v6802_v20  ;;  %6804 = vmatprep.subr.bf16.mxu0 %v7261_v10  ;;  %v707_v13 = vld [vmem:[#allocation2 + $0x60] sm:$0xff]  ;;  %s6120_s22 = sshll.u32 %s7349_s21, 7  ;;  %p8167_p9 = scmp.ne.s32.totalorder %s8155_s27, 0 }
  0x41   : > { %441 = vadd.xlane.f32.xlu0 %v440_v1  ;;  %6366 = vmatprep.subr.mxu1 %v7263_v18  ;;  %s8091_s0 = scalar_lea.hbm %s8145_s11, %s6120_s22  ;;  %s7267_s21 = smov [#allocation5]  }
  0xce   : > { %v442_v2 = vpop.xlane.xlu0 %441 }
  0xcf   : > { %v444_v3 = vmul.f32 0.03125, %v442_v2 }
  0xd1   : > { %v445_v4 = vsub.f32 %v7419_v0, %v444_v3 }
  0xd3   : > { %v446_v5 = vmul.f32 %v445_v4, %v445_v4 }
  0xd5   : > { %v447_v6 = vsel %vm439_vm0, %v446_v5, 0.0 }
  0xd6   : > { %448 = vadd.xlane.f32.xlu0 %v447_v6 }
 0x163   : > { %v449_v21 = vpop.xlane.xlu0 %448 }
 0x164   : > { %v450_v22 = vmul.f32 0.03125, %v449_v21 }
 0x166   : > { %v451_v23 = vadd.f32 1e-06, %v450_v22 }
 0x168   : > { %7082 = vrsqrt.f32 %v451_v23 }
 0x172   : > { %v7083_v24 = vpop.eup %7082 }
 0x173   : > { %v453_v26 = vmul.f32 %v7083_v24, %v445_v4 }
 0x175   : > { %v458_v30 = vmul.f32 %v5981_v25, %v453_v26 }
 0x177   : > { %v463_v32 = vadd.f32 %v5982_v29, %v458_v30 }
 0x179   : > { %6337 = vmatmul.mubr.msk.f32.vlgmr.msra.gmra.mrb[0].mxu0 %vm439_vm0, %v463_v32  ;;  %6348 = vmatmul.mubr.msk.f32.vlgmr.msra.gmra.mrb[0].mxu1 %vm439_vm0, %v463_v32 }
 0x17a   : > { %6806 = vmatpush3.bf16.msra.mxu0 %v6805_v31  ;;  %6358 = vmatprep.mubr.msk.f32.mxu0 %vm7262_vm1, %v7263_v18 }
 0x17b   : > { %6807 = vmatprep.subr.bf16.mxu0 %v7261_v10  ;;  %6368 = vmatprep.mubr.msk.f32.mxu1 %vm7262_vm1, %v7263_v18 }
 0x17e   : > { %6809 = vmatpush3.bf16.msra.mxu0 %v6808_v35 }
 0x17f   : > { %6361 = vmatprep.subr.mxu0 %v7263_v18 }
 0x181   : > { %6359 = vmatmul.mubr.msk.f32.vlgmr.msra.gmra.mrb[2].mxu0 %vm439_vm0, %v463_v32 }
 0x182   : > { %6363 = vmatprep.mubr.msk.f32.mxu0 %vm7262_vm1, %v7263_v18 }
 0x24c   : > { %v542_v38 = vpop.f32.mrb[0].mxu0  ;;  %v622_v39 = vpop.f32.mrb[0].mxu1 }
 0x24d   : > { %v543_v40 = vadd.f32 %v5983_v36, %v542_v38  ;;  %v7458_v41 = vadd.f32 %v5985_v37, %v622_v39  ;;  %v6338_v42 = vpop.f32.mrb[1].mxu0  ;;  %v6349_v43 = vpop.f32.mrb[1].mxu1 }
 0x24f   : > { %v7460_v44 = vmul.f32 0.35355338, %v543_v40  ;;  %876 = vrot.lane.b32.xlu1 %v7458_v41, %s7264_s25  ;;  %6362 = vmatpush3.xpose.msk.msra.mxu0 %vm713_vm2, %v7458_v41  ;;  %v709_v40 = vld [vmem:[#allocation2 + $0x70] sm:$0xff] }
 0x250   : > { %6371 = vmatprep.subr.mxu0 %v7263_v18 }
 0x252   : > { %6364 = vmatmul.mubr.msk.f32.vlgmr.msra.gmra.mrb[4].mxu0 %vm713_vm2, %v7460_v44 }
 0x253   : > { %874 = vrot.lane.b32.xlu1 %v7460_v44, %s7264_s25  ;;  %6373 = vmatprep.mubr.msk.f32.mxu0 %vm7262_vm1, %v7263_v18 }
 0x254   : > { %v702_v46 = vpop.f32.mrb[2].mxu0 }
 0x255   : > { %v7476_v47 = vadd.f32 %v5987_v45, %v702_v46  ;;  %v6360_v48 = vpop.f32.mrb[3].mxu0 }
 0x257   : > { %6367 = vmatpush3.msra.mxu1 %v7476_v47 }
 0x258   : > { %6376 = vmatprep.subr.mxu1 %v7263_v18 }
 0x2c1   : > { %v877_v49 = vpop.permute.xlu1 %876 }
 0x2c2   : > { %6372 = vmatpush3.xpose.msk.msra.mxu0 %vm713_vm2, %v877_v49 }
 0x2c3   : > { %6381 = vmatprep.subr.mxu0 %v7263_v18 }
 0x2c5   : > { %v875_v50 = vpop.permute.xlu1 %874 }
 0x2c6   : > { %6374 = vmatmul.mubr.msk.f32.vlgmr.msra.gmra.mrb[6].mxu0 %vm713_vm2, %v875_v50 }
 0x2c7   : > { %6383 = vmatprep.mubr.msk.f32.mxu0 %vm7262_vm1, %v7263_v18  ;;  %6382 = vmatpush3.msra.mxu0 %v708_v7 }
 0x2c8   : > { %6391 = vmatprep.subr.mxu0 %v7263_v18 }
 0x325   : > { %v786_v51 = vpop.f32.mrb[4].mxu0 }
 0x326   : > { %v6365_v52 = vpop.f32.mrb[5].mxu0  ;;  %v790_v53 = vsel %vm713_vm2, %v786_v51, -inf }
 0x327   : > { %791 = vmax.xlane.f32.xlu0 %v790_v53  ;;  %v710_v53 = vld [vmem:[#allocation2 + $0x78] sm:$0xff] }
 0x399   : > { %v948_v54 = vpop.f32.mrb[6].mxu0 }
 0x39a   : > { %v6375_v55 = vpop.f32.mrb[7].mxu0  ;;  %v952_v56 = vsel %vm713_vm2, %v948_v54, -inf }
 0x39b   : > { %953 = vmax.xlane.f32.xlu1 %v952_v56 }
 0x3ac   : > { %1186 = vrot.lane.b32.xlu1 %v7460_v44, %s8151_s30 }
 0x3b4   : > { %v792_v57 = vpop.xlane.xlu0 %791 }
 0x3b5   : > { %v793_v58 = vsub.f32 %v786_v51, %v792_v57 }
 0x3b7   : > { %v794_v59 = vmul.f32 1.442695, %v793_v58 }
 0x3b9   : > { %7084 = vpow2.f32 %v794_v59 }
 0x3c3   : > { %v7085_v60 = vpop.eup %7084 }
 0x3c4   : > { %v796_v61 = vsel %vm713_vm2, %v7085_v60, 0.0 }
 0x3c5   : > { %797 = vadd.xlane.f32.xlu0 %v796_v61  ;;  %v6005_v61 = vld [vmem:[%s8140_s6 + $0x3] ss:$0 sm:$0xff] }
 0x428   : > { %v954_v62 = vpop.xlane.xlu1 %953 }
 0x429   : > { %v955_v63 = vsub.f32 %v948_v54, %v954_v62 }
 0x42b   : > { %v956_v1 = vmul.f32 1.442695, %v955_v63 }
 0x42c   : > { %v1187_v20 = vpop.permute.xlu1 %1186 }
 0x42d   : > { %7086 = vpow2.f32 %v956_v1 }
 0x437   : > { %v7087_v2 = vpop.eup %7086 }
 0x438   : > { %v958_v3 = vsel %vm713_vm2, %v7087_v2, 0.0 }
 0x439   : > { %959 = vadd.xlane.f32.xlu0 %v958_v3 }
 0x44f   : > { %964 = vrot.lane.b32.xlu0 %v7476_v47, %s7264_s25 }
 0x452   : > { %v798_v4 = vpop.xlane.xlu0 %797 }
 0x453   : > { %7088 = vrcp.f32 %v798_v4  ;;  %1188 = vrot.lane.b32.xlu0 %v7458_v41, %s8151_s30 }
 0x45d   : > { %v7089_v5 = vpop.eup %7088 }
 0x45e   : > { %v800_v6 = vmul.f32 %v7089_v5, %v7085_v60 }
 0x460   : > { %6369 = vmatmul.mubr.msk.f32.vlgmr.msra.gmra.mrb[2].mxu1 %vm713_vm2, %v800_v6 }
 0x461   : > { %6378 = vmatprep.mubr.msk.f32.mxu1 %vm7262_vm1, %v7263_v18 }
 0x4c6   : > { %v960_v8 = vpop.xlane.xlu0 %959 }
 0x4c7   : > { %7090 = vrcp.f32 %v960_v8 }
 0x4ca   : > { %v965_v9 = vpop.permute.xlu0 %964 }
 0x4cb   : > { %6377 = vmatpush3.msra.mxu1 %v965_v9 }
 0x4cc   : > { %6386 = vmatprep.subr.mxu1 %v7263_v18 }
 0x4ce   : > { %v1189_v17 = vpop.permute.xlu0 %1188 }
 0x4d1   : > { %v7091_v11 = vpop.eup %7090 }
 0x4d2   : > { %v962_v12 = vmul.f32 %v7091_v11, %v7087_v2  ;;  %v1779_v11 = vld [vmem:[#allocation2 + $0xa0] sm:$0xff] }
 0x4d4   : > { %6379 = vmatmul.mubr.msk.f32.vlgmr.msra.gmra.mrb[4].mxu1 %vm713_vm2, %v962_v12  ;;  %v1780_v12 = vld [vmem:[#allocation2 + $0xa8] sm:$0xff] }
 0x4d5   : > { %6387 = vmatpush3.msra.mxu1 %v707_v13  ;;  %6388 = vmatprep.mubr.msk.f32.mxu1 %vm7262_vm1, %v7263_v18  ;;  %v6816_v13 = vpack.c.bf16 %v1780_v12, %v1779_v11 }
 0x4d6   : > { %6396 = vmatprep.subr.mxu1 %v7263_v18 }
 0x533   : > { %v870_v14 = vpop.f32.mrb[2].mxu1 }
 0x534   : > { %v6370_v15 = vpop.f32.mrb[3].mxu1  ;;  %6389 = vmatmul.mubr.msk.f32.vlgmr.msra.gmra.mrb[6].mxu1 %vm713_vm2, %v870_v14  ;;  %v1782_v14 = vld [vmem:[#allocation2 + $0xb8] sm:$0xff] }
 0x535   : > { %6398 = vmatprep.mubr.msk.f32.mxu1 %vm7262_vm1, %v7263_v18 }
 0x5a7   : > { %v1036_v16 = vpop.f32.mrb[4].mxu1 }
 0x5a8   : > { %v6380_v19 = vpop.f32.mrb[5].mxu1  ;;  %6384 = vmatmul.mubr.msk.f32.vlgmr.msra.gmra.mrb[8].mxu0 %vm713_vm2, %v1036_v16  ;;  %v432_v16 = vld [vmem:[%s7559_s12] sm:$0xff] }
 0x5a9   : > { %6392 = vmatpush3.xpose.msk.msra.mxu0 %vm713_vm2, %v1189_v17  ;;  %6393 = vmatprep.mubr.msk.f32.mxu0 %vm7262_vm1, %v7263_v18  ;;  %v433_v17 = vld [vmem:[%s7559_s12 + $0x8] sm:$0xff]  ;;  %v1696_v19 = vld [vmem:[#allocation2 + $0x80] sm:$0xff] }
 0x5aa   : > { %6401 = vmatprep.subr.mxu0 %v7263_v18 }
 0x5ac   : > { %6394 = vmatmul.mubr.msk.f32.vlgmr.msra.gmra.mrb[10].mxu0 %vm713_vm2, %v1187_v20  ;;  %v1697_v20 = vld [vmem:[#allocation2 + $0x88] sm:$0xff] }
 0x5ad   : > { %6403 = vmatprep.mubr.msk.f32.mxu0 %vm7262_vm1, %v7263_v18  ;;  %6402 = vmatpush3.msra.mxu0 %v709_v40 }
 0x5ae   : > { %6411 = vmatprep.subr.mxu0 %v7263_v18 }
 0x607   : > { %v1182_v21 = vpop.f32.mrb[6].mxu1 }
 0x608   : > { %v6390_v22 = vpop.f32.mrb[7].mxu1 }
 0x609   : > { %v1698_v22 = vld [vmem:[#allocation2 + $0x90] sm:$0xff] }
 0x67b   : > { %v1109_v23 = vpop.f32.mrb[8].mxu0 }
 0x67c   : > { %v1183_v24 = vadd.f32 %v1182_v21, %v1109_v23  ;;  %v6385_v25 = vpop.f32.mrb[9].mxu0  ;;  %v6811_v21 = vpack.c.bf16 %v1697_v20, %v1696_v19  ;;  %v1699_v23 = vld [vmem:[#allocation2 + $0x98] sm:$0xff] }
 0x67f   : > { %v1260_v26 = vpop.f32.mrb[10].mxu0 }
 0x680   : > { %v6395_v27 = vpop.f32.mrb[11].mxu0  ;;  %v1264_v28 = vsel %vm713_vm2, %v1260_v26, -inf }
 0x681   : > { %1265 = vmax.xlane.f32.xlu0 %v1264_v28 }
 0x697   : > { %1275 = vrot.lane.b32.xlu0 %v7476_v47, %s8151_s30 }
 0x69b   : > { %1425 = vrot.lane.b32.xlu0 %v7460_v44, %s8149_s14 }
 0x70e   : > { %v1266_v29 = vpop.xlane.xlu0 %1265 }
 0x70f   : > { %v1267_v30 = vsub.f32 %v1260_v26, %v1266_v29  ;;  %v6006_v29 = vld [vmem:[%s8137_s3 + $0x1] ss:$0 sm:$0xff] }
 0x711   : > { %v1268_v31 = vmul.f32 1.442695, %v1267_v30 }
 0x712   : > { %v1276_v32 = vpop.permute.xlu0 %1275 }
 0x713   : > { %7092 = vpow2.f32 %v1268_v31  ;;  %6397 = vmatpush3.msra.mxu1 %v1276_v32  ;;  %v6007_v31 = vld [vmem:[%s8138_s4 + $0x1] ss:$0 sm:$0xff] }
 0x714   : > { %6406 = vmatprep.subr.mxu1 %v7263_v18 }
 0x716   : > { %v1426_v39 = vpop.permute.xlu0 %1425 }
 0x71d   : > { %v7093_v33 = vpop.eup %7092 }
 0x71e   : > { %v1270_v34 = vsel %vm713_vm2, %v7093_v33, 0.0 }
 0x71f   : > { %1271 = vadd.xlane.f32.xlu1 %v1270_v34  ;;  %v6010_v34 = vld [vmem:[%s8140_s6 + $0x5] ss:$0 sm:$0xff] }
 0x730   : > { %1427 = vrot.lane.b32.xlu1 %v7458_v41, %s8149_s14 }
 0x7ac   : > { %v1272_v35 = vpop.xlane.xlu1 %1271 }
 0x7ad   : > { %7094 = vrcp.f32 %v1272_v35 }
 0x7b0   : > { %v1428_v38 = vpop.permute.xlu1 %1427 }
 0x7b7   : > { %v7095_v36 = vpop.eup %7094 }
 0x7b8   : > { %v1274_v37 = vmul.f32 %v7095_v36, %v7093_v33 }
 0x7ba   : > { %6399 = vmatmul.mubr.msk.f32.vlgmr.msra.gmra.mrb[8].mxu1 %vm713_vm2, %v1274_v37 }
 0x7bb   : > { %6407 = vmatpush3.xpose.msk.msra.mxu1 %vm713_vm2, %v1428_v38  ;;  %6408 = vmatprep.mubr.msk.f32.mxu1 %vm7262_vm1, %v7263_v18 }
 0x7bc   : > { %6416 = vmatprep.subr.mxu1 %v7263_v18 }
 0x7be   : > { %6409 = vmatmul.mubr.msk.f32.vlgmr.msra.gmra.mrb[10].mxu1 %vm713_vm2, %v1426_v39 }
 0x7bf   : > { %6418 = vmatprep.mubr.msk.f32.mxu1 %vm7262_vm1, %v7263_v18  ;;  %6417 = vmatpush3.msra.mxu1 %v710_v53  ;;  %v1871_v53 = vld [vmem:[#allocation2 + $0xc8] sm:$0xff] }
 0x7c0   : > { %6817 = vmatprep.subr.bf16.mxu1 %v6816_v13 }
 0x88d   : > { %v1347_v41 = vpop.f32.mrb[8].mxu1 }
 0x88e   : > { %v6400_v42 = vpop.f32.mrb[9].mxu1  ;;  %6404 = vmatmul.mubr.msk.f32.vlgmr.msra.gmra.mrb[12].mxu0 %vm713_vm2, %v1347_v41 }
 0x88f   : > { %6413 = vmatprep.mubr.msk.f32.mxu0 %vm7262_vm1, %v7263_v18 }
 0x891   : > { %v1499_v43 = vpop.f32.mrb[10].mxu1 }
 0x892   : > { %v6410_v44 = vpop.f32.mrb[11].mxu1  ;;  %v1503_v45 = vsel %vm713_vm2, %v1499_v43, -inf }
 0x893   : > { %1504 = vmax.xlane.f32.xlu0 %v1503_v45 }
 0x8a9   : > { %1514 = vrot.lane.b32.xlu0 %v7476_v47, %s8149_s14 }
 0x920   : > { %v1505_v46 = vpop.xlane.xlu0 %1504 }
 0x921   : > { %v1506_v48 = vsub.f32 %v1499_v43, %v1505_v46  ;;  %v6008_v43 = vld [vmem:[%s8140_s6 + $0x4] ss:$0 sm:$0xff] }
 0x923   : > { %v1507_v49 = vmul.f32 1.442695, %v1506_v48 }
 0x924   : > { %v1515_v50 = vpop.permute.xlu0 %1514 }
 0x925   : > { %7096 = vpow2.f32 %v1507_v49  ;;  %6412 = vmatpush3.msra.mxu0 %v1515_v50 }
 0x926   : > { %6810 = vmatprep.subr.bf16.mxu0 %v7261_v10 }
 0x92f   : > { %v7097_v51 = vpop.eup %7096 }
 0x930   : > { %v1509_v52 = vsel %vm713_vm2, %v7097_v51, 0.0 }
 0x931   : > { %1510 = vadd.xlane.f32.xlu1 %v1509_v52  ;;  %v1870_v52 = vld [vmem:[#allocation2 + $0xc0] sm:$0xff] }
 0x961   : > { %v1420_v54 = vpop.f32.mrb[12].mxu0 }
 0x962   : > { %v1424_v55 = vadd.f32 %v1420_v54, %v1183_v24  ;;  %v6405_v56 = vpop.f32.mrb[13].mxu0  ;;  %v6814_v24 = vpack.c.bf16 %v1699_v23, %v1698_v22  ;;  %v1872_v54 = vld [vmem:[#allocation2 + $0xd0] sm:$0xff] }
 0x963   : > { %v1873_v56 = vld [vmem:[#allocation2 + $0xd8] sm:$0xff] }
 0x9be   : > { %v1511_v57 = vpop.xlane.xlu1 %1510 }
 0x9bf   : > { %7098 = vrcp.f32 %v1511_v57  ;;  %v6828_v57 = vpack.c.bf16 %v1873_v56, %v1872_v54 }
 0x9c9   : > { %v7099_v47 = vpop.eup %7098 }
 0x9ca   : > { %v1513_v58 = vmul.f32 %v7099_v47, %v7097_v51 }
 0x9cc   : > { %6414 = vmatmul.mubr.msk.f32.vlgmr.msra.gmra.mrb[14].mxu0 %vm713_vm2, %v1513_v58  ;;  %v1962_v58 = vlaneseq }
 0x9cd   : > { %6429 = vmatprep.mubr.msk.f32.mxu0 %vm7262_vm1, %v7263_v18  ;;  %6812 = vmatpush3.bf16.msra.mxu0 %v6811_v21 }
 0x9ce   : > { %6813 = vmatprep.subr.bf16.mxu0 %v7261_v10 }
 0x9d1   : > { %6815 = vmatpush3.bf16.msra.mxu0 %v6814_v24 }
 0xa9f   : > { %v1586_v59 = vpop.f32.mrb[14].mxu0 }
 0xaa0   : > { %v6415_v60 = vpop.f32.mrb[15].mxu0  ;;  %6419 = vmatmul.mubr.msk.f32.vlgmr.msra.gmra.mrb[12].mxu1 %vm713_vm2, %v1586_v59  ;;  %v434_v59 = vld [vmem:[%s430_s13] sm:$0x1] }
 0xaa1   : > { %6819 = vmatpush3.bf16.msra.mxu1 %v6816_v13  ;;  %6440 = vmatprep.mubr.msk.f32.mxu1 %vm439_vm0, %v432_v16  ;;  %v435_v60 = vsub.f32 1.0, %v434_v59 }
 0xb73   : > { %v1659_v62 = vpop.f32.mrb[12].mxu1 }
 0xb74   : > { %v1663_v63 = vadd.f32 %v1659_v62, %v1424_v55  ;;  %v6420_v1 = vpop.f32.mrb[13].mxu1  ;;  %v6824_v55 = vpack.c.bf16 %v1871_v53, %v1870_v52  ;;  %v436_v62 = vmul.f32 -1e+09, %v435_v60 }
 0xb76   : > { %v1668_v2 = vadd.f32 %v6005_v61, %v1663_v63  ;;  %6825 = vmatprep.subr.bf16.mxu0 %v6824_v55  ;;  %v1963_v61 = vshrl.u32 %v1962_v58, 7 }
 0xb78   : > { %v7549_v3 = vadd.f32 %v1668_v2, %v7419_v0  ;;  %v1781_v0 = vld [vmem:[#allocation2 + $0xb0] sm:$0xff]  ;;  %v1964_v63 = vsub.s32 0, %v1963_v61 }
 0xb79   : > { %v6820_v15 = vpack.c.bf16 %v1782_v14, %v1781_v0 }
 0xb7a   : > { %v1672_v4 = vsel %vm439_vm0, %v7549_v3, 0.0  ;;  %v7618_v1 = vrot.slane %v436_v62, %v1964_v63 }
 0xb7b   : > { %1673 = vadd.xlane.f32.xlu1 %v1672_v4  ;;  %6821 = vmatprep.subr.bf16.mxu1 %v6820_v15 }
 0xb7c   : > { %6823 = vmatpush3.bf16.msra.mxu1 %v6820_v15  ;;  %v6013_v15 = vld [vmem:[%s8140_s6 + $0x6] ss:$0 sm:$0xff] }
 0xb7d   : > { %6832 = vmatprep.subr.bf16.mxu1 %v7261_v10 }
 0xb7f   : > { %6441 = vmatmul.mubr.msk.f32.vlgmr.msra.gmra.mrb[14].mxu1 %vm439_vm0, %v433_v17 }
 0xb80   : > { %6458 = vmatprep.mubr.msk.f32.mxu1 %vm7262_vm1, %v7263_v18 }
 0xc08   : > { %v1674_v5 = vpop.xlane.xlu1 %1673 }
 0xc09   : > { %v1675_v6 = vmul.f32 0.03125, %v1674_v5 }
 0xc0b   : > { %v1676_v7 = vsub.f32 %v7549_v3, %v1675_v6 }
 0xc0d   : > { %v1677_v8 = vmul.f32 %v1676_v7, %v1676_v7 }
 0xc0f   : > { %v1678_v9 = vsel %vm439_vm0, %v1677_v8, 0.0 }
 0xc10   : > { %1679 = vadd.xlane.f32.xlu1 %v1678_v9 }
 0xc52   : > { %v6442_v35 = vpop.f32.mrb[14].mxu1 }
 0xc53   : > { %v1866_v36 = vadd.f32 %v6442_v35, %v6010_v34  ;;  %v1860_v37 = vpop.f32.mrb[15].mxu1 }
 0xc54   : > { %v1861_v38 = vadd.f32 %v6010_v34, %v1860_v37 }
 0xc56   : > { %v6833_v40 = vpack.c.bf16 %v1866_v36, %v1861_v38  ;;  %v7586_v41 = vpack.i.bf16 %v1866_v36, %v1861_v38 }
 0xc58   : > { %7023 = vrot.lane.b32.xlu0 %v7586_v41, %s7264_s25  ;;  %6835 = vmatpush3.bf16.xpose.msk.msra.mxu1 %vm7582_vm3, %v6833_v40 }
 0xc59   : > { %6839 = vmatprep.subr.bf16.mxu1 %v7261_v10 }
 0xc9d   : > { %v1680_v25 = vpop.xlane.xlu1 %1679 }
 0xc9e   : > { %v1681_v26 = vmul.f32 0.03125, %v1680_v25 }
 0xca0   : > { %v1682_v27 = vadd.f32 1e-06, %v1681_v26 }
 0xca2   : > { %7100 = vrsqrt.f32 %v1682_v27 }
 0xcac   : > { %v7101_v28 = vpop.eup %7100 }
 0xcad   : > { %v1684_v30 = vmul.f32 %v7101_v28, %v1676_v7 }
 0xcaf   : > { %v1689_v32 = vmul.f32 %v6006_v29, %v1684_v30 }
 0xcb1   : > { %v1694_v33 = vadd.f32 %v6007_v31, %v1689_v32  ;;  %v1955_v32 = vld [vmem:[#allocation2 + $0xe0] sm:$0xff] }
 0xcb3   : > { %6430 = vmatmul.mubr.msk.f32.vlgmr.msra.gmra.mrb[16].mxu0 %vm439_vm0, %v1694_v33 }
 0xcb4   : > { %6451 = vmatprep.mubr.msk.f32.mxu0 %vm439_vm0, %v432_v16  ;;  %6827 = vmatpush3.bf16.msra.mxu0 %v6824_v55 }
 0xcb5   : > { %6829 = vmatprep.subr.bf16.mxu0 %v6828_v57 }
 0xcb8   : > { %6831 = vmatpush3.bf16.msra.mxu0 %v6828_v57 }
 0xcb9   : > { %6836 = vmatprep.subr.bf16.mxu0 %v7261_v10 }
 0xcbb   : > { %6452 = vmatmul.mubr.msk.f32.vlgmr.msra.gmra.mrb[18].mxu0 %vm439_vm0, %v433_v17 }
 0xcbc   : > { %6465 = vmatprep.mubr.msk.f32.mxu0 %vm7262_vm1, %v7263_v18 }
 0xcca   : > { %v7024_v42 = vpop.permute.xlu0 %7023 }
 0xccb   : > { %v7026_v44 = vunpack.i.h.bf16 %v7024_v42  ;;  %v7025_v45 = vunpack.i.l.bf16 %v7024_v42 }
 0xccd   : > { %v6840_v50 = vpack.c.bf16 %v7026_v44, %v7025_v45 }
 0xd86   : > { %v1774_v46 = vpop.f32.mrb[16].mxu0 }
 0xd87   : > { %v1775_v48 = vadd.f32 %v6008_v43, %v1774_v46  ;;  %v6431_v49 = vpop.f32.mrb[17].mxu0 }
 0xd89   : > { %v7596_v51 = vmul.f32 0.35355338, %v1775_v48 }
 0xd8b   : > { %2131 = vrot.lane.b32.xlu1 %v7596_v51, %s7264_s25  ;;  %6459 = vmatmul.mubr.msk.f32.vlgmr.msra.gmra.mrb[16].mxu1 %vm713_vm2, %v7596_v51 }
 0xd8c   : > { %6842 = vmatpush3.bf16.xpose.msk.msra.mxu1 %vm7582_vm3, %v6840_v50  ;;  %6472 = vmatprep.mubr.msk.f32.mxu1 %vm7262_vm1, %v7263_v18 }
 0xd8d   : > { %6487 = vmatprep.subr.mxu1 %v7263_v18 }
 0xd8e   : > { %v6453_v14 = vpop.f32.mrb[18].mxu0 }
 0xd8f   : > { %v1951_v16 = vadd.f32 %v6453_v14, %v6013_v15  ;;  %v1945_v17 = vpop.f32.mrb[19].mxu0 }
 0xd90   : > { %v1946_v19 = vadd.f32 %v6013_v15, %v1945_v17 }
 0xd92   : > { %v7631_v20 = vpack.i.bf16 %v1951_v16, %v1946_v19  ;;  %v6837_v23 = vpack.c.bf16 %v1951_v16, %v1946_v19 }
 0xd94   : > { %6838 = vmatpush3.bf16.msra.mxu0 %v6837_v23 }
 0xd95   : > { %6843 = vmatprep.subr.bf16.mxu0 %v7261_v10 }
 0xdfd   : > { %v2132_v47 = vpop.permute.xlu1 %2131 }
 0xdfe   : > { %6473 = vmatmul.mubr.msk.f32.vlgmr.msra.gmra.mrb[18].mxu1 %vm713_vm2, %v2132_v47 }
 0xdff   : > { %6489 = vmatprep.mubr.msk.f32.mxu1 %vm7262_vm1, %v7263_v18  ;;  %6488 = vmatpush3.msra.mxu1 %v1955_v32 }
 0xe00   : > { %6850 = vmatprep.subr.bf16.mxu1 %v7261_v10 }
 0xe5e   : > { %v2042_v2 = vpop.f32.mrb[16].mxu1 }
 0xe5f   : > { %v2043_v4 = vadd.f32 %v2042_v2, %v7618_v1  ;;  %v6460_v5 = vpop.f32.mrb[17].mxu1 }
 0xe61   : > { %v2047_v6 = vsel %vm2046_vm4, %v2043_v4, -inf }
 0xe62   : > { %2048 = vmax.xlane.f32.xlu0 %v2047_v6 }
 0xed1   : > { %v2209_v7 = vpop.f32.mrb[18].mxu1 }
 0xed2   : > { %v2210_v8 = vadd.f32 %v2209_v7, %v7618_v1  ;;  %v6474_v9 = vpop.f32.mrb[19].mxu1 }
 0xed4   : > { %v2213_v11 = vsel %vm2046_vm4, %v2210_v8, -inf }
 0xed5   : > { %2214 = vmax.xlane.f32.xlu1 %v2213_v11 }
 0xee6   : > { %7033 = vrot.lane.b32.xlu1 %v7586_v41, %s8151_s30 }
 0xeea   : > { %2697 = vrot.lane.b32.xlu1 %v7596_v51, %s8149_s14 }
 0xeef   : > { %v2049_v12 = vpop.xlane.xlu0 %2048 }
 0xef0   : > { %v2050_v13 = vsub.f32 %v2043_v4, %v2049_v12 }
 0xef2   : > { %v2051_v0 = vmul.f32 1.442695, %v2050_v13 }
 0xef4   : > { %7102 = vpow2.f32 %v2051_v0 }
 0xefe   : > { %v7103_v21 = vpop.eup %7102 }
 0xeff   : > { %v2053_v22 = vsel %vm2046_vm4, %v7103_v21, 0.0 }
 0xf00   : > { %2054 = vadd.xlane.f32.xlu0 %v2053_v22 }
 0xf62   : > { %v2215_v24 = vpop.xlane.xlu1 %2214 }
 0xf63   : > { %v2216_v25 = vsub.f32 %v2210_v8, %v2215_v24 }
 0xf65   : > { %v2217_v26 = vmul.f32 1.442695, %v2216_v25 }
 0xf66   : > { %v7034_v44 = vpop.permute.xlu1 %7033 }
 0xf67   : > { %7104 = vpow2.f32 %v2217_v26  ;;  %v7036_v46 = vunpack.i.h.bf16 %v7034_v44  ;;  %v7035_v48 = vunpack.i.l.bf16 %v7034_v44 }
 0xf69   : > { %v6847_v49 = vpack.c.bf16 %v7036_v46, %v7035_v48 }
 0xf6a   : > { %v2698_v56 = vpop.permute.xlu1 %2697 }
 0xf71   : > { %v7105_v27 = vpop.eup %7104 }
 0xf72   : > { %v2219_v28 = vsel %vm2046_vm4, %v7105_v27, 0.0 }
 0xf73   : > { %2220 = vadd.xlane.f32.xlu0 %v2219_v28 }
 0xf89   : > { %7028 = vrot.lane.b32.xlu0 %v7631_v20, %s7264_s25 }
 0xf8d   : > { %v2055_v29 = vpop.xlane.xlu0 %2054  ;;  %2451 = vrot.lane.b32.xlu0 %v7596_v51, %s8151_s30 }
 0xf8e   : > { %7106 = vrcp.f32 %v2055_v29 }
 0xf91   : > { %7038 = vrot.lane.b32.xlu0 %v7586_v41, %s8149_s14  ;;  %v1956_v41 = vld [vmem:[#allocation2 + $0xe8] sm:$0xff] }
 0xf98   : > { %v7107_v30 = vpop.eup %7106 }
 0xf99   : > { %v2057_v31 = vmul.f32 %v7107_v30, %v7103_v21 }
 0xf9b   : > { %6466 = vmatmul.mubr.msk.f32.vlgmr.msra.gmra.mrb[20].mxu0 %vm2046_vm4, %v2057_v31 }
 0xf9c   : > { %6479 = vmatprep.mubr.msk.f32.mxu0 %vm7262_vm1, %v7263_v18 }
0x1000   : > { %v2221_v33 = vpop.xlane.xlu0 %2220 }
0x1001   : > { %7108 = vrcp.f32 %v2221_v33 }
0x1004   : > { %v7029_v34 = vpop.permute.xlu0 %7028 }
0x1005   : > { %v7031_v35 = vunpack.i.h.bf16 %v7029_v34  ;;  %v7030_v36 = vunpack.i.l.bf16 %v7029_v34 }
0x1007   : > { %v6844_v37 = vpack.c.bf16 %v7031_v35, %v7030_v36  ;;  %v1958_v36 = vld [vmem:[#allocation2 + $0xf8] sm:$0xff] }
0x1008   : > { %v2452_v45 = vpop.permute.xlu0 %2451 }
0x1009   : > { %6845 = vmatpush3.bf16.msra.mxu0 %v6844_v37 }
0x100a   : > { %6482 = vmatprep.subr.mxu0 %v7263_v18 }
0x100b   : > { %v7109_v38 = vpop.eup %7108 }
0x100c   : > { %v2223_v40 = vmul.f32 %v7109_v38, %v7105_v27  ;;  %v7039_v51 = vpop.permute.xlu0 %7038  ;;  %v1957_v27 = vld [vmem:[#allocation2 + $0xf0] sm:$0xff] }
0x100d   : > { %v7041_v53 = vunpack.i.h.bf16 %v7039_v51  ;;  %v7040_v54 = vunpack.i.l.bf16 %v7039_v51 }
0x100e   : > { %6480 = vmatmul.mubr.msk.f32.vlgmr.msra.gmra.mrb[22].mxu0 %vm2046_vm4, %v2223_v40 }
0x100f   : > { %6483 = vmatpush3.msra.mxu0 %v1956_v41  ;;  %6484 = vmatprep.mubr.msk.f32.mxu0 %vm7262_vm1, %v7263_v18  ;;  %v6854_v55 = vpack.c.bf16 %v7041_v53, %v7040_v54 }
0x1010   : > { %6846 = vmatprep.subr.bf16.mxu0 %v7261_v10 }
0x106e   : > { %v2127_v42 = vpop.f32.mrb[20].mxu0 }
0x106f   : > { %v6467_v43 = vpop.f32.mrb[21].mxu0  ;;  %6490 = vmatmul.mubr.msk.f32.vlgmr.msra.gmra.mrb[20].mxu1 %vm713_vm2, %v2127_v42 }
0x1070   : > { %6503 = vmatprep.mubr.msk.f32.mxu1 %vm7262_vm1, %v7263_v18  ;;  %v6036_v43 = vld [vmem:[%s8140_s6 + $0x7] ss:$0 sm:$0xff] }
0x10e1   : > { %v2301_v50 = vpop.f32.mrb[22].mxu0 }
0x10e2   : > { %v6481_v52 = vpop.f32.mrb[23].mxu0  ;;  %6485 = vmatmul.mubr.msk.f32.vlgmr.msra.gmra.mrb[24].mxu0 %vm713_vm2, %v2301_v50 }
0x10e3   : > { %6849 = vmatpush3.bf16.xpose.msk.msra.mxu0 %vm7582_vm3, %v6847_v49  ;;  %6496 = vmatprep.mubr.msk.f32.mxu0 %vm7262_vm1, %v7263_v18 }
0x10e4   : > { %6853 = vmatprep.subr.bf16.mxu0 %v7261_v10 }
0x10ea   : > { %6497 = vmatmul.mubr.msk.f32.vlgmr.msra.gmra.mrb[26].mxu0 %vm713_vm2, %v2452_v45 }
0x10eb   : > { %6856 = vmatpush3.bf16.xpose.msk.msra.mxu0 %vm7582_vm3, %v6854_v55  ;;  %6515 = vmatprep.mubr.msk.f32.mxu0 %vm7262_vm1, %v7263_v18 }
0x10ec   : > { %6860 = vmatprep.subr.bf16.mxu0 %v7261_v10 }
0x10f2   : > { %6516 = vmatmul.mubr.msk.f32.vlgmr.msra.gmra.mrb[28].mxu0 %vm713_vm2, %v2698_v56  ;;  %v2974_v56 = vld [vmem:[%s8141_s7] sm:$0xff] }
0x10f3   : > { %6538 = vmatprep.mubr.msk.f32.mxu0 %vm7262_vm1, %v7263_v18 }
0x1142   : > { %v2447_v57 = vpop.f32.mrb[20].mxu1 }
0x1143   : > { %v6491_v47 = vpop.f32.mrb[21].mxu1 }
0x1144   : > { %v2976_v47 = vld [vmem:[%s8141_s7 + $0x10] sm:$0xff] }
0x11b5   : > { %v2374_v58 = vpop.f32.mrb[24].mxu0 }
0x11b6   : > { %v7669_v59 = vadd.f32 %v2447_v57, %v2374_v58  ;;  %v6486_v60 = vpop.f32.mrb[25].mxu0  ;;  %v2977_v58 = vld [vmem:[%s8141_s7 + $0x18] sm:$0xff] }
0x11b7   : > { %v3057_v60 = vld [vmem:[%s8143_s9] sm:$0xff] }
0x11bd   : > { %v2529_v61 = vpop.f32.mrb[26].mxu0 }
0x11be   : > { %v2530_v62 = vadd.f32 %v2529_v61, %v7618_v1  ;;  %v6498_v63 = vpop.f32.mrb[27].mxu0  ;;  %v3058_v61 = vld [vmem:[%s8143_s9 + $0x8] sm:$0xff] }
0x11bf   : > { %v6867_v63 = vpack.c.bf16 %v3058_v61, %v3057_v60  ;;  %v3256_v61 = vld [vmem:[#allocation2 + $0x130] sm:$0xff] }
0x11c0   : > { %v2533_v2 = vsel %vm2046_vm4, %v2530_v62, -inf }
0x11c1   : > { %2534 = vmax.xlane.f32.xlu0 %v2533_v2  ;;  %v3060_v2 = vld [vmem:[%s8143_s9 + $0x18] sm:$0xff] }
0x11c5   : > { %v2775_v4 = vpop.f32.mrb[28].mxu0 }
0x11c6   : > { %v6517_v5 = vpop.f32.mrb[29].mxu0  ;;  %v2776_v14 = vadd.f32 %v2775_v4, %v7618_v1 }
0x11c7   : > { %v3061_v5 = vld [vmem:[%s8143_s9 + $0x20] sm:$0xff] }
0x11c8   : > { %v2779_v16 = vsel %vm2046_vm4, %v2776_v14, -inf }
0x11d7   : > { %7043 = vrot.lane.b32.xlu0 %v7631_v20, %s8151_s30 }
0x124e   : > { %v2535_v6 = vpop.xlane.xlu0 %2534 }
0x124f   : > { %v2536_v7 = vsub.f32 %v2530_v62, %v2535_v6  ;;  %v3059_v62 = vld [vmem:[%s8143_s9 + $0x10] sm:$0xff]  ;;  %v3062_v6 = vld [vmem:[%s8143_s9 + $0x28] sm:$0xff] }
0x1250   : > { %v6870_v4 = vpack.c.bf16 %v3060_v2, %v3059_v62  ;;  %v3257_v62 = vld [vmem:[#allocation2 + $0x138] sm:$0xff]  ;;  %v6045_v2 = vld [vmem:[%s8140_s6 + $0x8] ss:$0 sm:$0xff] }
0x1251   : > { %v2537_v8 = vmul.f32 1.442695, %v2536_v7  ;;  %v6873_v7 = vpack.c.bf16 %v3062_v6, %v3061_v5 }
0x1252   : > { %v7044_v9 = vpop.permute.xlu0 %7043 }
0x1253   : > { %7110 = vpow2.f32 %v2537_v8  ;;  %v7046_v11 = vunpack.i.h.bf16 %v7044_v9  ;;  %v7045_v12 = vunpack.i.l.bf16 %v7044_v9 }
0x1255   : > { %v6851_v13 = vpack.c.bf16 %v7046_v11, %v7045_v12 }
0x1257   : > { %6852 = vmatpush3.bf16.msra.mxu1 %v6851_v13  ;;  %v6037_v13 = vld [vmem:[%s8137_s3 + $0x2] ss:$0 sm:$0xff] }
0x1258   : > { %6506 = vmatprep.subr.mxu1 %v7263_v18 }
0x125d   : > { %v7111_v0 = vpop.eup %7110 }
0x125e   : > { %v2539_v15 = vsel %vm2046_vm4, %v7111_v0, 0.0 }
0x125f   : > { %2540 = vadd.xlane.f32.xlu1 %v2539_v15 }
0x1263   : > { %2780 = vmax.xlane.f32.xlu1 %v2779_v16 }
0x12ec   : > { %v2541_v17 = vpop.xlane.xlu1 %2540 }
0x12ed   : > { %7112 = vrcp.f32 %v2541_v17  ;;  %v3063_v17 = vld [vmem:[%s8143_s9 + $0x30] sm:$0xff] }
0x12f0   : > { %v2781_v19 = vpop.xlane.xlu1 %2780 }
0x12f1   : > { %v2782_v21 = vsub.f32 %v2776_v14, %v2781_v19  ;;  %v6038_v14 = vld [vmem:[%s8138_s4 + $0x2] ss:$0 sm:$0xff]  ;;  %v3064_v19 = vld [vmem:[%s8143_s9 + $0x38] sm:$0xff] }
0x12f3   : > { %v2783_v22 = vmul.f32 1.442695, %v2782_v21  ;;  %v6876_v21 = vpack.c.bf16 %v3064_v19, %v3063_v17 }
0x12f5   : > { %7114 = vpow2.f32 %v2783_v22  ;;  %v6039_v22 = vld [vmem:[%s8142_s8] ss:$0 sm:$0xff] }
0x12f7   : > { %v7113_v23 = vpop.eup %7112 }
0x12f8   : > { %v2543_v24 = vmul.f32 %v7113_v23, %v7111_v0 }
0x12fa   : > { %6504 = vmatmul.mubr.msk.f32.vlgmr.msra.gmra.mrb[22].mxu1 %vm2046_vm4, %v2543_v24 }
0x12fb   : > { %6508 = vmatprep.mubr.msk.f32.mxu1 %vm7262_vm1, %v7263_v18  ;;  %6507 = vmatpush3.msra.mxu1 %v1957_v27  ;;  %v6041_v27 = vld [vmem:[%s8144_s10] ss:$0 sm:$0xff] }
0x12fc   : > { %6857 = vmatprep.subr.bf16.mxu1 %v7261_v10 }
0x12ff   : > { %v7115_v25 = vpop.eup %7114 }
0x1300   : > { %v2785_v26 = vsel %vm2046_vm4, %v7115_v25, 0.0 }
0x1301   : > { %2786 = vadd.xlane.f32.xlu1 %v2785_v26 }
0x1312   : > { %7048 = vrot.lane.b32.xlu1 %v7631_v20, %s8149_s14  ;;  %s8165_s14 = smov 112  }
0x138e   : > { %v2787_v28 = vpop.xlane.xlu1 %2786 }
0x138f   : > { %7116 = vrcp.f32 %v2787_v28 }
0x1392   : > { %v7049_v29 = vpop.permute.xlu1 %7048 }
0x1393   : > { %v7051_v30 = vunpack.i.h.bf16 %v7049_v29  ;;  %v7050_v31 = vunpack.i.l.bf16 %v7049_v29 }
0x1395   : > { %v6858_v33 = vpack.c.bf16 %v7051_v30, %v7050_v31 }
0x1399   : > { %v7117_v32 = vpop.eup %7116 }
0x139a   : > { %v2789_v20 = vmul.f32 %v7117_v32, %v7115_v25 }
0x13cd   : > { %v2619_v34 = vpop.f32.mrb[22].mxu1 }
0x13ce   : > { %v6505_v35 = vpop.f32.mrb[23].mxu1  ;;  %6509 = vmatmul.mubr.msk.f32.vlgmr.msra.gmra.mrb[24].mxu1 %vm713_vm2, %v2619_v34 }
0x13cf   : > { %6859 = vmatpush3.bf16.msra.mxu1 %v6858_v33  ;;  %6522 = vmatprep.mubr.msk.f32.mxu1 %vm7262_vm1, %v7263_v18 }
0x13d0   : > { %6525 = vmatprep.subr.mxu1 %v7263_v18 }
0x13d2   : > { %6523 = vmatmul.mubr.msk.f32.vlgmr.msra.gmra.mrb[26].mxu1 %vm2046_vm4, %v2789_v20 }
0x13d3   : > { %6527 = vmatprep.mubr.msk.f32.mxu1 %vm7262_vm1, %v7263_v18  ;;  %6526 = vmatpush3.msra.mxu1 %v1958_v36 }
0x13d4   : > { %6866 = vmatprep.subr.bf16.mxu1 %v7261_v10 }
0x14a1   : > { %v2692_v37 = vpop.f32.mrb[24].mxu1 }
0x14a2   : > { %v2696_v38 = vadd.f32 %v2692_v37, %v7669_v59  ;;  %v6510_v40 = vpop.f32.mrb[25].mxu1  ;;  %v6864_v59 = vpack.c.bf16 %v2977_v58, %v2976_v47  ;;  %v3171_v37 = vld [vmem:[#allocation2 + $0x100] sm:$0xff] }
0x14a3   : > { %v6044_v47 = vld [vmem:[%s8138_s4 + $0x3] ss:$0 sm:$0xff] }
0x14a5   : > { %v2865_v41 = vpop.f32.mrb[26].mxu1 }
0x14a6   : > { %v6524_v42 = vpop.f32.mrb[27].mxu1  ;;  %6528 = vmatmul.mubr.msk.f32.vlgmr.msra.gmra.mrb[28].mxu1 %vm713_vm2, %v2865_v41  ;;  %v3334_v41 = vld [vmem:[#allocation2 + $0x140] sm:$0xff] }
0x14a7   : > { %6557 = vmatprep.mubr.msk.f32.mxu1 %vm7262_vm1, %v7263_v18  ;;  %6868 = vmatpush3.bf16.msra.mxu1 %v6867_v63  ;;  %v3335_v42 = vld [vmem:[#allocation2 + $0x148] sm:$0xff]  ;;  %v6888_v63 = vpack.c.bf16 %v3257_v62, %v3256_v61 }
0x14a8   : > { %6869 = vmatprep.subr.bf16.mxu1 %v7261_v10 }
0x14ab   : > { %6871 = vmatpush3.bf16.msra.mxu1 %v6870_v4  ;;  %v6049_v4 = vld [vmem:[%s8140_s6 + $0xa] ss:$0 sm:$0xff] }
0x14ac   : > { %6872 = vmatprep.subr.bf16.mxu1 %v7261_v10 }
0x14af   : > { %6874 = vmatpush3.bf16.msra.mxu1 %v6873_v7 }
0x14b0   : > { %6875 = vmatprep.subr.bf16.mxu1 %v7261_v10 }
0x14b3   : > { %6877 = vmatpush3.bf16.msra.mxu1 %v6876_v21 }
0x14b4   : > { %6890 = vmatprep.subr.bf16.mxu1 %v7261_v10 }
0x1579   : > { %v2938_v44 = vpop.f32.mrb[28].mxu1 }
0x157a   : > { %v2942_v45 = vadd.f32 %v2938_v44, %v2696_v38  ;;  %v6529_v46 = vpop.f32.mrb[29].mxu1  ;;  %v3172_v38 = vld [vmem:[#allocation2 + $0x108] sm:$0xff]  ;;  %v3173_v44 = vld [vmem:[#allocation2 + $0x110] sm:$0xff] }
0x157b   : > { %v6879_v40 = vpack.c.bf16 %v3172_v38, %v3171_v37  ;;  %v3336_v46 = vld [vmem:[#allocation2 + $0x150] sm:$0xff] }
0x157c   : > { %v2947_v48 = vadd.f32 %v6036_v43, %v2942_v45  ;;  %v6891_v43 = vpack.c.bf16 %v3335_v42, %v3334_v41  ;;  %v3174_v45 = vld [vmem:[#allocation2 + $0x118] sm:$0xff] }
0x157e   : > { %v7702_v49 = vadd.f32 %v2947_v48, %v7549_v3  ;;  %v2975_v3 = vld [vmem:[%s8141_s7 + $0x8] sm:$0xff]  ;;  %v6882_v48 = vpack.c.bf16 %v3174_v45, %v3173_v44  ;;  %v3414_v45 = vld [vmem:[#allocation2 + $0x160] sm:$0xff] }
0x157f   : > { %v6861_v57 = vpack.c.bf16 %v2975_v3, %v2974_v56  ;;  %v3254_v3 = vld [vmem:[#allocation2 + $0x120] sm:$0xff] }
0x1580   : > { %v2951_v50 = vsel %vm439_vm0, %v7702_v49, 0.0 }
0x1581   : > { %2952 = vadd.xlane.f32.xlu0 %v2951_v50  ;;  %6862 = vmatpush3.bf16.msra.mxu0 %v6861_v57  ;;  %v3255_v57 = vld [vmem:[#allocation2 + $0x128] sm:$0xff] }
0x1582   : > { %6863 = vmatprep.subr.bf16.mxu0 %v7261_v10 }
0x1585   : > { %6865 = vmatpush3.bf16.msra.mxu0 %v6864_v59  ;;  %v6885_v59 = vpack.c.bf16 %v3255_v57, %v3254_v3 }
0x1586   : > { %6878 = vmatprep.subr.bf16.mxu0 %v7261_v10 }
0x160e   : > { %v2953_v51 = vpop.xlane.xlu0 %2952 }
0x160f   : > { %v2954_v52 = vmul.f32 0.03125, %v2953_v51 }
0x1611   : > { %v2955_v53 = vsub.f32 %v7702_v49, %v2954_v52 }
0x1613   : > { %v2956_v54 = vmul.f32 %v2955_v53, %v2955_v53 }
0x1615   : > { %v2957_v55 = vsel %vm439_vm0, %v2956_v54, 0.0 }
0x1616   : > { %2958 = vadd.xlane.f32.xlu1 %v2957_v55  ;;  %v6043_v55 = vld [vmem:[%s8137_s3 + $0x3] ss:$0 sm:$0xff] }
0x16a3   : > { %v2959_v8 = vpop.xlane.xlu1 %2958 }
0x16a4   : > { %v2960_v9 = vmul.f32 0.03125, %v2959_v8 }
0x16a6   : > { %v2961_v11 = vadd.f32 1e-06, %v2960_v9 }
0x16a8   : > { %7118 = vrsqrt.f32 %v2961_v11 }
0x16b2   : > { %v7119_v12 = vpop.eup %7118 }
0x16b3   : > { %v2963_v0 = vmul.f32 %v7119_v12, %v2955_v53 }
0x16b5   : > { %v2968_v15 = vmul.f32 %v6037_v13, %v2963_v0  ;;  %v6047_v13 = vld [vmem:[%s8140_s6 + $0x9] ss:$0 sm:$0xff] }
0x16b7   : > { %v2973_v16 = vadd.f32 %v6038_v14, %v2968_v15 }
0x16b9   : > { %6539 = vmatmul.mubr.msk.f32.vlgmr.msra.gmra.mrb[30].mxu0 %vm439_vm0, %v2973_v16 }
0x16ba   : > { %6568 = vmatprep.mubr.msk.f32.mxu0 %vm7262_vm1, %v7263_v18  ;;  %6880 = vmatpush3.bf16.msra.mxu0 %v6879_v40  ;;  %v3415_v40 = vld [vmem:[#allocation2 + $0x168] sm:$0xff] }
0x16bb   : > { %6881 = vmatprep.subr.bf16.mxu0 %v7261_v10 }
0x16be   : > { %6883 = vmatpush3.bf16.msra.mxu0 %v6882_v48 }
0x16bf   : > { %6884 = vmatprep.subr.bf16.mxu0 %v7261_v10 }
0x178c   : > { %v3052_v23 = vpop.f32.mrb[30].mxu0 }
0x178d   : > { %v3053_v24 = vadd.f32 %v6039_v22, %v3052_v23  ;;  %v6540_v25 = vpop.f32.mrb[31].mxu0 }
0x178f   : > { %v3056_v26 = vmax.f32 %v3053_v24, 0.0 }
0x1791   : > { %6558 = vmatmul.mubr.msk.f32.vlgmr.msra.gmra.mrb[30].mxu1 %vm3070_vm5, %v3056_v26 }
0x1792   : > { %6590 = vmatprep.mubr.msk.f32.mxu1 %vm7262_vm1, %v7263_v18  ;;  %6892 = vmatpush3.bf16.msra.mxu1 %v6891_v43 }
0x1793   : > { %6893 = vmatprep.subr.bf16.mxu1 %v7261_v10 }
0x1864   : > { %v3140_v28 = vpop.f32.mrb[30].mxu1 }
0x1865   : > { %v3141_v29 = vadd.f32 %v6041_v27, %v3140_v28  ;;  %v6559_v30 = vpop.f32.mrb[31].mxu1 }
0x1867   : > { %v7769_v31 = vadd.f32 %v3141_v29, %v7702_v49  ;;  %v3337_v49 = vld [vmem:[#allocation2 + $0x158] sm:$0xff] }
0x1868   : > { %v6894_v50 = vpack.c.bf16 %v3337_v49, %v3336_v46 }
0x1869   : > { %v3147_v32 = vsel %vm439_vm0, %v7769_v31, 0.0 }
0x186a   : > { %3148 = vadd.xlane.f32.xlu0 %v3147_v32  ;;  %6895 = vmatpush3.bf16.msra.mxu1 %v6894_v50 }
0x186b   : > { %6598 = vmatprep.subr.mxu1 %v7263_v18 }
0x18f7   : > { %v3149_v33 = vpop.xlane.xlu0 %3148 }
0x18f8   : > { %v3150_v34 = vmul.f32 0.03125, %v3149_v33 }
0x18fa   : > { %v3151_v35 = vsub.f32 %v7769_v31, %v3150_v34 }
0x18fc   : > { %v3152_v20 = vmul.f32 %v3151_v35, %v3151_v35 }
0x18fe   : > { %v3153_v36 = vsel %vm439_vm0, %v3152_v20, 0.0 }
0x18ff   : > { %3154 = vadd.xlane.f32.xlu0 %v3153_v36 }
0x198c   : > { %v3155_v51 = vpop.xlane.xlu0 %3154 }
0x198d   : > { %v3156_v52 = vmul.f32 0.03125, %v3155_v51 }
0x198f   : > { %v3157_v53 = vadd.f32 1e-06, %v3156_v52 }
0x1991   : > { %7120 = vrsqrt.f32 %v3157_v53 }
0x199b   : > { %v7121_v54 = vpop.eup %7120 }
0x199c   : > { %v3159_v56 = vmul.f32 %v7121_v54, %v3151_v35 }
0x199e   : > { %v3164_v58 = vmul.f32 %v6043_v55, %v3159_v56 }
0x19a0   : > { %v3169_v60 = vadd.f32 %v6044_v47, %v3164_v58 }
0x19a2   : > { %6569 = vmatmul.mubr.msk.f32.vlgmr.msra.gmra.mrb[32].mxu0 %vm439_vm0, %v3169_v60  ;;  %6591 = vmatmul.mubr.msk.f32.vlgmr.msra.gmra.mrb[32].mxu1 %vm439_vm0, %v3169_v60 }
0x19a3   : > { %6886 = vmatpush3.bf16.msra.mxu0 %v6885_v59  ;;  %6579 = vmatprep.mubr.msk.f32.mxu0 %vm7262_vm1, %v7263_v18 }
0x19a4   : > { %6887 = vmatprep.subr.bf16.mxu0 %v7261_v10  ;;  %6600 = vmatprep.mubr.msk.f32.mxu1 %vm7262_vm1, %v7263_v18 }
0x19a7   : > { %6889 = vmatpush3.bf16.msra.mxu0 %v6888_v63 }
0x19a8   : > { %6593 = vmatprep.subr.mxu0 %v7263_v18 }
0x19aa   : > { %6580 = vmatmul.mubr.msk.f32.vlgmr.msra.gmra.mrb[34].mxu0 %vm439_vm0, %v3169_v60 }
0x19ab   : > { %6595 = vmatprep.mubr.msk.f32.mxu0 %vm7262_vm1, %v7263_v18 }
0x1a75   : > { %v3249_v5 = vpop.f32.mrb[32].mxu0  ;;  %v3409_v6 = vpop.f32.mrb[32].mxu1 }
0x1a76   : > { %v3250_v7 = vadd.f32 %v6045_v2, %v3249_v5  ;;  %v7802_v8 = vadd.f32 %v6049_v4, %v3409_v6  ;;  %v6570_v9 = vpop.f32.mrb[33].mxu0  ;;  %v6592_v11 = vpop.f32.mrb[33].mxu1 }
0x1a77   : > { %v3416_v11 = vld [vmem:[#allocation2 + $0x170] sm:$0xff] }
0x1a78   : > { %v7804_v12 = vmul.f32 0.35355338, %v3250_v7  ;;  %6599 = vmatpush3.msra.mxu1 %v7802_v8 }
0x1a79   : > { %6608 = vmatprep.subr.mxu1 %v7263_v18 }
0x1a7a   : > { %3580 = vrot.lane.b32.xlu1 %v7804_v12, %s7264_s25 }
0x1a7d   : > { %v3329_v0 = vpop.f32.mrb[34].mxu0 }
0x1a7e   : > { %v7813_v14 = vadd.f32 %v6047_v13, %v3329_v0  ;;  %v6581_v15 = vpop.f32.mrb[35].mxu0 }
0x1a80   : > { %3582 = vrot.lane.b32.xlu0 %v7813_v14, %s7264_s25  ;;  %6594 = vmatpush3.xpose.msk.msra.mxu0 %vm713_vm2, %v7813_v14 }
0x1a81   : > { %6603 = vmatprep.subr.mxu0 %v7263_v18 }
0x1a83   : > { %6596 = vmatmul.mubr.msk.f32.vlgmr.msra.gmra.mrb[36].mxu0 %vm713_vm2, %v7804_v12 }
0x1a84   : > { %6605 = vmatprep.mubr.msk.f32.mxu0 %vm7262_vm1, %v7263_v18 }
0x1aec   : > { %v3581_v17 = vpop.permute.xlu1 %3580 }
0x1af2   : > { %v3583_v16 = vpop.permute.xlu0 %3582 }
0x1af3   : > { %6604 = vmatpush3.xpose.msk.msra.mxu0 %vm713_vm2, %v3583_v16 }
0x1af4   : > { %6613 = vmatprep.subr.mxu0 %v7263_v18 }
0x1af6   : > { %6606 = vmatmul.mubr.msk.f32.vlgmr.msra.gmra.mrb[38].mxu0 %vm713_vm2, %v3581_v17 }
0x1af7   : > { %6615 = vmatprep.mubr.msk.f32.mxu0 %vm7262_vm1, %v7263_v18  ;;  %6614 = vmatpush3.msra.mxu0 %v3415_v40 }
0x1af8   : > { %6623 = vmatprep.subr.mxu0 %v7263_v18 }
0x1b56   : > { %v3492_v19 = vpop.f32.mrb[36].mxu0 }
0x1b57   : > { %v6597_v21 = vpop.f32.mrb[37].mxu0  ;;  %v3496_v22 = vsel %vm713_vm2, %v3492_v19, -inf }
0x1b58   : > { %3497 = vmax.xlane.f32.xlu0 %v3496_v22 }
0x1bc9   : > { %v3654_v23 = vpop.f32.mrb[38].mxu0 }
0x1bca   : > { %v6607_v24 = vpop.f32.mrb[39].mxu0  ;;  %v3658_v25 = vsel %vm713_vm2, %v3654_v23, -inf }
0x1bcb   : > { %3659 = vmax.xlane.f32.xlu1 %v3658_v25  ;;  %v3417_v24 = vld [vmem:[#allocation2 + $0x178] sm:$0xff] }
0x1bdc   : > { %3894 = vrot.lane.b32.xlu1 %v7813_v14, %s8165_s14 }
0x1be0   : > { %3892 = vrot.lane.b32.xlu1 %v7804_v12, %s8165_s14 }
0x1be5   : > { %v3498_v26 = vpop.xlane.xlu0 %3497 }
0x1be6   : > { %v3499_v27 = vsub.f32 %v3492_v19, %v3498_v26 }
0x1be8   : > { %v3500_v28 = vmul.f32 1.442695, %v3499_v27 }
0x1bea   : > { %7122 = vpow2.f32 %v3500_v28 }
0x1bf4   : > { %v7123_v29 = vpop.eup %7122 }
0x1bf5   : > { %v3502_v30 = vsel %vm713_vm2, %v7123_v29, 0.0 }
0x1bf6   : > { %3503 = vadd.xlane.f32.xlu0 %v3502_v30 }
0x1c58   : > { %v3660_v32 = vpop.xlane.xlu1 %3659 }
0x1c59   : > { %v3661_v33 = vsub.f32 %v3654_v23, %v3660_v32 }
0x1c5b   : > { %v3662_v34 = vmul.f32 1.442695, %v3661_v33  ;;  %v7160_v33 = vld [vmem:[%s7559_s12] sm:$0xff] }
0x1c5c   : > { %v3895_v49 = vpop.permute.xlu1 %3894 }
0x1c5d   : > { %7124 = vpow2.f32 %v3662_v34  ;;  %v6067_v34 = vld [vmem:[%s8140_s6 + $0xb] ss:$0 sm:$0xff] }
0x1c60   : > { %v3893_v52 = vpop.permute.xlu1 %3892 }
0x1c67   : > { %v7125_v35 = vpop.eup %7124 }
0x1c68   : > { %v3664_v20 = vsel %vm713_vm2, %v7125_v35, 0.0 }
0x1c69   : > { %3665 = vadd.xlane.f32.xlu0 %v3664_v20 }
0x1c7f   : > { %3670 = vrot.lane.b32.xlu0 %v7802_v8, %s7264_s25 }
0x1c83   : > { %v3504_v36 = vpop.xlane.xlu0 %3503 }
0x1c84   : > { %7126 = vrcp.f32 %v3504_v36 }
0x1c8e   : > { %v7127_v37 = vpop.eup %7126 }
0x1c8f   : > { %v3506_v38 = vmul.f32 %v7127_v37, %v7123_v29 }
0x1c91   : > { %6601 = vmatmul.mubr.msk.f32.vlgmr.msra.gmra.mrb[34].mxu1 %vm713_vm2, %v3506_v38 }
0x1c92   : > { %6610 = vmatprep.mubr.msk.f32.mxu1 %vm7262_vm1, %v7263_v18 }
0x1cf6   : > { %v3666_v41 = vpop.xlane.xlu0 %3665 }
0x1cf7   : > { %7128 = vrcp.f32 %v3666_v41 }
0x1cfa   : > { %v3671_v42 = vpop.permute.xlu0 %3670 }
0x1cfb   : > { %6609 = vmatpush3.msra.mxu1 %v3671_v42 }
0x1cfc   : > { %6618 = vmatprep.subr.mxu1 %v7263_v18 }
0x1d01   : > { %v7129_v43 = vpop.eup %7128 }
0x1d02   : > { %v3668_v44 = vmul.f32 %v7129_v43, %v7125_v35 }
0x1d04   : > { %6611 = vmatmul.mubr.msk.f32.vlgmr.msra.gmra.mrb[36].mxu1 %vm713_vm2, %v3668_v44 }
0x1d05   : > { %6619 = vmatpush3.msra.mxu1 %v3414_v45  ;;  %6620 = vmatprep.mubr.msk.f32.mxu1 %vm7262_vm1, %v7263_v18 }
0x1d06   : > { %6628 = vmatprep.subr.mxu1 %v7263_v18 }
0x1d64   : > { %v3576_v46 = vpop.f32.mrb[34].mxu1 }
0x1d65   : > { %v6602_v48 = vpop.f32.mrb[35].mxu1  ;;  %6621 = vmatmul.mubr.msk.f32.vlgmr.msra.gmra.mrb[38].mxu1 %vm713_vm2, %v3576_v46  ;;  %v4485_v46 = vld [vmem:[#allocation2 + $0x1a0] sm:$0xff] }
0x1d66   : > { %6630 = vmatprep.mubr.msk.f32.mxu1 %vm7262_vm1, %v7263_v18  ;;  %v4486_v48 = vld [vmem:[#allocation2 + $0x1a8] sm:$0xff] }
0x1dd7   : > { %v3742_v50 = vpop.f32.mrb[36].mxu1 }
0x1dd8   : > { %v6612_v51 = vpop.f32.mrb[37].mxu1  ;;  %6616 = vmatmul.mubr.msk.f32.vlgmr.msra.gmra.mrb[40].mxu0 %vm713_vm2, %v3742_v50  ;;  %v4488_v50 = vld [vmem:[#allocation2 + $0x1b8] sm:$0xff] }
0x1dd9   : > { %6624 = vmatpush3.xpose.msk.msra.mxu0 %vm713_vm2, %v3895_v49  ;;  %6625 = vmatprep.mubr.msk.f32.mxu0 %vm7262_vm1, %v7263_v18  ;;  %v6902_v49 = vpack.c.bf16 %v4486_v48, %v4485_v46 }
0x1dda   : > { %6633 = vmatprep.subr.mxu0 %v7263_v18 }
0x1ddc   : > { %6626 = vmatmul.mubr.msk.f32.vlgmr.msra.gmra.mrb[42].mxu0 %vm713_vm2, %v3893_v52  ;;  %v7161_v52 = vld [vmem:[%s7559_s12 + $0x8] sm:$0xff] }
0x1ddd   : > { %6635 = vmatprep.mubr.msk.f32.mxu0 %vm7262_vm1, %v7263_v18  ;;  %6634 = vmatpush3.msra.mxu0 %v3416_v11 }
0x1dde   : > { %6643 = vmatprep.subr.mxu0 %v7263_v18 }
0x1e38   : > { %v3888_v53 = vpop.f32.mrb[38].mxu1 }
0x1e39   : > { %v6622_v54 = vpop.f32.mrb[39].mxu1 }
0x1e3a   : > { %v4403_v54 = vld [vmem:[#allocation2 + $0x188] sm:$0xff] }
0x1eab   : > { %v3815_v55 = vpop.f32.mrb[40].mxu0 }
0x1eac   : > { %v3889_v56 = vadd.f32 %v3888_v53, %v3815_v55  ;;  %v6617_v3 = vpop.f32.mrb[41].mxu0  ;;  %v4402_v53 = vld [vmem:[#allocation2 + $0x180] sm:$0xff] }
0x1ead   : > { %v6897_v55 = vpack.c.bf16 %v4403_v54, %v4402_v53  ;;  %v4405_v3 = vld [vmem:[#allocation2 + $0x198] sm:$0xff] }
0x1eaf   : > { %v3966_v57 = vpop.f32.mrb[42].mxu0 }
0x1eb0   : > { %v6627_v47 = vpop.f32.mrb[43].mxu0  ;;  %v3970_v58 = vsel %vm713_vm2, %v3966_v57, -inf }
0x1eb1   : > { %3971 = vmax.xlane.f32.xlu1 %v3970_v58 }
0x1ec2   : > { %4133 = vrot.lane.b32.xlu1 %v7813_v14, %s8166_s15 }
0x1ec6   : > { %4131 = vrot.lane.b32.xlu1 %v7804_v12, %s8166_s15 }
0x1f3e   : > { %v3972_v59 = vpop.xlane.xlu1 %3971 }
0x1f3f   : > { %v3973_v60 = vsub.f32 %v3966_v57, %v3972_v59 }
0x1f41   : > { %v3974_v61 = vmul.f32 1.442695, %v3973_v60 }
0x1f42   : > { %v4134_v6 = vpop.permute.xlu1 %4133 }
0x1f43   : > { %7130 = vpow2.f32 %v3974_v61  ;;  %v6068_v61 = vld [vmem:[%s8137_s3 + $0x4] ss:$0 sm:$0xff] }
0x1f46   : > { %v4132_v9 = vpop.permute.xlu1 %4131 }
0x1f4d   : > { %v7131_v62 = vpop.eup %7130 }
0x1f4e   : > { %v3976_v63 = vsel %vm713_vm2, %v7131_v62, 0.0 }
0x1f4f   : > { %3977 = vadd.xlane.f32.xlu0 %v3976_v63  ;;  %v6069_v63 = vld [vmem:[%s8138_s4 + $0x4] ss:$0 sm:$0xff] }
0x1f65   : > { %3981 = vrot.lane.b32.xlu0 %v7802_v8, %s8165_s14 }
0x1fdc   : > { %v3978_v2 = vpop.xlane.xlu0 %3977 }
0x1fdd   : > { %7132 = vrcp.f32 %v3978_v2 }
0x1fe0   : > { %v3982_v4 = vpop.permute.xlu0 %3981 }
0x1fe1   : > { %6629 = vmatpush3.msra.mxu1 %v3982_v4 }
0x1fe2   : > { %6638 = vmatprep.subr.mxu1 %v7263_v18 }
0x1fe7   : > { %v7133_v5 = vpop.eup %7132 }
0x1fe8   : > { %v3980_v7 = vmul.f32 %v7133_v5, %v7131_v62  ;;  %v6072_v5 = vld [vmem:[%s8140_s6 + $0xd] ss:$0 sm:$0xff] }
0x1fea   : > { %6631 = vmatmul.mubr.msk.f32.vlgmr.msra.gmra.mrb[40].mxu1 %vm713_vm2, %v3980_v7 }
0x1feb   : > { %6639 = vmatpush3.xpose.msk.msra.mxu1 %vm713_vm2, %v4134_v6  ;;  %6640 = vmatprep.mubr.msk.f32.mxu1 %vm7262_vm1, %v7263_v18 }
0x1fec   : > { %6648 = vmatprep.subr.mxu1 %v7263_v18 }
0x1fee   : > { %6641 = vmatmul.mubr.msk.f32.vlgmr.msra.gmra.mrb[42].mxu1 %vm713_vm2, %v4132_v9 }
0x1fef   : > { %6650 = vmatprep.mubr.msk.f32.mxu1 %vm7262_vm1, %v7263_v18  ;;  %6649 = vmatpush3.msra.mxu1 %v3417_v24  ;;  %v4570_v24 = vld [vmem:[#allocation2 + $0x1c0] sm:$0xff] }
0x1ff0   : > { %6903 = vmatprep.subr.bf16.mxu1 %v6902_v49 }
0x20bd   : > { %v4053_v12 = vpop.f32.mrb[40].mxu1 }
0x20be   : > { %v6632_v13 = vpop.f32.mrb[41].mxu1  ;;  %6636 = vmatmul.mubr.msk.f32.vlgmr.msra.gmra.mrb[44].mxu0 %vm713_vm2, %v4053_v12 }
0x20bf   : > { %6645 = vmatprep.mubr.msk.f32.mxu0 %vm7262_vm1, %v7263_v18 }
0x20c1   : > { %v4205_v0 = vpop.f32.mrb[42].mxu1 }
0x20c2   : > { %v6642_v14 = vpop.f32.mrb[43].mxu1  ;;  %v4209_v15 = vsel %vm713_vm2, %v4205_v0, -inf }
0x20c3   : > { %4210 = vmax.xlane.f32.xlu0 %v4209_v15  ;;  %v6070_v14 = vld [vmem:[%s8140_s6 + $0xc] ss:$0 sm:$0xff] }
0x20d9   : > { %4220 = vrot.lane.b32.xlu0 %v7802_v8, %s8166_s15 }
0x2150   : > { %v4211_v16 = vpop.xlane.xlu0 %4210 }
0x2151   : > { %v4212_v17 = vsub.f32 %v4205_v0, %v4211_v16 }
0x2153   : > { %v4213_v19 = vmul.f32 1.442695, %v4212_v17 }
0x2154   : > { %v4221_v21 = vpop.permute.xlu0 %4220 }
0x2155   : > { %7134 = vpow2.f32 %v4213_v19  ;;  %6644 = vmatpush3.msra.mxu0 %v4221_v21 }
0x2156   : > { %6896 = vmatprep.subr.bf16.mxu0 %v7261_v10 }
0x215f   : > { %v7135_v22 = vpop.eup %7134 }
0x2160   : > { %v4215_v23 = vsel %vm713_vm2, %v7135_v22, 0.0 }
0x2161   : > { %4216 = vadd.xlane.f32.xlu1 %v4215_v23 }
0x2191   : > { %v4126_v25 = vpop.f32.mrb[44].mxu0 }
0x2192   : > { %v4130_v26 = vadd.f32 %v4126_v25, %v3889_v56  ;;  %v6637_v27 = vpop.f32.mrb[45].mxu0  ;;  %v4404_v56 = vld [vmem:[#allocation2 + $0x190] sm:$0xff]  ;;  %v4571_v25 = vld [vmem:[#allocation2 + $0x1c8] sm:$0xff] }
0x2193   : > { %v6900_v57 = vpack.c.bf16 %v4405_v3, %v4404_v56  ;;  %v6910_v27 = vpack.c.bf16 %v4571_v25, %v4570_v24 }
0x21ee   : > { %v4217_v28 = vpop.xlane.xlu1 %4216 }
0x21ef   : > { %7136 = vrcp.f32 %v4217_v28  ;;  %v4573_v28 = vld [vmem:[#allocation2 + $0x1d8] sm:$0xff] }
0x21f9   : > { %v7137_v8 = vpop.eup %7136 }
0x21fa   : > { %v4219_v29 = vmul.f32 %v7137_v8, %v7135_v22 }
0x21fc   : > { %6646 = vmatmul.mubr.msk.f32.vlgmr.msra.gmra.mrb[46].mxu0 %vm713_vm2, %v4219_v29 }
0x21fd   : > { %6661 = vmatprep.mubr.msk.f32.mxu0 %vm7262_vm1, %v7263_v18  ;;  %6898 = vmatpush3.bf16.msra.mxu0 %v6897_v55 }
0x21fe   : > { %6899 = vmatprep.subr.bf16.mxu0 %v7261_v10 }
0x2201   : > { %6901 = vmatpush3.bf16.msra.mxu0 %v6900_v57 }
0x2202   : > { %6911 = vmatprep.subr.bf16.mxu0 %v6910_v27 }
0x22cf   : > { %v4292_v30 = vpop.f32.mrb[46].mxu0 }
0x22d0   : > { %v6647_v32 = vpop.f32.mrb[47].mxu0  ;;  %6651 = vmatmul.mubr.msk.f32.vlgmr.msra.gmra.mrb[44].mxu1 %vm713_vm2, %v4292_v30 }
0x22d1   : > { %6672 = vmatprep.mubr.msk.f32.mxu1 %vm439_vm0, %v7160_v33  ;;  %6905 = vmatpush3.bf16.msra.mxu1 %v6902_v49 }
0x23a3   : > { %v4365_v35 = vpop.f32.mrb[44].mxu1 }
0x23a4   : > { %v4369_v20 = vadd.f32 %v4365_v35, %v4130_v26  ;;  %v6652_v36 = vpop.f32.mrb[45].mxu1  ;;  %v4572_v26 = vld [vmem:[#allocation2 + $0x1d0] sm:$0xff] }
0x23a5   : > { %v6914_v8 = vpack.c.bf16 %v4573_v28, %v4572_v26 }
0x23a6   : > { %v4374_v37 = vadd.f32 %v6067_v34, %v4369_v20 }
0x23a8   : > { %v7895_v38 = vadd.f32 %v4374_v37, %v7769_v31  ;;  %v4487_v31 = vld [vmem:[#allocation2 + $0x1b0] sm:$0xff] }
0x23a9   : > { %v6906_v51 = vpack.c.bf16 %v4488_v50, %v4487_v31 }
0x23aa   : > { %v4378_v40 = vsel %vm439_vm0, %v7895_v38, 0.0 }
0x23ab   : > { %4379 = vadd.xlane.f32.xlu1 %v4378_v40  ;;  %6907 = vmatprep.subr.bf16.mxu1 %v6906_v51 }
0x23ac   : > { %6909 = vmatpush3.bf16.msra.mxu1 %v6906_v51 }
0x23ad   : > { %6918 = vmatprep.subr.bf16.mxu1 %v7261_v10 }
0x23af   : > { %6673 = vmatmul.mubr.msk.f32.vlgmr.msra.gmra.mrb[46].mxu1 %vm439_vm0, %v7161_v52 }
0x23b0   : > { %6690 = vmatprep.mubr.msk.f32.mxu1 %vm7262_vm1, %v7263_v18 }
0x2438   : > { %v4380_v41 = vpop.xlane.xlu1 %4379 }
0x2439   : > { %v4381_v42 = vmul.f32 0.03125, %v4380_v41 }
0x243b   : > { %v4382_v43 = vsub.f32 %v7895_v38, %v4381_v42 }
0x243d   : > { %v4383_v44 = vmul.f32 %v4382_v43, %v4382_v43 }
0x243f   : > { %v4384_v45 = vsel %vm439_vm0, %v4383_v44, 0.0  ;;  %v6075_v44 = vld [vmem:[%s8140_s6 + $0xe] ss:$0 sm:$0xff] }
0x2440   : > { %4385 = vadd.xlane.f32.xlu1 %v4384_v45 }
0x2482   : > { %v6674_v6 = vpop.f32.mrb[46].mxu1 }
0x2483   : > { %v4566_v7 = vadd.f32 %v6674_v6, %v6072_v5  ;;  %v4560_v9 = vpop.f32.mrb[47].mxu1 }
0x2484   : > { %v4561_v11 = vadd.f32 %v6072_v5, %v4560_v9  ;;  %v4656_v5 = vld [vmem:[#allocation2 + $0x1e8] sm:$0xff] }
0x2486   : > { %v6919_v12 = vpack.c.bf16 %v4566_v7, %v4561_v11  ;;  %v7918_v13 = vpack.i.bf16 %v4566_v7, %v4561_v11 }
0x2488   : > { %7053 = vrot.lane.b32.xlu1 %v7918_v13, %s7264_s25  ;;  %6921 = vmatpush3.bf16.xpose.msk.msra.mxu1 %vm7582_vm3, %v6919_v12 }
0x2489   : > { %6925 = vmatprep.subr.bf16.mxu1 %v7261_v10 }
0x24cd   : > { %v4386_v47 = vpop.xlane.xlu1 %4385 }
0x24ce   : > { %v4387_v58 = vmul.f32 0.03125, %v4386_v47 }
0x24d0   : > { %v4388_v59 = vadd.f32 1e-06, %v4387_v58  ;;  %v4655_v58 = vld [vmem:[#allocation2 + $0x1e0] sm:$0xff] }
0x24d2   : > { %7138 = vrsqrt.f32 %v4388_v59 }
0x24dc   : > { %v7139_v60 = vpop.eup %7138 }
0x24dd   : > { %v4390_v62 = vmul.f32 %v7139_v60, %v4382_v43 }
0x24df   : > { %v4395_v2 = vmul.f32 %v6068_v61, %v4390_v62 }
0x24e1   : > { %v4400_v4 = vadd.f32 %v6069_v63, %v4395_v2 }
0x24e3   : > { %6662 = vmatmul.mubr.msk.f32.vlgmr.msra.gmra.mrb[48].mxu0 %vm439_vm0, %v4400_v4 }
0x24e4   : > { %6683 = vmatprep.mubr.msk.f32.mxu0 %vm439_vm0, %v7160_v33  ;;  %6913 = vmatpush3.bf16.msra.mxu0 %v6910_v27 }
0x24e5   : > { %6915 = vmatprep.subr.bf16.mxu0 %v6914_v8 }
0x24e8   : > { %6917 = vmatpush3.bf16.msra.mxu0 %v6914_v8 }
0x24e9   : > { %6922 = vmatprep.subr.bf16.mxu0 %v7261_v10 }
0x24eb   : > { %6684 = vmatmul.mubr.msk.f32.vlgmr.msra.gmra.mrb[50].mxu0 %vm439_vm0, %v7161_v52 }
0x24ec   : > { %6697 = vmatprep.mubr.msk.f32.mxu0 %vm7262_vm1, %v7263_v18 }
0x24fa   : > { %v7054_v0 = vpop.permute.xlu1 %7053 }
0x24fb   : > { %v7056_v15 = vunpack.i.h.bf16 %v7054_v0  ;;  %v7055_v16 = vunpack.i.l.bf16 %v7054_v0 }
0x24fd   : > { %v6926_v22 = vpack.c.bf16 %v7056_v15, %v7055_v16 }
0x25b6   : > { %v4480_v17 = vpop.f32.mrb[48].mxu0 }
0x25b7   : > { %v4481_v19 = vadd.f32 %v6070_v14, %v4480_v17  ;;  %v6663_v21 = vpop.f32.mrb[49].mxu0 }
0x25b9   : > { %v4660_v23 = vmul.f32 0.35355338, %v4481_v19 }
0x25bb   : > { %4824 = vrot.lane.b32.xlu0 %v4660_v23, %s7264_s25  ;;  %6691 = vmatmul.mubr.msk.f32.vlgmr.msra.gmra.mrb[48].mxu1 %vm713_vm2, %v4660_v23 }
0x25bc   : > { %6928 = vmatpush3.bf16.xpose.msk.msra.mxu1 %vm7582_vm3, %v6926_v22  ;;  %6704 = vmatprep.mubr.msk.f32.mxu1 %vm7262_vm1, %v7263_v18 }
0x25bd   : > { %6719 = vmatprep.subr.mxu1 %v7263_v18 }
0x25be   : > { %v6685_v43 = vpop.f32.mrb[50].mxu0 }
0x25bf   : > { %v4651_v45 = vadd.f32 %v6685_v43, %v6075_v44  ;;  %v4645_v46 = vpop.f32.mrb[51].mxu0 }
0x25c0   : > { %v4646_v48 = vadd.f32 %v6075_v44, %v4645_v46 }
0x25c2   : > { %v7953_v49 = vpack.i.bf16 %v4651_v45, %v4646_v48  ;;  %v6923_v51 = vpack.c.bf16 %v4651_v45, %v4646_v48 }
0x25c4   : > { %6924 = vmatpush3.bf16.msra.mxu0 %v6923_v51 }
0x25c5   : > { %6929 = vmatprep.subr.bf16.mxu0 %v7261_v10 }
0x262d   : > { %v4825_v29 = vpop.permute.xlu0 %4824 }
0x262e   : > { %6705 = vmatmul.mubr.msk.f32.vlgmr.msra.gmra.mrb[50].mxu1 %vm713_vm2, %v4825_v29 }
0x262f   : > { %6721 = vmatprep.mubr.msk.f32.mxu1 %vm7262_vm1, %v7263_v18  ;;  %6720 = vmatpush3.msra.mxu1 %v4655_v58 }
0x2630   : > { %6936 = vmatprep.subr.bf16.mxu1 %v7261_v10 }
0x268e   : > { %v4736_v30 = vpop.f32.mrb[48].mxu1 }
0x268f   : > { %v4737_v32 = vadd.f32 %v4736_v30, %v7618_v1  ;;  %v6692_v33 = vpop.f32.mrb[49].mxu1 }
0x2691   : > { %v4740_v34 = vsel %vm2046_vm4, %v4737_v32, -inf }
0x2692   : > { %4741 = vmax.xlane.f32.xlu0 %v4740_v34 }
0x2701   : > { %v4902_v35 = vpop.f32.mrb[50].mxu1 }
0x2702   : > { %v4903_v20 = vadd.f32 %v4902_v35, %v7618_v1  ;;  %v6706_v36 = vpop.f32.mrb[51].mxu1 }
0x2704   : > { %v4906_v37 = vsel %vm2046_vm4, %v4903_v20, -inf }
0x2705   : > { %4907 = vmax.xlane.f32.xlu1 %v4906_v37 }
0x2716   : > { %7063 = vrot.lane.b32.xlu1 %v7918_v13, %s8165_s14 }
0x271a   : > { %5144 = vrot.lane.b32.xlu1 %v4660_v23, %s8165_s14 }
0x271e   : > { %5390 = vrot.lane.b32.xlu1 %v4660_v23, %s8166_s15 }
0x271f   : > { %v4742_v40 = vpop.xlane.xlu0 %4741 }
0x2720   : > { %v4743_v41 = vsub.f32 %v4737_v32, %v4742_v40 }
0x2722   : > { %v4744_v42 = vmul.f32 1.442695, %v4743_v41 }
0x2724   : > { %7140 = vpow2.f32 %v4744_v42 }
0x272e   : > { %v7141_v31 = vpop.eup %7140 }
0x272f   : > { %v4746_v50 = vsel %vm2046_vm4, %v7141_v31, 0.0 }
0x2730   : > { %4747 = vadd.xlane.f32.xlu0 %v4746_v50 }
0x2792   : > { %v4908_v52 = vpop.xlane.xlu1 %4907 }
0x2793   : > { %v4909_v53 = vsub.f32 %v4903_v20, %v4908_v52 }
0x2795   : > { %v4910_v54 = vmul.f32 1.442695, %v4909_v53  ;;  %v4657_v53 = vld [vmem:[#allocation2 + $0x1f0] sm:$0xff] }
0x2796   : > { %v7064_v9 = vpop.permute.xlu1 %7063 }
0x2797   : > { %7142 = vpow2.f32 %v4910_v54  ;;  %v7066_v11 = vunpack.i.h.bf16 %v7064_v9  ;;  %v7065_v12 = vunpack.i.l.bf16 %v7064_v9 }
0x279a   : > { %v5145_v19 = vpop.permute.xlu1 %5144 }
0x279e   : > { %v5391_v22 = vpop.permute.xlu1 %5390 }
0x27a1   : > { %v7143_v55 = vpop.eup %7142 }
0x27a2   : > { %v4912_v56 = vsel %vm2046_vm4, %v7143_v55, 0.0 }
0x27a3   : > { %4913 = vadd.xlane.f32.xlu0 %v4912_v56 }
0x27b9   : > { %7058 = vrot.lane.b32.xlu0 %v7953_v49, %s7264_s25 }
0x27bd   : > { %v4748_v3 = vpop.xlane.xlu0 %4747  ;;  %7068 = vrot.lane.b32.xlu0 %v7918_v13, %s8166_s15  ;;  %v6933_v13 = vpack.c.bf16 %v7066_v11, %v7065_v12 }
0x27be   : > { %7144 = vrcp.f32 %v4748_v3 }
0x27c8   : > { %v7145_v57 = vpop.eup %7144 }
0x27c9   : > { %v4750_v47 = vmul.f32 %v7145_v57, %v7141_v31 }
0x27cb   : > { %6698 = vmatmul.mubr.msk.f32.vlgmr.msra.gmra.mrb[52].mxu0 %vm2046_vm4, %v4750_v47 }
0x27cc   : > { %6711 = vmatprep.mubr.msk.f32.mxu0 %vm7262_vm1, %v7263_v18 }
0x2830   : > { %v4914_v59 = vpop.xlane.xlu0 %4913 }
0x2831   : > { %7146 = vrcp.f32 %v4914_v59 }
0x2834   : > { %v7059_v60 = vpop.permute.xlu0 %7058 }
0x2835   : > { %v7061_v61 = vunpack.i.h.bf16 %v7059_v60  ;;  %v7060_v62 = vunpack.i.l.bf16 %v7059_v60  ;;  %v4658_v60 = vld [vmem:[#allocation2 + $0x1f8] sm:$0xff] }
0x2837   : > { %v6930_v63 = vpack.c.bf16 %v7061_v61, %v7060_v62 }
0x2838   : > { %v7069_v14 = vpop.permute.xlu0 %7068 }
0x2839   : > { %6931 = vmatpush3.bf16.msra.mxu0 %v6930_v63  ;;  %v7071_v16 = vunpack.i.h.bf16 %v7069_v14  ;;  %v7070_v17 = vunpack.i.l.bf16 %v7069_v14 }
0x283a   : > { %6714 = vmatprep.subr.mxu0 %v7263_v18 }
0x283b   : > { %v7147_v2 = vpop.eup %7146  ;;  %v6940_v21 = vpack.c.bf16 %v7071_v16, %v7070_v17 }
0x283c   : > { %v4916_v4 = vmul.f32 %v7147_v2, %v7143_v55 }
0x283e   : > { %6712 = vmatmul.mubr.msk.f32.vlgmr.msra.gmra.mrb[54].mxu0 %vm2046_vm4, %v4916_v4 }
0x283f   : > { %6715 = vmatpush3.msra.mxu0 %v4656_v5  ;;  %6716 = vmatprep.mubr.msk.f32.mxu0 %vm7262_vm1, %v7263_v18  ;;  %v6098_v5 = vld [vmem:[%s8140_s6 + $0xf] ss:$0 sm:$0xff] }
0x2840   : > { %6932 = vmatprep.subr.bf16.mxu0 %v7261_v10 }
0x289e   : > { %v4820_v6 = vpop.f32.mrb[52].mxu0 }
0x289f   : > { %v6699_v7 = vpop.f32.mrb[53].mxu0  ;;  %6722 = vmatmul.mubr.msk.f32.vlgmr.msra.gmra.mrb[52].mxu1 %vm713_vm2, %v4820_v6 }
0x28a0   : > { %6735 = vmatprep.mubr.msk.f32.mxu1 %vm7262_vm1, %v7263_v18 }
0x2911   : > { %v4994_v0 = vpop.f32.mrb[54].mxu0 }
0x2912   : > { %v6713_v15 = vpop.f32.mrb[55].mxu0  ;;  %6717 = vmatmul.mubr.msk.f32.vlgmr.msra.gmra.mrb[56].mxu0 %vm713_vm2, %v4994_v0 }
0x2913   : > { %6935 = vmatpush3.bf16.xpose.msk.msra.mxu0 %vm7582_vm3, %v6933_v13  ;;  %6728 = vmatprep.mubr.msk.f32.mxu0 %vm7262_vm1, %v7263_v18 }
0x2914   : > { %6939 = vmatprep.subr.bf16.mxu0 %v7261_v10 }
0x291a   : > { %6729 = vmatmul.mubr.msk.f32.vlgmr.msra.gmra.mrb[58].mxu0 %vm713_vm2, %v5145_v19  ;;  %v6102_v19 = vld [vmem:[%s8141_s7 + $0x28] sm:$0xff] }
0x291b   : > { %6942 = vmatpush3.bf16.xpose.msk.msra.mxu0 %vm7582_vm3, %v6940_v21  ;;  %6747 = vmatprep.mubr.msk.f32.mxu0 %vm7262_vm1, %v7263_v18 }
0x291c   : > { %6946 = vmatprep.subr.bf16.mxu0 %v7261_v10 }
0x2922   : > { %6748 = vmatmul.mubr.msk.f32.vlgmr.msra.gmra.mrb[60].mxu0 %vm713_vm2, %v5391_v22  ;;  %v6104_v22 = vld [vmem:[%s8141_s7 + $0x38] sm:$0xff] }
0x2923   : > { %6770 = vmatprep.mubr.msk.f32.mxu0 %vm7262_vm1, %v7263_v18 }
0x2972   : > { %v5140_v23 = vpop.f32.mrb[52].mxu1 }
0x2973   : > { %v6723_v24 = vpop.f32.mrb[53].mxu1 }
0x2974   : > { %v6107_v24 = vld [vmem:[%s8143_s9 + $0x40] sm:$0xff] }
0x29e5   : > { %v5067_v25 = vpop.f32.mrb[56].mxu0 }
0x29e6   : > { %v7989_v26 = vadd.f32 %v5140_v23, %v5067_v25  ;;  %v6718_v27 = vpop.f32.mrb[57].mxu0  ;;  %v6108_v25 = vld [vmem:[%s8143_s9 + $0x48] sm:$0xff] }
0x29e7   : > { %v6953_v27 = vpack.c.bf16 %v6108_v25, %v6107_v24 }
0x29ed   : > { %v5222_v28 = vpop.f32.mrb[58].mxu0 }
0x29ee   : > { %v5223_v39 = vadd.f32 %v5222_v28, %v7618_v1  ;;  %v6730_v8 = vpop.f32.mrb[59].mxu0  ;;  %v6110_v28 = vld [vmem:[%s8143_s9 + $0x58] sm:$0xff] }
0x29ef   : > { %v6111_v8 = vld [vmem:[%s8143_s9 + $0x60] sm:$0xff] }
0x29f0   : > { %v5226_v29 = vsel %vm2046_vm4, %v5223_v39, -inf }
0x29f1   : > { %5227 = vmax.xlane.f32.xlu0 %v5226_v29  ;;  %v6112_v29 = vld [vmem:[%s8143_s9 + $0x68] sm:$0xff] }
0x29f5   : > { %v5468_v30 = vpop.f32.mrb[60].mxu0 }
0x29f6   : > { %v6749_v32 = vpop.f32.mrb[61].mxu0  ;;  %v5469_v42 = vadd.f32 %v5468_v30, %v7618_v1  ;;  %v6959_v30 = vpack.c.bf16 %v6112_v29, %v6111_v8 }
0x29f8   : > { %v5472_v44 = vsel %vm2046_vm4, %v5469_v42, -inf }
0x2a07   : > { %7073 = vrot.lane.b32.xlu0 %v7953_v49, %s8165_s14  ;;  %s416_s14 = sand.u32 1, %s7248_s18  }
0x2a08   : > { %s5866_s26 = scalar_lea.sflag [#allocation4], %s416_s14 }
0x2a7e   : > { %v5228_v33 = vpop.xlane.xlu0 %5227 }
0x2a7f   : > { %v5229_v34 = vsub.f32 %v5223_v39, %v5228_v33 }
0x2a81   : > { %v5230_v35 = vmul.f32 1.442695, %v5229_v34 }
0x2a82   : > { %v7074_v20 = vpop.permute.xlu0 %7073 }
0x2a83   : > { %7148 = vpow2.f32 %v5230_v35  ;;  %v7076_v36 = vunpack.i.h.bf16 %v7074_v20  ;;  %v7075_v37 = vunpack.i.l.bf16 %v7074_v20  ;;  %v6099_v20 = vld [vmem:[%s8137_s3 + $0x5] ss:$0 sm:$0xff] }
0x2a85   : > { %v6937_v40 = vpack.c.bf16 %v7076_v36, %v7075_v37  ;;  %v6100_v37 = vld [vmem:[%s8138_s4 + $0x5] ss:$0 sm:$0xff] }
0x2a87   : > { %6938 = vmatpush3.bf16.msra.mxu1 %v6937_v40 }
0x2a88   : > { %6738 = vmatprep.subr.mxu1 %v7263_v18 }
0x2a8d   : > { %v7149_v41 = vpop.eup %7148 }
0x2a8e   : > { %v5232_v43 = vsel %vm2046_vm4, %v7149_v41, 0.0 }
0x2a8f   : > { %5233 = vadd.xlane.f32.xlu1 %v5232_v43 }
0x2a93   : > { %5473 = vmax.xlane.f32.xlu1 %v5472_v44  ;;  %v6105_v44 = vld [vmem:[%s8142_s8 + $0x1] ss:$0 sm:$0xff] }
0x2b1c   : > { %v5234_v45 = vpop.xlane.xlu1 %5233 }
0x2b1d   : > { %7150 = vrcp.f32 %v5234_v45 }
0x2b20   : > { %v5474_v46 = vpop.xlane.xlu1 %5473 }
0x2b21   : > { %v5475_v48 = vsub.f32 %v5469_v42, %v5474_v46  ;;  %v6114_v42 = vld [vmem:[%s8143_s9 + $0x78] sm:$0xff] }
0x2b23   : > { %v5476_v31 = vmul.f32 1.442695, %v5475_v48 }
0x2b25   : > { %7152 = vpow2.f32 %v5476_v31 }
0x2b27   : > { %v7151_v50 = vpop.eup %7150 }
0x2b28   : > { %v5236_v51 = vmul.f32 %v7151_v50, %v7149_v41  ;;  %v6115_v50 = vld [vmem:[%s8144_s10 + $0x1] ss:$0 sm:$0xff] }
0x2b2a   : > { %6736 = vmatmul.mubr.msk.f32.vlgmr.msra.gmra.mrb[54].mxu1 %vm2046_vm4, %v5236_v51 }
0x2b2b   : > { %6740 = vmatprep.mubr.msk.f32.mxu1 %vm7262_vm1, %v7263_v18  ;;  %6739 = vmatpush3.msra.mxu1 %v4657_v53 }
0x2b2c   : > { %6943 = vmatprep.subr.bf16.mxu1 %v7261_v10 }
0x2b2f   : > { %v7153_v1 = vpop.eup %7152 }
0x2b30   : > { %v5478_v52 = vsel %vm2046_vm4, %v7153_v1, 0.0 }
0x2b31   : > { %5479 = vadd.xlane.f32.xlu1 %v5478_v52 }
0x2b42   : > { %7078 = vrot.lane.b32.xlu1 %v7953_v49, %s8166_s15  ;;  %s5977_s15 = sshll.u32 %s416_s14, 3 }
0x2b43   : > { %s418_s24 = scalar_lea.vmem [#allocation5], %s5977_s15  ;;  %s7194_s15 = sshll.u32 %s7267_s21, 4  ;;  %s7195_s15 = int_to_ptr.vmem [resolvable:$false] %s7194_s15 }
0x2b44   : > { %s5879_s12 = sshll.u32 %s418_s24, 4  ;;  %s7196_s30 = scalar_lea.vmem %s7195_s15, 256  ;;  %s8093_s12 = int_to_ptr.vmem [resolvable:$true] %s5879_s12 }
0x2b45   : > { %s7190_s16 = scalar_lea.vmem %s8093_s12, 128  ;;  %p7197_p2 = scmp.lt.s32.totalorder %s8093_s12, %s7195_s15 }
0x2b46   : > { %p7191_p6 = scmp.ne.s32.totalorder %s8093_s12, %s7190_s16  ;;  %p7198_p3 = scmp.lt.s32.totalorder %s7196_s30, %s7190_s16 }
0x2b48   : > { %p7192_p10 = pnand %p7191_p6, %p8167_p9  ;;  %p7199_p4 = por %p7198_p3, %p7197_p2 }
0x2b4a   : > { %p7193_p12 = pneg %p7192_p10 }
0x2b4c   : > { %p7200_p7 = pnand %p7199_p4, %p7193_p12 }
0x2bbe   : > { %v5480_v54 = vpop.xlane.xlu1 %5479 }
0x2bbf   : > { %7154 = vrcp.f32 %v5480_v54 }
0x2bc2   : > { %v7079_v55 = vpop.permute.xlu1 %7078 }
0x2bc3   : > { %v7081_v56 = vunpack.i.h.bf16 %v7079_v55  ;;  %v7080_v3 = vunpack.i.l.bf16 %v7079_v55 }
0x2bc5   : > { %v6944_v47 = vpack.c.bf16 %v7081_v56, %v7080_v3 }
0x2bc9   : > { %v7155_v57 = vpop.eup %7154 }
0x2bca   : > { %v5482_v49 = vmul.f32 %v7155_v57, %v7153_v1 }
0x2bfd   : > { %v5312_v58 = vpop.f32.mrb[54].mxu1 }
0x2bfe   : > { %v6737_v59 = vpop.f32.mrb[55].mxu1  ;;  %6741 = vmatmul.mubr.msk.f32.vlgmr.msra.gmra.mrb[56].mxu1 %vm713_vm2, %v5312_v58 }
0x2bff   : > { %6945 = vmatpush3.bf16.msra.mxu1 %v6944_v47  ;;  %6754 = vmatprep.mubr.msk.f32.mxu1 %vm7262_vm1, %v7263_v18 }
0x2c00   : > { %6757 = vmatprep.subr.mxu1 %v7263_v18 }
0x2c02   : > { %6755 = vmatmul.mubr.msk.f32.vlgmr.msra.gmra.mrb[58].mxu1 %vm2046_vm4, %v5482_v49 }
0x2c03   : > { %6759 = vmatprep.mubr.msk.f32.mxu1 %vm7262_vm1, %v7263_v18  ;;  %6758 = vmatpush3.msra.mxu1 %v4658_v60 }
0x2c04   : > { %6952 = vmatprep.subr.bf16.mxu1 %v7261_v10 }
0x2cd1   : > { %v5385_v61 = vpop.f32.mrb[56].mxu1 }
0x2cd2   : > { %v5389_v62 = vadd.f32 %v5385_v61, %v7989_v26  ;;  %v6742_v63 = vpop.f32.mrb[57].mxu1  ;;  %v6109_v26 = vld [vmem:[%s8143_s9 + $0x50] sm:$0xff]  ;;  %v6117_v61 = vld [vmem:[%s8137_s3 + $0x6] ss:$0 sm:$0xff] }
0x2cd3   : > { %v6956_v39 = vpack.c.bf16 %v6110_v28, %v6109_v26  ;;  %v6118_v63 = vld [vmem:[%s8138_s4 + $0x6] ss:$0 sm:$0xff] }
0x2cd5   : > { %v5558_v2 = vpop.f32.mrb[58].mxu1 }
0x2cd6   : > { %v6756_v4 = vpop.f32.mrb[59].mxu1  ;;  %6760 = vmatmul.mubr.msk.f32.vlgmr.msra.gmra.mrb[60].mxu1 %vm713_vm2, %v5558_v2 }
0x2cd7   : > { %6789 = vmatprep.mubr.msk.f32.mxu1 %vm7262_vm1, %v7263_v18  ;;  %v6101_v18 = vld [vmem:[%s8141_s7 + $0x20] sm:$0xff]  ;;  %6954 = vmatpush3.bf16.msra.mxu1 %v6953_v27 }
0x2cd8   : > { %v6947_v21 = vpack.c.bf16 %v6102_v19, %v6101_v18  ;;  %6955 = vmatprep.subr.bf16.mxu1 %v7261_v10 }
0x2cda   : > { %6948 = vmatpush3.bf16.msra.mxu0 %v6947_v21 }
0x2cdb   : > { %6949 = vmatprep.subr.bf16.mxu0 %v7261_v10  ;;  %6957 = vmatpush3.bf16.msra.mxu1 %v6956_v39 }
0x2cdc   : > { %6958 = vmatprep.subr.bf16.mxu1 %v7261_v10 }
0x2cdf   : > { %6960 = vmatpush3.bf16.msra.mxu1 %v6959_v30 }
0x2ce0   : > { %6961 = vmatprep.subr.bf16.mxu1 %v7261_v10  ;;  %v6113_v10 = vld [vmem:[%s8143_s9 + $0x70] sm:$0xff] }
0x2ce1   : > { %v6962_v43 = vpack.c.bf16 %v6114_v42, %v6113_v10 }
0x2ce3   : > { %6963 = vmatpush3.bf16.msra.mxu1 %v6962_v43 }
0x2da9   : > { %v5631_v6 = vpop.f32.mrb[60].mxu1 }
0x2daa   : > { %v5635_v7 = vadd.f32 %v5631_v6, %v5389_v62  ;;  %v6761_v9 = vpop.f32.mrb[61].mxu1 }
0x2dac   : > { %v5640_v11 = vadd.f32 %v6098_v5, %v5635_v7 }
0x2dae   : > { %v5641_v12 = vadd.f32 %v5640_v11, %v7895_v38  ;;  %v6103_v38 = vld [vmem:[%s8141_s7 + $0x30] sm:$0xff] }
0x2daf   : > { %v6950_v23 = vpack.c.bf16 %v6104_v22, %v6103_v38 }
0x2db0   : > { %v5644_v13 = vsel %vm439_vm0, %v5641_v12, 0.0 }
0x2db1   : > { %5645 = vadd.xlane.f32.xlu0 %v5644_v13  ;;  %6951 = vmatpush3.bf16.msra.mxu0 %v6950_v23 }
0x2e3e   : > { %v5646_v0 = vpop.xlane.xlu0 %5645 }
0x2e3f   : > { %v5647_v14 = vmul.f32 0.03125, %v5646_v0 }
0x2e41   : > { %v5648_v15 = vsub.f32 %v5641_v12, %v5647_v14 }
0x2e43   : > { %v5649_v16 = vmul.f32 %v5648_v15, %v5648_v15 }
0x2e45   : > { %v5650_v17 = vsel %vm439_vm0, %v5649_v16, 0.0 }
0x2e46   : > { %5651 = vadd.xlane.f32.xlu1 %v5650_v17 }
0x2ed3   : > { %v5652_v32 = vpop.xlane.xlu1 %5651 }
0x2ed4   : > { %v5653_v33 = vmul.f32 0.03125, %v5652_v32 }
0x2ed6   : > { %v5654_v34 = vadd.f32 1e-06, %v5653_v33 }
0x2ed8   : > { %7156 = vrsqrt.f32 %v5654_v34 }
0x2ee2   : > { %v7157_v35 = vpop.eup %7156 }
0x2ee3   : > { %v5656_v36 = vmul.f32 %v7157_v35, %v5648_v15 }
0x2ee5   : > { %v5661_v40 = vmul.f32 %v6099_v20, %v5656_v36 }
0x2ee7   : > { %v5666_v41 = vadd.f32 %v6100_v37, %v5661_v40 }
0x2ee9   : > { %6771 = vmatmul.mubr.msk.f32.vlgmr.msra.gmra.mrb[62].mxu0 %vm439_vm0, %v5666_v41 }
0x2fbc   : > { %v5746_v45 = vpop.f32.mrb[62].mxu0 }
0x2fbd   : > { %v5747_v46 = vadd.f32 %v6105_v44, %v5746_v45  ;;  %v6772_v48 = vpop.f32.mrb[63].mxu0 }
0x2fbf   : > { %v5750_v31 = vmax.f32 %v5747_v46, 0.0 }
0x2fc1   : > { %6790 = vmatmul.mubr.msk.f32.vlgmr.msra.gmra.mrb[62].mxu1 %vm3070_vm5, %v5750_v31 }
0x3094   : > { %v5834_v51 = vpop.f32.mrb[62].mxu1 }
0x3095   : > { %v5835_v1 = vadd.f32 %v6115_v50, %v5834_v51  ;;  %v6791_v52 = vpop.f32.mrb[63].mxu1 }
0x3097   : > { %v5838_v53 = vadd.f32 %v5835_v1, %v5641_v12 }
0x3099   : > { %v5841_v54 = vsel %vm439_vm0, %v5838_v53, 0.0 }
0x309a   : > { %5842 = vadd.xlane.f32.xlu0 %v5841_v54 }
0x3127   : > { %v5843_v55 = vpop.xlane.xlu0 %5842 }
0x3128   : > { %v5844_v56 = vmul.f32 0.03125, %v5843_v55 }
0x312a   : > { %v5845_v3 = vsub.f32 %v5838_v53, %v5844_v56 }
0x312c   : > { %v5846_v57 = vmul.f32 %v5845_v3, %v5845_v3 }
0x312e   : > { %v5847_v47 = vsel %vm439_vm0, %v5846_v57, 0.0 }
0x312f   : > { %5848 = vadd.xlane.f32.xlu0 %v5847_v47 }
0x31bc   : > { %v5849_v58 = vpop.xlane.xlu0 %5848 }
0x31bd   : > { %v5850_v59 = vmul.f32 0.03125, %v5849_v58 }
0x31bf   : > { %v5851_v49 = vadd.f32 1e-06, %v5850_v59 }
0x31c1   : > { %7158 = vrsqrt.f32 %v5851_v49 }
0x31cb   : > { %v7159_v60 = vpop.eup %7158 }
0x31cc   : > { %v5853_v62 = vmul.f32 %v7159_v60, %v5845_v3 }
0x31ce   : > { %v5858_v2 = vmul.f32 %v6117_v61, %v5853_v62 }
0x31d0   : > { %v5863_v4 = vadd.f32 %v6118_v63, %v5858_v2 }
0x31d2   : > { %5864 = vst.msk [vmem:[%s418_s24] sm:$0xff] %vm439_vm0, %v5863_v4 }
0x31d3   : > { %7203 = shalt.err (!%p7200_p7)
}
0x31d4   : > { %s7204_s14 = scalar_lea.hbm %s8091_s0, 128  ;;  %s7208_s24 = scalar_lea.hbm %s8145_s11, 256 }
0x31d5   : > { %p7205_p8 = scmp.ne.s32.totalorder %s8091_s0, %s7204_s14  ;;  %p7209_p1 = scmp.lt.u32.totalorder %s8091_s0, %s8145_s11 }
0x31d6   : > { %p7210_p0 = scmp.lt.u32.totalorder %s7208_s24, %s7204_s14  ;;  %p7212_p6 = scmp.lt.u32.totalorder %s7204_s14, %s8091_s0 }
0x31d7   : > { %p7206_p11 = pnand %p7205_p8, %p8167_p9 }
0x31d8   : > { %p7211_p5 = por %p7210_p0, %p7209_p1 }
0x31d9   : > { %p7207_p13 = pneg %p7206_p11 }
0x31da   : > { %p7213_p10 = por %p7212_p6, %p7211_p5 }
0x31dc   : > { %p7214_p12 = pnand %p7213_p10, %p7207_p13 }
0x31de   : > { %7217 = shalt.err (!%p7214_p12)
}
0x31df   : > { %6968 = dma.vmem_to_hbm [thread:$0]  (%p8167_p9), %s8093_s12, 128, %s8091_s0, %s5866_s26  }
0x31e0 PF: > { %p6980_p2 = scmp.ge.s32.totalorder %s7256_s20, 2  ;;  %s5891_s16 = sand.u32 1, %s7244_s17  }
0x31e1   : > { %p8168_p3 = scmp.ne.s32.totalorder %s8156_s28, 0  ;;  %s5892_s21 = scalar_lea.sflag [#allocation4], %s5891_s16 }
0x31e3   : > { %p6975_p4 = pnand %p6980_p2, %p8168_p3 }
0x31e5   : > { %7239 = dma.done.wait (!%p6975_p4), %s5892_s21, 128  }
0x31e6   : > { %7241 = vsyncadd (!%p6975_p4), %s5892_s21, 4294967168  ;;  %s8169_s15 = sld [smem:[#allocation8_spill]]  ;;  %p22_p7 = scmp.ge.s32.totalorder %s7353_s23, 4  }
0x31e7   : > { %s8170_s17 = smov %s7248_s18  ;;  %s8171_s18 = smov %s7252_s19 }
0x31e8   : > { %s8173_s20 = smov %s7353_s23  ;;  %24 = sbr.rel (!%p22_p7) target bundleno = 6 (0x6), region = 127 }
0x31ec   : > { %s8172_s19 = smov %s8169_s15 }
0x31ef   :  { %5897 = vsyncpa [#allocation3], 1 }
0x31f0   :  { %5899 = vsyncpa [#allocation3 + $0x1], 1 }
0x31f1   :  { %5900 = vsyncpa [#allocation4], 1 }
0x31f2   :  { %5902 = vsyncpa [#allocation4 + $0x1], 1 }

</bundles_post_ra>
